<compile_context>
chip_gen: v6e
topology: v6e:2x2x1
jax: 0.10.0
libtpu: 0.0.40
codegen_flags: <defaults>
</compile_context>

<pallas_src>
import jax
import jax.numpy as jnp
from jax import lax
from jax.experimental import pallas as pl
from jax.experimental.pallas import tpu as pltpu

# ---------------- problem sizes (small, consistent with the module's forward) -------------
B = 4          # batch_size
S = 8          # seq_len
H = 32         # decoder hidden size (num_direction*num_layers = 1)
E_EMB = 16     # decoder word-embedding size
E_ENC = 16     # enc_embedding_size (enc_inputs feature dim)
D_ENC = 32     # enc_outputs feature dim
V = 32         # vocab size
START_IDX = 1  # start token


def _lane_tile(x, reps):
    """Repeat x along the last (lane) axis `reps` times via log2 doubling concats (reps = 2^k)."""
    while reps > 1:
        x = jnp.concatenate([x, x], axis=-1)
        reps //= 2
    return x


def _decoder_kernel(
    enc_h_ref,    # (B, H)        f32   initial h
    enc_c_ref,    # (B, H)        f32   initial c
    eo_wa_ref,    # (B, S*H)      f32   attention keys with Wa folded in, lane index = s*H + h
    eo2_ref,      # (B, D*S)      f32   enc_outputs, lane index = d*S + s
    xg_ref,       # (S, B, 4H)    f32   enc_inputs @ Wx + b  (per-step gate contribution)
    whh_ref,      # (H, 4H)       bf16
    wc_ref,       # (D, 4H)       bf16
    embwe_ref,    # (V, 4H)       bf16  embedding table folded through We
    wo_ref,       # (H, V)        bf16
    bo_ref,       # (1, V)        f32
    seg_s_ref,    # (S*H, S)      bf16  segment-sum selector over h within each s
    seg_d_ref,    # (D*S, D)      bf16  segment-sum selector over s within each d
    out_ref,      # (B, S)        int32
):
    h = enc_h_ref[...]
    c = enc_c_ref[...]
    eo_wa = eo_wa_ref[...]
    eo2 = eo2_ref[...]
    whh = whh_ref[...]
    wc = wc_ref[...]
    embwe = embwe_ref[...]
    wo = wo_ref[...]
    bo = bo_ref[...]
    seg_s = seg_s_ref[...]
    seg_d = seg_d_ref[...]

    vocab_iota = lax.broadcasted_iota(jnp.int32, (B, V), 1)
    gate_lane = lax.broadcasted_iota(jnp.int32, (B, 4 * H), 1)
    is_g = jnp.logical_and(gate_lane >= 2 * H, gate_lane < 3 * H)

    # current word = start token
    onehot = (vocab_iota == START_IDX).astype(jnp.bfloat16)

    ids = []
    for step in range(S):                                         # statically unrolled
        # --- gate contributions that are OFF the h->attention->ctx critical path ---
        g_emb = jnp.dot(onehot, embwe, preferred_element_type=jnp.float32)            # (B, 4H)
        g_hh = jnp.dot(h.astype(jnp.bfloat16), whh, preferred_element_type=jnp.float32)

        # --- dot attention (key projection Wa already folded into eo_wa in the wrapper) ---
        h_rep = _lane_tile(h, S)                                                       # (B, S*H)
        scores = jnp.dot((eo_wa * h_rep).astype(jnp.bfloat16), seg_s,
                         preferred_element_type=jnp.float32)                           # (B, S)
        m = jnp.max(scores, axis=-1, keepdims=True)
        p = jnp.exp(scores - m)
        attn = p * pl.reciprocal(jnp.sum(p, axis=-1, keepdims=True), approx=True)      # (B, S)
        attn_rep = _lane_tile(attn, D_ENC)                                             # (B, D*S)
        ctx = jnp.dot((eo2 * attn_rep).astype(jnp.bfloat16), seg_d,
                      preferred_element_type=jnp.float32)                              # (B, D)

        g_ctx = jnp.dot(ctx.astype(jnp.bfloat16), wc, preferred_element_type=jnp.float32)

        # --- LSTM cell: accumulate split gate matmuls, full-vreg nonlinearities ---
        gates = xg_ref[step] + g_hh + g_ctx + g_emb                                    # (B, 4H)
        act = jnp.where(is_g, jnp.tanh(gates), jax.nn.sigmoid(gates))
        i_g = act[:, 0 * H:1 * H]
        f_g = act[:, 1 * H:2 * H]
        g_g = act[:, 2 * H:3 * H]
        o_g = act[:, 3 * H:4 * H]
        c = f_g * c + i_g * g_g
        h = o_g * jnp.tanh(c)

        # --- vocab projection + fused greedy argmax (single lane max-reduce) ---
        logits = jnp.dot(h.astype(jnp.bfloat16), wo,
                         preferred_element_type=jnp.float32) + bo                      # (B, V)
        li = pltpu.bitcast(logits, jnp.int32)
        # monotone (order-preserving) signed-int key for f32
        key = jnp.where(li >= 0, li, li ^ jnp.int32(0x7FFFFFFF))
        # pack first-max tie-break index into the low 5 bits (low mantissa bits sacrificed)
        key = (key & jnp.int32(-32)) | (jnp.int32(V - 1) - vocab_iota)
        best = jnp.max(key, axis=-1, keepdims=True)                                    # (B, 1)
        idx = jnp.int32(V - 1) - (best & jnp.int32(V - 1))                             # (B, 1)
        ids.append(idx)

        # next-word one-hot for the following step (feeds only g_emb of step+1)
        onehot = (vocab_iota == idx).astype(jnp.bfloat16)

    # single store of the whole decoded sequence
    out_ref[...] = jnp.concatenate(ids, axis=-1).astype(jnp.int32)                     # (B, S)


@jax.jit
def decoder_greedy_with_src_infer(enc_h_n, enc_c_n, enc_outputs, enc_inputs, params):
    """enc_h_n/enc_c_n: (1, B, H); enc_outputs: (S, B, D_ENC); enc_inputs: (S, B, E_ENC).
    Returns decoder_output: (B, S) int32 (same semantics as the torch module)."""
    emb_tbl, wa, we, wx, wc, whh, b, wo, bo = params

    # ---- wrapper-side layout / hoisted batched matmuls (cheap XLA prep, outside the kernel) ----
    enc_h = enc_h_n[0]                                                          # (B, H)
    enc_c = enc_c_n[0]                                                          # (B, H)

    # attention keys with Wa folded in, s-major lane layout: lane = s*H + h
    eo_wa = jnp.einsum('sbd,hd->bsh', enc_outputs, wa).reshape(B, S * H)        # (B, S*H)
    # enc_outputs d-major lane layout for context: lane = d*S + s
    eo2 = jnp.transpose(enc_outputs, (1, 2, 0)).reshape(B, D_ENC * S)           # (B, D*S)
    # step-independent gate contribution (x @ Wx) with the gate bias folded in
    xg = jnp.einsum('sbe,ef->sbf', enc_inputs, wx) + b                          # (S, B, 4H)

    # bf16 single-pass matmul operands
    whh_bf = whh.astype(jnp.bfloat16)                                           # (H, 4H)
    wc_bf = wc.astype(jnp.bfloat16)                                             # (D, 4H)
    embwe_bf = (emb_tbl @ we).astype(jnp.bfloat16)                              # (V, 4H)
    wo_bf = wo.astype(jnp.bfloat16)                                             # (H, V)

    # 0/1 segment-sum selectors (exact in bf16)
    rS = jnp.arange(S * H)[:, None]
    seg_s = (rS // H == jnp.arange(S)[None, :]).astype(jnp.bfloat16)            # (S*H, S)
    rD = jnp.arange(D_ENC * S)[:, None]
    seg_d = (rD // S == jnp.arange(D_ENC)[None, :]).astype(jnp.bfloat16)        # (D*S, D)

    vmem = pl.BlockSpec(memory_space=pltpu.MemorySpace.VMEM)
    n_inputs = 12

    return pl.pallas_call(
        _decoder_kernel,
        out_shape=jax.ShapeDtypeStruct((B, S), jnp.int32),
        in_specs=[vmem] * n_inputs,
        out_specs=pl.BlockSpec(memory_space=pltpu.MemorySpace.VMEM),
    )(enc_h, enc_c, eo_wa, eo2, xg,
      whh_bf, wc_bf, embwe_bf, wo_bf, bo,
      seg_s, seg_d)


def _init_params(key):
    ks = jax.random.split(key, 9)
    scale = 0.2
    emb_tbl = scale * jax.random.normal(ks[0], (V, E_EMB), jnp.float32)
    wa = scale * jax.random.normal(ks[1], (H, D_ENC), jnp.float32)
    we = scale * jax.random.normal(ks[2], (E_EMB, 4 * H), jnp.float32)
    wx = scale * jax.random.normal(ks[3], (E_ENC, 4 * H), jnp.float32)
    wc = scale * jax.random.normal(ks[4], (D_ENC, 4 * H), jnp.float32)
    whh = scale * jax.random.normal(ks[5], (H, 4 * H), jnp.float32)
    b = scale * jax.random.normal(ks[6], (1, 4 * H), jnp.float32)
    wo = scale * jax.random.normal(ks[7], (H, V), jnp.float32)
    bo = scale * jax.random.normal(ks[8], (1, V), jnp.float32)
    return (emb_tbl, wa, we, wx, wc, whh, b, wo, bo)


if __name__ == "__main__":
    key = jax.random.PRNGKey(0)
    k_in, k_par = jax.random.split(key)
    k1, k2, k3, k4 = jax.random.split(k_in, 4)

    enc_h_n = jax.random.normal(k1, (1, B, H), jnp.float32)          # (num_dir*num_layers, batch, hidden)
    enc_c_n = jax.random.normal(k2, (1, B, H), jnp.float32)
    enc_outputs = jax.random.normal(k3, (S, B, D_ENC), jnp.float32)  # (seq_len, batch, _)
    enc_inputs = jax.random.normal(k4, (S, B, E_ENC), jnp.float32)   # (seq_len, batch, enc_emb)

    params = _init_params(k_par)

    out = decoder_greedy_with_src_infer(enc_h_n, enc_c_n, enc_outputs, enc_inputs, params)
    out = jax.block_until_ready(out)

    # sanity: correct shape/dtype and all greedy token ids are valid vocab indices
    assert out.shape == (B, S) and out.dtype == jnp.int32
    assert bool(jnp.all((out >= 0) & (out < V)))
    print("KERNEL_OK")
</pallas_src>

<mosaic_0001>
module attributes {stable_mosaic.version = 11 : i64} {
  func.func @_decoder_kernel(%arg0: memref<4x32xf32, #tpu.memory_space<vmem>>, %arg1: memref<4x32xf32, #tpu.memory_space<vmem>>, %arg2: memref<4x256xf32, #tpu.memory_space<vmem>>, %arg3: memref<4x256xf32, #tpu.memory_space<vmem>>, %arg4: memref<8x4x128xf32, #tpu.memory_space<vmem>>, %arg5: memref<32x128xbf16, #tpu.memory_space<vmem>>, %arg6: memref<32x128xbf16, #tpu.memory_space<vmem>>, %arg7: memref<32x128xbf16, #tpu.memory_space<vmem>>, %arg8: memref<32x32xbf16, #tpu.memory_space<vmem>>, %arg9: memref<1x32xf32, #tpu.memory_space<vmem>>, %arg10: memref<256x8xbf16, #tpu.memory_space<vmem>>, %arg11: memref<256x32xbf16, #tpu.memory_space<vmem>>, %arg12: memref<4x8xi32, #tpu.memory_space<vmem>>) attributes {dimension_semantics = [], scalar_prefetch = 0 : i64, scratch_operands = 0 : i64, tpu.core_type = #tpu.core_type<tc>} {
    %c0 = arith.constant 0 : index
    %c0_0 = arith.constant 0 : index
    %0 = vector.load %arg0[%c0, %c0_0] : memref<4x32xf32, #tpu.memory_space<vmem>>, vector<4x32xf32>
    %c0_1 = arith.constant 0 : index
    %c0_2 = arith.constant 0 : index
    %1 = vector.load %arg1[%c0_1, %c0_2] : memref<4x32xf32, #tpu.memory_space<vmem>>, vector<4x32xf32>
    %c0_3 = arith.constant 0 : index
    %c0_4 = arith.constant 0 : index
    %2 = vector.load %arg2[%c0_3, %c0_4] : memref<4x256xf32, #tpu.memory_space<vmem>>, vector<4x256xf32>
    %c0_5 = arith.constant 0 : index
    %c0_6 = arith.constant 0 : index
    %3 = vector.load %arg3[%c0_5, %c0_6] : memref<4x256xf32, #tpu.memory_space<vmem>>, vector<4x256xf32>
    %c0_7 = arith.constant 0 : index
    %c0_8 = arith.constant 0 : index
    %4 = vector.load %arg5[%c0_7, %c0_8] : memref<32x128xbf16, #tpu.memory_space<vmem>>, vector<32x128xbf16>
    %c0_9 = arith.constant 0 : index
    %c0_10 = arith.constant 0 : index
    %5 = vector.load %arg6[%c0_9, %c0_10] : memref<32x128xbf16, #tpu.memory_space<vmem>>, vector<32x128xbf16>
    %c0_11 = arith.constant 0 : index
    %c0_12 = arith.constant 0 : index
    %6 = vector.load %arg7[%c0_11, %c0_12] : memref<32x128xbf16, #tpu.memory_space<vmem>>, vector<32x128xbf16>
    %c0_13 = arith.constant 0 : index
    %c0_14 = arith.constant 0 : index
    %7 = vector.load %arg8[%c0_13, %c0_14] : memref<32x32xbf16, #tpu.memory_space<vmem>>, vector<32x32xbf16>
    %c0_15 = arith.constant 0 : index
    %c0_16 = arith.constant 0 : index
    %8 = vector.load %arg9[%c0_15, %c0_16] : memref<1x32xf32, #tpu.memory_space<vmem>>, vector<1x32xf32>
    %c0_17 = arith.constant 0 : index
    %c0_18 = arith.constant 0 : index
    %9 = vector.load %arg10[%c0_17, %c0_18] : memref<256x8xbf16, #tpu.memory_space<vmem>>, vector<256x8xbf16>
    %c0_19 = arith.constant 0 : index
    %c0_20 = arith.constant 0 : index
    %10 = vector.load %arg11[%c0_19, %c0_20] : memref<256x32xbf16, #tpu.memory_space<vmem>>, vector<256x32xbf16>
    %11 = tpu.iota {dimensions = array<i32: 1>} : vector<4x32xi32>
    %12 = tpu.iota {dimensions = array<i32: 1>} : vector<4x128xi32>
    %c64_i32 = arith.constant 64 : i32
    %13 = vector.broadcast %c64_i32 : i32 to vector<4x128xi32>
    %14 = arith.cmpi sge, %12, %13 : vector<4x128xi32>
    %c96_i32 = arith.constant 96 : i32
    %15 = vector.broadcast %c96_i32 : i32 to vector<4x128xi32>
    %16 = arith.cmpi slt, %12, %15 : vector<4x128xi32>
    %17 = arith.andi %14, %16 : vector<4x128xi1>
    %c1_i32 = arith.constant 1 : i32
    %18 = vector.broadcast %c1_i32 : i32 to vector<4x32xi32>
    %19 = arith.cmpi eq, %11, %18 : vector<4x32xi32>
    %20 = arith.extui %19 : vector<4x32xi1> to vector<4x32xi32>
    %21 = arith.sitofp %20 : vector<4x32xi32> to vector<4x32xf32>
    %22 = arith.truncf %21 : vector<4x32xf32> to vector<4x32xbf16>
    %cst = arith.constant dense<0.000000e+00> : vector<4x128xf32>
    %23 = tpu.matmul %22, %6, %cst {dimension_numbers = #tpu.dot_dimension_numbers<[1], [0], [0], [1], [0, 0, 1, 1], [], []>} : vector<4x32xbf16>, vector<32x128xbf16>, vector<4x128xf32> -> vector<4x128xf32>
    %24 = arith.truncf %0 : vector<4x32xf32> to vector<4x32xbf16>
    %cst_21 = arith.constant dense<0.000000e+00> : vector<4x128xf32>
    %25 = tpu.matmul %24, %4, %cst_21 {dimension_numbers = #tpu.dot_dimension_numbers<[1], [0], [0], [1], [0, 0, 1, 1], [], []>} : vector<4x32xbf16>, vector<32x128xbf16>, vector<4x128xf32> -> vector<4x128xf32>
    %26 = tpu.concatenate %0, %0 in 1 : vector<4x32xf32>, vector<4x32xf32> -> vector<4x64xf32>
    %27 = tpu.concatenate %26, %26 in 1 : vector<4x64xf32>, vector<4x64xf32> -> vector<4x128xf32>
    %28 = tpu.concatenate %27, %27 in 1 : vector<4x128xf32>, vector<4x128xf32> -> vector<4x256xf32>
    %29 = arith.mulf %2, %28 : vector<4x256xf32>
    %30 = arith.truncf %29 : vector<4x256xf32> to vector<4x256xbf16>
    %cst_22 = arith.constant dense<0.000000e+00> : vector<4x8xf32>
    %31 = tpu.matmul %30, %9, %cst_22 {dimension_numbers = #tpu.dot_dimension_numbers<[1], [0], [0], [1], [0, 0, 1, 1], [], []>} : vector<4x256xbf16>, vector<256x8xbf16>, vector<4x8xf32> -> vector<4x8xf32>
    %cst_23 = arith.constant dense<0xFF800000> : vector<4xf32>
    %32 = vector.multi_reduction <maximumf>, %31, %cst_23 [1] : vector<4x8xf32> to vector<4xf32>
    %33 = vector.shape_cast %32 : vector<4xf32> to vector<4x1xf32>
    %34 = vector.broadcast %33 : vector<4x1xf32> to vector<4x8xf32>
    %35 = arith.subf %31, %34 : vector<4x8xf32>
    %36 = math.exp %35 : vector<4x8xf32>
    %cst_24 = arith.constant dense<0.000000e+00> : vector<4xf32>
    %37 = vector.multi_reduction <add>, %36, %cst_24 [1] : vector<4x8xf32> to vector<4xf32>
    %38 = vector.shape_cast %37 : vector<4xf32> to vector<4x1xf32>
    %39 = tpu.reciprocal %38 {approx = true} : vector<4x1xf32> -> vector<4x1xf32>
    %40 = vector.broadcast %39 : vector<4x1xf32> to vector<4x8xf32>
    %41 = arith.mulf %36, %40 : vector<4x8xf32>
    %42 = tpu.concatenate %41, %41 in 1 : vector<4x8xf32>, vector<4x8xf32> -> vector<4x16xf32>
    %43 = tpu.concatenate %42, %42 in 1 : vector<4x16xf32>, vector<4x16xf32> -> vector<4x32xf32>
    %44 = tpu.concatenate %43, %43 in 1 : vector<4x32xf32>, vector<4x32xf32> -> vector<4x64xf32>
    %45 = tpu.concatenate %44, %44 in 1 : vector<4x64xf32>, vector<4x64xf32> -> vector<4x128xf32>
    %46 = tpu.concatenate %45, %45 in 1 : vector<4x128xf32>, vector<4x128xf32> -> vector<4x256xf32>
    %47 = arith.mulf %3, %46 : vector<4x256xf32>
    %48 = arith.truncf %47 : vector<4x256xf32> to vector<4x256xbf16>
    %cst_25 = arith.constant dense<0.000000e+00> : vector<4x32xf32>
    %49 = tpu.matmul %48, %10, %cst_25 {dimension_numbers = #tpu.dot_dimension_numbers<[1], [0], [0], [1], [0, 0, 1, 1], [], []>} : vector<4x256xbf16>, vector<256x32xbf16>, vector<4x32xf32> -> vector<4x32xf32>
    %50 = arith.truncf %49 : vector<4x32xf32> to vector<4x32xbf16>
    %cst_26 = arith.constant dense<0.000000e+00> : vector<4x128xf32>
    %51 = tpu.matmul %50, %5, %cst_26 {dimension_numbers = #tpu.dot_dimension_numbers<[1], [0], [0], [1], [0, 0, 1, 1], [], []>} : vector<4x32xbf16>, vector<32x128xbf16>, vector<4x128xf32> -> vector<4x128xf32>
    %c0_27 = arith.constant 0 : index
    %c0_28 = arith.constant 0 : index
    %c0_29 = arith.constant 0 : index
    %52 = vector.load %arg4[%c0_27, %c0_28, %c0_29] : memref<8x4x128xf32, #tpu.memory_space<vmem>>, vector<1x4x128xf32>
    %53 = vector.shape_cast %52 : vector<1x4x128xf32> to vector<4x128xf32>
    %54 = arith.addf %53, %25 : vector<4x128xf32>
    %55 = arith.addf %54, %51 : vector<4x128xf32>
    %56 = arith.addf %55, %23 : vector<4x128xf32>
    %57 = math.tanh %56 : vector<4x128xf32>
    %58 = arith.negf %56 : vector<4x128xf32>
    %59 = math.exp %58 : vector<4x128xf32>
    %cst_30 = arith.constant 1.000000e+00 : f32
    %60 = vector.broadcast %cst_30 : f32 to vector<4x128xf32>
    %61 = arith.addf %60, %59 : vector<4x128xf32>
    %62 = arith.divf %60, %61 : vector<4x128xf32>
    %63 = arith.select %17, %57, %62 : vector<4x128xi1>, vector<4x128xf32>
    %64 = vector.extract_strided_slice %63 {offsets = [0, 0], sizes = [4, 32], strides = [1, 1]} : vector<4x128xf32> to vector<4x32xf32>
    %65 = vector.extract_strided_slice %63 {offsets = [0, 32], sizes = [4, 32], strides = [1, 1]} : vector<4x128xf32> to vector<4x32xf32>
    %66 = vector.extract_strided_slice %63 {offsets = [0, 64], sizes = [4, 32], strides = [1, 1]} : vector<4x128xf32> to vector<4x32xf32>
    %67 = vector.extract_strided_slice %63 {offsets = [0, 96], sizes = [4, 32], strides = [1, 1]} : vector<4x128xf32> to vector<4x32xf32>
    %68 = arith.mulf %65, %1 : vector<4x32xf32>
    %69 = arith.mulf %64, %66 : vector<4x32xf32>
    %70 = arith.addf %68, %69 : vector<4x32xf32>
    %71 = math.tanh %70 : vector<4x32xf32>
    %72 = arith.mulf %67, %71 : vector<4x32xf32>
    %73 = arith.truncf %72 : vector<4x32xf32> to vector<4x32xbf16>
    %cst_31 = arith.constant dense<0.000000e+00> : vector<4x32xf32>
    %74 = tpu.matmul %73, %7, %cst_31 {dimension_numbers = #tpu.dot_dimension_numbers<[1], [0], [0], [1], [0, 0, 1, 1], [], []>} : vector<4x32xbf16>, vector<32x32xbf16>, vector<4x32xf32> -> vector<4x32xf32>
    %75 = vector.broadcast %8 : vector<1x32xf32> to vector<4x32xf32>
    %76 = arith.addf %74, %75 : vector<4x32xf32>
    %77 = tpu.bitcast %76 : vector<4x32xf32> -> vector<4x32xi32>
    %c0_i32 = arith.constant 0 : i32
    %78 = vector.broadcast %c0_i32 : i32 to vector<4x32xi32>
    %79 = arith.cmpi sge, %77, %78 : vector<4x32xi32>
    %c2147483647_i32 = arith.constant 2147483647 : i32
    %80 = vector.broadcast %c2147483647_i32 : i32 to vector<4x32xi32>
    %81 = arith.xori %77, %80 : vector<4x32xi32>
    %82 = arith.select %79, %77, %81 : vector<4x32xi1>, vector<4x32xi32>
    %c-32_i32 = arith.constant -32 : i32
    %83 = vector.broadcast %c-32_i32 : i32 to vector<4x32xi32>
    %84 = arith.andi %82, %83 : vector<4x32xi32>
    %c31_i32 = arith.constant 31 : i32
    %85 = vector.broadcast %c31_i32 : i32 to vector<4x32xi32>
    %86 = arith.subi %85, %11 : vector<4x32xi32>
    %87 = arith.ori %84, %86 : vector<4x32xi32>
    %cst_32 = arith.constant dense<-2147483648> : vector<4xi32>
    %88 = vector.multi_reduction <maxsi>, %87, %cst_32 [1] : vector<4x32xi32> to vector<4xi32>
    %89 = vector.shape_cast %88 : vector<4xi32> to vector<4x1xi32>
    %c31_i32_33 = arith.constant 31 : i32
    %90 = vector.broadcast %c31_i32_33 : i32 to vector<4x1xi32>
    %91 = arith.andi %89, %90 : vector<4x1xi32>
    %c31_i32_34 = arith.constant 31 : i32
    %92 = vector.broadcast %c31_i32_34 : i32 to vector<4x1xi32>
    %93 = arith.subi %92, %91 : vector<4x1xi32>
    %94 = vector.broadcast %93 : vector<4x1xi32> to vector<4x32xi32>
    %95 = arith.cmpi eq, %11, %94 : vector<4x32xi32>
    %96 = arith.extui %95 : vector<4x32xi1> to vector<4x32xi32>
    %97 = arith.sitofp %96 : vector<4x32xi32> to vector<4x32xf32>
    %98 = arith.truncf %97 : vector<4x32xf32> to vector<4x32xbf16>
    %cst_35 = arith.constant dense<0.000000e+00> : vector<4x128xf32>
    %99 = tpu.matmul %98, %6, %cst_35 {dimension_numbers = #tpu.dot_dimension_numbers<[1], [0], [0], [1], [0, 0, 1, 1], [], []>} : vector<4x32xbf16>, vector<32x128xbf16>, vector<4x128xf32> -> vector<4x128xf32>
    %100 = arith.truncf %72 : vector<4x32xf32> to vector<4x32xbf16>
    %cst_36 = arith.constant dense<0.000000e+00> : vector<4x128xf32>
    %101 = tpu.matmul %100, %4, %cst_36 {dimension_numbers = #tpu.dot_dimension_numbers<[1], [0], [0], [1], [0, 0, 1, 1], [], []>} : vector<4x32xbf16>, vector<32x128xbf16>, vector<4x128xf32> -> vector<4x128xf32>
    %102 = tpu.concatenate %72, %72 in 1 : vector<4x32xf32>, vector<4x32xf32> -> vector<4x64xf32>
    %103 = tpu.concatenate %102, %102 in 1 : vector<4x64xf32>, vector<4x64xf32> -> vector<4x128xf32>
    %104 = tpu.concatenate %103, %103 in 1 : vector<4x128xf32>, vector<4x128xf32> -> vector<4x256xf32>
    %105 = arith.mulf %2, %104 : vector<4x256xf32>
    %106 = arith.truncf %105 : vector<4x256xf32> to vector<4x256xbf16>
    %cst_37 = arith.constant dense<0.000000e+00> : vector<4x8xf32>
    %107 = tpu.matmul %106, %9, %cst_37 {dimension_numbers = #tpu.dot_dimension_numbers<[1], [0], [0], [1], [0, 0, 1, 1], [], []>} : vector<4x256xbf16>, vector<256x8xbf16>, vector<4x8xf32> -> vector<4x8xf32>
    %cst_38 = arith.constant dense<0xFF800000> : vector<4xf32>
    %108 = vector.multi_reduction <maximumf>, %107, %cst_38 [1] : vector<4x8xf32> to vector<4xf32>
    %109 = vector.shape_cast %108 : vector<4xf32> to vector<4x1xf32>
    %110 = vector.broadcast %109 : vector<4x1xf32> to vector<4x8xf32>
    %111 = arith.subf %107, %110 : vector<4x8xf32>
    %112 = math.exp %111 : vector<4x8xf32>
    %cst_39 = arith.constant dense<0.000000e+00> : vector<4xf32>
    %113 = vector.multi_reduction <add>, %112, %cst_39 [1] : vector<4x8xf32> to vector<4xf32>
    %114 = vector.shape_cast %113 : vector<4xf32> to vector<4x1xf32>
    %115 = tpu.reciprocal %114 {approx = true} : vector<4x1xf32> -> vector<4x1xf32>
    %116 = vector.broadcast %115 : vector<4x1xf32> to vector<4x8xf32>
    %117 = arith.mulf %112, %116 : vector<4x8xf32>
    %118 = tpu.concatenate %117, %117 in 1 : vector<4x8xf32>, vector<4x8xf32> -> vector<4x16xf32>
    %119 = tpu.concatenate %118, %118 in 1 : vector<4x16xf32>, vector<4x16xf32> -> vector<4x32xf32>
    %120 = tpu.concatenate %119, %119 in 1 : vector<4x32xf32>, vector<4x32xf32> -> vector<4x64xf32>
    %121 = tpu.concatenate %120, %120 in 1 : vector<4x64xf32>, vector<4x64xf32> -> vector<4x128xf32>
    %122 = tpu.concatenate %121, %121 in 1 : vector<4x128xf32>, vector<4x128xf32> -> vector<4x256xf32>
    %123 = arith.mulf %3, %122 : vector<4x256xf32>
    %124 = arith.truncf %123 : vector<4x256xf32> to vector<4x256xbf16>
    %cst_40 = arith.constant dense<0.000000e+00> : vector<4x32xf32>
    %125 = tpu.matmul %124, %10, %cst_40 {dimension_numbers = #tpu.dot_dimension_numbers<[1], [0], [0], [1], [0, 0, 1, 1], [], []>} : vector<4x256xbf16>, vector<256x32xbf16>, vector<4x32xf32> -> vector<4x32xf32>
    %126 = arith.truncf %125 : vector<4x32xf32> to vector<4x32xbf16>
    %cst_41 = arith.constant dense<0.000000e+00> : vector<4x128xf32>
    %127 = tpu.matmul %126, %5, %cst_41 {dimension_numbers = #tpu.dot_dimension_numbers<[1], [0], [0], [1], [0, 0, 1, 1], [], []>} : vector<4x32xbf16>, vector<32x128xbf16>, vector<4x128xf32> -> vector<4x128xf32>
    %c1 = arith.constant 1 : index
    %c0_42 = arith.constant 0 : index
    %c0_43 = arith.constant 0 : index
    %128 = vector.load %arg4[%c1, %c0_42, %c0_43] : memref<8x4x128xf32, #tpu.memory_space<vmem>>, vector<1x4x128xf32>
    %129 = vector.shape_cast %128 : vector<1x4x128xf32> to vector<4x128xf32>
    %130 = arith.addf %129, %101 : vector<4x128xf32>
    %131 = arith.addf %130, %127 : vector<4x128xf32>
    %132 = arith.addf %131, %99 : vector<4x128xf32>
    %133 = math.tanh %132 : vector<4x128xf32>
    %134 = arith.negf %132 : vector<4x128xf32>
    %135 = math.exp %134 : vector<4x128xf32>
    %cst_44 = arith.constant 1.000000e+00 : f32
    %136 = vector.broadcast %cst_44 : f32 to vector<4x128xf32>
    %137 = arith.addf %136, %135 : vector<4x128xf32>
    %138 = arith.divf %136, %137 : vector<4x128xf32>
    %139 = arith.select %17, %133, %138 : vector<4x128xi1>, vector<4x128xf32>
    %140 = vector.extract_strided_slice %139 {offsets = [0, 0], sizes = [4, 32], strides = [1, 1]} : vector<4x128xf32> to vector<4x32xf32>
    %141 = vector.extract_strided_slice %139 {offsets = [0, 32], sizes = [4, 32], strides = [1, 1]} : vector<4x128xf32> to vector<4x32xf32>
    %142 = vector.extract_strided_slice %139 {offsets = [0, 64], sizes = [4, 32], strides = [1, 1]} : vector<4x128xf32> to vector<4x32xf32>
    %143 = vector.extract_strided_slice %139 {offsets = [0, 96], sizes = [4, 32], strides = [1, 1]} : vector<4x128xf32> to vector<4x32xf32>
    %144 = arith.mulf %141, %70 : vector<4x32xf32>
    %145 = arith.mulf %140, %142 : vector<4x32xf32>
    %146 = arith.addf %144, %145 : vector<4x32xf32>
    %147 = math.tanh %146 : vector<4x32xf32>
    %148 = arith.mulf %143, %147 : vector<4x32xf32>
    %149 = arith.truncf %148 : vector<4x32xf32> to vector<4x32xbf16>
    %cst_45 = arith.constant dense<0.000000e+00> : vector<4x32xf32>
    %150 = tpu.matmul %149, %7, %cst_45 {dimension_numbers = #tpu.dot_dimension_numbers<[1], [0], [0], [1], [0, 0, 1, 1], [], []>} : vector<4x32xbf16>, vector<32x32xbf16>, vector<4x32xf32> -> vector<4x32xf32>
    %151 = vector.broadcast %8 : vector<1x32xf32> to vector<4x32xf32>
    %152 = arith.addf %150, %151 : vector<4x32xf32>
    %153 = tpu.bitcast %152 : vector<4x32xf32> -> vector<4x32xi32>
    %c0_i32_46 = arith.constant 0 : i32
    %154 = vector.broadcast %c0_i32_46 : i32 to vector<4x32xi32>
    %155 = arith.cmpi sge, %153, %154 : vector<4x32xi32>
    %c2147483647_i32_47 = arith.constant 2147483647 : i32
    %156 = vector.broadcast %c2147483647_i32_47 : i32 to vector<4x32xi32>
    %157 = arith.xori %153, %156 : vector<4x32xi32>
    %158 = arith.select %155, %153, %157 : vector<4x32xi1>, vector<4x32xi32>
    %c-32_i32_48 = arith.constant -32 : i32
    %159 = vector.broadcast %c-32_i32_48 : i32 to vector<4x32xi32>
    %160 = arith.andi %158, %159 : vector<4x32xi32>
    %c31_i32_49 = arith.constant 31 : i32
    %161 = vector.broadcast %c31_i32_49 : i32 to vector<4x32xi32>
    %162 = arith.subi %161, %11 : vector<4x32xi32>
    %163 = arith.ori %160, %162 : vector<4x32xi32>
    %cst_50 = arith.constant dense<-2147483648> : vector<4xi32>
    %164 = vector.multi_reduction <maxsi>, %163, %cst_50 [1] : vector<4x32xi32> to vector<4xi32>
    %165 = vector.shape_cast %164 : vector<4xi32> to vector<4x1xi32>
    %c31_i32_51 = arith.constant 31 : i32
    %166 = vector.broadcast %c31_i32_51 : i32 to vector<4x1xi32>
    %167 = arith.andi %165, %166 : vector<4x1xi32>
    %c31_i32_52 = arith.constant 31 : i32
    %168 = vector.broadcast %c31_i32_52 : i32 to vector<4x1xi32>
    %169 = arith.subi %168, %167 : vector<4x1xi32>
    %170 = vector.broadcast %169 : vector<4x1xi32> to vector<4x32xi32>
    %171 = arith.cmpi eq, %11, %170 : vector<4x32xi32>
    %172 = arith.extui %171 : vector<4x32xi1> to vector<4x32xi32>
    %173 = arith.sitofp %172 : vector<4x32xi32> to vector<4x32xf32>
    %174 = arith.truncf %173 : vector<4x32xf32> to vector<4x32xbf16>
    %cst_53 = arith.constant dense<0.000000e+00> : vector<4x128xf32>
    %175 = tpu.matmul %174, %6, %cst_53 {dimension_numbers = #tpu.dot_dimension_numbers<[1], [0], [0], [1], [0, 0, 1, 1], [], []>} : vector<4x32xbf16>, vector<32x128xbf16>, vector<4x128xf32> -> vector<4x128xf32>
    %176 = arith.truncf %148 : vector<4x32xf32> to vector<4x32xbf16>
    %cst_54 = arith.constant dense<0.000000e+00> : vector<4x128xf32>
    %177 = tpu.matmul %176, %4, %cst_54 {dimension_numbers = #tpu.dot_dimension_numbers<[1], [0], [0], [1], [0, 0, 1, 1], [], []>} : vector<4x32xbf16>, vector<32x128xbf16>, vector<4x128xf32> -> vector<4x128xf32>
    %178 = tpu.concatenate %148, %148 in 1 : vector<4x32xf32>, vector<4x32xf32> -> vector<4x64xf32>
    %179 = tpu.concatenate %178, %178 in 1 : vector<4x64xf32>, vector<4x64xf32> -> vector<4x128xf32>
    %180 = tpu.concatenate %179, %179 in 1 : vector<4x128xf32>, vector<4x128xf32> -> vector<4x256xf32>
    %181 = arith.mulf %2, %180 : vector<4x256xf32>
    %182 = arith.truncf %181 : vector<4x256xf32> to vector<4x256xbf16>
    %cst_55 = arith.constant dense<0.000000e+00> : vector<4x8xf32>
    %183 = tpu.matmul %182, %9, %cst_55 {dimension_numbers = #tpu.dot_dimension_numbers<[1], [0], [0], [1], [0, 0, 1, 1], [], []>} : vector<4x256xbf16>, vector<256x8xbf16>, vector<4x8xf32> -> vector<4x8xf32>
    %cst_56 = arith.constant dense<0xFF800000> : vector<4xf32>
    %184 = vector.multi_reduction <maximumf>, %183, %cst_56 [1] : vector<4x8xf32> to vector<4xf32>
    %185 = vector.shape_cast %184 : vector<4xf32> to vector<4x1xf32>
    %186 = vector.broadcast %185 : vector<4x1xf32> to vector<4x8xf32>
    %187 = arith.subf %183, %186 : vector<4x8xf32>
    %188 = math.exp %187 : vector<4x8xf32>
    %cst_57 = arith.constant dense<0.000000e+00> : vector<4xf32>
    %189 = vector.multi_reduction <add>, %188, %cst_57 [1] : vector<4x8xf32> to vector<4xf32>
    %190 = vector.shape_cast %189 : vector<4xf32> to vector<4x1xf32>
    %191 = tpu.reciprocal %190 {approx = true} : vector<4x1xf32> -> vector<4x1xf32>
    %192 = vector.broadcast %191 : vector<4x1xf32> to vector<4x8xf32>
    %193 = arith.mulf %188, %192 : vector<4x8xf32>
    %194 = tpu.concatenate %193, %193 in 1 : vector<4x8xf32>, vector<4x8xf32> -> vector<4x16xf32>
    %195 = tpu.concatenate %194, %194 in 1 : vector<4x16xf32>, vector<4x16xf32> -> vector<4x32xf32>
    %196 = tpu.concatenate %195, %195 in 1 : vector<4x32xf32>, vector<4x32xf32> -> vector<4x64xf32>
    %197 = tpu.concatenate %196, %196 in 1 : vector<4x64xf32>, vector<4x64xf32> -> vector<4x128xf32>
    %198 = tpu.concatenate %197, %197 in 1 : vector<4x128xf32>, vector<4x128xf32> -> vector<4x256xf32>
    %199 = arith.mulf %3, %198 : vector<4x256xf32>
    %200 = arith.truncf %199 : vector<4x256xf32> to vector<4x256xbf16>
    %cst_58 = arith.constant dense<0.000000e+00> : vector<4x32xf32>
    %201 = tpu.matmul %200, %10, %cst_58 {dimension_numbers = #tpu.dot_dimension_numbers<[1], [0], [0], [1], [0, 0, 1, 1], [], []>} : vector<4x256xbf16>, vector<256x32xbf16>, vector<4x32xf32> -> vector<4x32xf32>
    %202 = arith.truncf %201 : vector<4x32xf32> to vector<4x32xbf16>
    %cst_59 = arith.constant dense<0.000000e+00> : vector<4x128xf32>
    %203 = tpu.matmul %202, %5, %cst_59 {dimension_numbers = #tpu.dot_dimension_numbers<[1], [0], [0], [1], [0, 0, 1, 1], [], []>} : vector<4x32xbf16>, vector<32x128xbf16>, vector<4x128xf32> -> vector<4x128xf32>
    %c2 = arith.constant 2 : index
    %c0_60 = arith.constant 0 : index
    %c0_61 = arith.constant 0 : index
    %204 = vector.load %arg4[%c2, %c0_60, %c0_61] : memref<8x4x128xf32, #tpu.memory_space<vmem>>, vector<1x4x128xf32>
    %205 = vector.shape_cast %204 : vector<1x4x128xf32> to vector<4x128xf32>
    %206 = arith.addf %205, %177 : vector<4x128xf32>
    %207 = arith.addf %206, %203 : vector<4x128xf32>
    %208 = arith.addf %207, %175 : vector<4x128xf32>
    %209 = math.tanh %208 : vector<4x128xf32>
    %210 = arith.negf %208 : vector<4x128xf32>
    %211 = math.exp %210 : vector<4x128xf32>
    %cst_62 = arith.constant 1.000000e+00 : f32
    %212 = vector.broadcast %cst_62 : f32 to vector<4x128xf32>
    %213 = arith.addf %212, %211 : vector<4x128xf32>
    %214 = arith.divf %212, %213 : vector<4x128xf32>
    %215 = arith.select %17, %209, %214 : vector<4x128xi1>, vector<4x128xf32>
    %216 = vector.extract_strided_slice %215 {offsets = [0, 0], sizes = [4, 32], strides = [1, 1]} : vector<4x128xf32> to vector<4x32xf32>
    %217 = vector.extract_strided_slice %215 {offsets = [0, 32], sizes = [4, 32], strides = [1, 1]} : vector<4x128xf32> to vector<4x32xf32>
    %218 = vector.extract_strided_slice %215 {offsets = [0, 64], sizes = [4, 32], strides = [1, 1]} : vector<4x128xf32> to vector<4x32xf32>
    %219 = vector.extract_strided_slice %215 {offsets = [0, 96], sizes = [4, 32], strides = [1, 1]} : vector<4x128xf32> to vector<4x32xf32>
    %220 = arith.mulf %217, %146 : vector<4x32xf32>
    %221 = arith.mulf %216, %218 : vector<4x32xf32>
    %222 = arith.addf %220, %221 : vector<4x32xf32>
    %223 = math.tanh %222 : vector<4x32xf32>
    %224 = arith.mulf %219, %223 : vector<4x32xf32>
    %225 = arith.truncf %224 : vector<4x32xf32> to vector<4x32xbf16>
    %cst_63 = arith.constant dense<0.000000e+00> : vector<4x32xf32>
    %226 = tpu.matmul %225, %7, %cst_63 {dimension_numbers = #tpu.dot_dimension_numbers<[1], [0], [0], [1], [0, 0, 1, 1], [], []>} : vector<4x32xbf16>, vector<32x32xbf16>, vector<4x32xf32> -> vector<4x32xf32>
    %227 = vector.broadcast %8 : vector<1x32xf32> to vector<4x32xf32>
    %228 = arith.addf %226, %227 : vector<4x32xf32>
    %229 = tpu.bitcast %228 : vector<4x32xf32> -> vector<4x32xi32>
    %c0_i32_64 = arith.constant 0 : i32
    %230 = vector.broadcast %c0_i32_64 : i32 to vector<4x32xi32>
    %231 = arith.cmpi sge, %229, %230 : vector<4x32xi32>
    %c2147483647_i32_65 = arith.constant 2147483647 : i32
    %232 = vector.broadcast %c2147483647_i32_65 : i32 to vector<4x32xi32>
    %233 = arith.xori %229, %232 : vector<4x32xi32>
    %234 = arith.select %231, %229, %233 : vector<4x32xi1>, vector<4x32xi32>
    %c-32_i32_66 = arith.constant -32 : i32
    %235 = vector.broadcast %c-32_i32_66 : i32 to vector<4x32xi32>
    %236 = arith.andi %234, %235 : vector<4x32xi32>
    %c31_i32_67 = arith.constant 31 : i32
    %237 = vector.broadcast %c31_i32_67 : i32 to vector<4x32xi32>
    %238 = arith.subi %237, %11 : vector<4x32xi32>
    %239 = arith.ori %236, %238 : vector<4x32xi32>
    %cst_68 = arith.constant dense<-2147483648> : vector<4xi32>
    %240 = vector.multi_reduction <maxsi>, %239, %cst_68 [1] : vector<4x32xi32> to vector<4xi32>
    %241 = vector.shape_cast %240 : vector<4xi32> to vector<4x1xi32>
    %c31_i32_69 = arith.constant 31 : i32
    %242 = vector.broadcast %c31_i32_69 : i32 to vector<4x1xi32>
    %243 = arith.andi %241, %242 : vector<4x1xi32>
    %c31_i32_70 = arith.constant 31 : i32
    %244 = vector.broadcast %c31_i32_70 : i32 to vector<4x1xi32>
    %245 = arith.subi %244, %243 : vector<4x1xi32>
    %246 = vector.broadcast %245 : vector<4x1xi32> to vector<4x32xi32>
    %247 = arith.cmpi eq, %11, %246 : vector<4x32xi32>
    %248 = arith.extui %247 : vector<4x32xi1> to vector<4x32xi32>
    %249 = arith.sitofp %248 : vector<4x32xi32> to vector<4x32xf32>
    %250 = arith.truncf %249 : vector<4x32xf32> to vector<4x32xbf16>
    %cst_71 = arith.constant dense<0.000000e+00> : vector<4x128xf32>
    %251 = tpu.matmul %250, %6, %cst_71 {dimension_numbers = #tpu.dot_dimension_numbers<[1], [0], [0], [1], [0, 0, 1, 1], [], []>} : vector<4x32xbf16>, vector<32x128xbf16>, vector<4x128xf32> -> vector<4x128xf32>
    %252 = arith.truncf %224 : vector<4x32xf32> to vector<4x32xbf16>
    %cst_72 = arith.constant dense<0.000000e+00> : vector<4x128xf32>
    %253 = tpu.matmul %252, %4, %cst_72 {dimension_numbers = #tpu.dot_dimension_numbers<[1], [0], [0], [1], [0, 0, 1, 1], [], []>} : vector<4x32xbf16>, vector<32x128xbf16>, vector<4x128xf32> -> vector<4x128xf32>
    %254 = tpu.concatenate %224, %224 in 1 : vector<4x32xf32>, vector<4x32xf32> -> vector<4x64xf32>
    %255 = tpu.concatenate %254, %254 in 1 : vector<4x64xf32>, vector<4x64xf32> -> vector<4x128xf32>
    %256 = tpu.concatenate %255, %255 in 1 : vector<4x128xf32>, vector<4x128xf32> -> vector<4x256xf32>
    %257 = arith.mulf %2, %256 : vector<4x256xf32>
    %258 = arith.truncf %257 : vector<4x256xf32> to vector<4x256xbf16>
    %cst_73 = arith.constant dense<0.000000e+00> : vector<4x8xf32>
    %259 = tpu.matmul %258, %9, %cst_73 {dimension_numbers = #tpu.dot_dimension_numbers<[1], [0], [0], [1], [0, 0, 1, 1], [], []>} : vector<4x256xbf16>, vector<256x8xbf16>, vector<4x8xf32> -> vector<4x8xf32>
    %cst_74 = arith.constant dense<0xFF800000> : vector<4xf32>
    %260 = vector.multi_reduction <maximumf>, %259, %cst_74 [1] : vector<4x8xf32> to vector<4xf32>
    %261 = vector.shape_cast %260 : vector<4xf32> to vector<4x1xf32>
    %262 = vector.broadcast %261 : vector<4x1xf32> to vector<4x8xf32>
    %263 = arith.subf %259, %262 : vector<4x8xf32>
    %264 = math.exp %263 : vector<4x8xf32>
    %cst_75 = arith.constant dense<0.000000e+00> : vector<4xf32>
    %265 = vector.multi_reduction <add>, %264, %cst_75 [1] : vector<4x8xf32> to vector<4xf32>
    %266 = vector.shape_cast %265 : vector<4xf32> to vector<4x1xf32>
    %267 = tpu.reciprocal %266 {approx = true} : vector<4x1xf32> -> vector<4x1xf32>
    %268 = vector.broadcast %267 : vector<4x1xf32> to vector<4x8xf32>
    %269 = arith.mulf %264, %268 : vector<4x8xf32>
    %270 = tpu.concatenate %269, %269 in 1 : vector<4x8xf32>, vector<4x8xf32> -> vector<4x16xf32>
    %271 = tpu.concatenate %270, %270 in 1 : vector<4x16xf32>, vector<4x16xf32> -> vector<4x32xf32>
    %272 = tpu.concatenate %271, %271 in 1 : vector<4x32xf32>, vector<4x32xf32> -> vector<4x64xf32>
    %273 = tpu.concatenate %272, %272 in 1 : vector<4x64xf32>, vector<4x64xf32> -> vector<4x128xf32>
    %274 = tpu.concatenate %273, %273 in 1 : vector<4x128xf32>, vector<4x128xf32> -> vector<4x256xf32>
    %275 = arith.mulf %3, %274 : vector<4x256xf32>
    %276 = arith.truncf %275 : vector<4x256xf32> to vector<4x256xbf16>
    %cst_76 = arith.constant dense<0.000000e+00> : vector<4x32xf32>
    %277 = tpu.matmul %276, %10, %cst_76 {dimension_numbers = #tpu.dot_dimension_numbers<[1], [0], [0], [1], [0, 0, 1, 1], [], []>} : vector<4x256xbf16>, vector<256x32xbf16>, vector<4x32xf32> -> vector<4x32xf32>
    %278 = arith.truncf %277 : vector<4x32xf32> to vector<4x32xbf16>
    %cst_77 = arith.constant dense<0.000000e+00> : vector<4x128xf32>
    %279 = tpu.matmul %278, %5, %cst_77 {dimension_numbers = #tpu.dot_dimension_numbers<[1], [0], [0], [1], [0, 0, 1, 1], [], []>} : vector<4x32xbf16>, vector<32x128xbf16>, vector<4x128xf32> -> vector<4x128xf32>
    %c3 = arith.constant 3 : index
    %c0_78 = arith.constant 0 : index
    %c0_79 = arith.constant 0 : index
    %280 = vector.load %arg4[%c3, %c0_78, %c0_79] : memref<8x4x128xf32, #tpu.memory_space<vmem>>, vector<1x4x128xf32>
    %281 = vector.shape_cast %280 : vector<1x4x128xf32> to vector<4x128xf32>
    %282 = arith.addf %281, %253 : vector<4x128xf32>
    %283 = arith.addf %282, %279 : vector<4x128xf32>
    %284 = arith.addf %283, %251 : vector<4x128xf32>
    %285 = math.tanh %284 : vector<4x128xf32>
    %286 = arith.negf %284 : vector<4x128xf32>
    %287 = math.exp %286 : vector<4x128xf32>
    %cst_80 = arith.constant 1.000000e+00 : f32
    %288 = vector.broadcast %cst_80 : f32 to vector<4x128xf32>
    %289 = arith.addf %288, %287 : vector<4x128xf32>
    %290 = arith.divf %288, %289 : vector<4x128xf32>
    %291 = arith.select %17, %285, %290 : vector<4x128xi1>, vector<4x128xf32>
    %292 = vector.extract_strided_slice %291 {offsets = [0, 0], sizes = [4, 32], strides = [1, 1]} : vector<4x128xf32> to vector<4x32xf32>
    %293 = vector.extract_strided_slice %291 {offsets = [0, 32], sizes = [4, 32], strides = [1, 1]} : vector<4x128xf32> to vector<4x32xf32>
    %294 = vector.extract_strided_slice %291 {offsets = [0, 64], sizes = [4, 32], strides = [1, 1]} : vector<4x128xf32> to vector<4x32xf32>
    %295 = vector.extract_strided_slice %291 {offsets = [0, 96], sizes = [4, 32], strides = [1, 1]} : vector<4x128xf32> to vector<4x32xf32>
    %296 = arith.mulf %293, %222 : vector<4x32xf32>
    %297 = arith.mulf %292, %294 : vector<4x32xf32>
    %298 = arith.addf %296, %297 : vector<4x32xf32>
    %299 = math.tanh %298 : vector<4x32xf32>
    %300 = arith.mulf %295, %299 : vector<4x32xf32>
    %301 = arith.truncf %300 : vector<4x32xf32> to vector<4x32xbf16>
    %cst_81 = arith.constant dense<0.000000e+00> : vector<4x32xf32>
    %302 = tpu.matmul %301, %7, %cst_81 {dimension_numbers = #tpu.dot_dimension_numbers<[1], [0], [0], [1], [0, 0, 1, 1], [], []>} : vector<4x32xbf16>, vector<32x32xbf16>, vector<4x32xf32> -> vector<4x32xf32>
    %303 = vector.broadcast %8 : vector<1x32xf32> to vector<4x32xf32>
    %304 = arith.addf %302, %303 : vector<4x32xf32>
    %305 = tpu.bitcast %304 : vector<4x32xf32> -> vector<4x32xi32>
    %c0_i32_82 = arith.constant 0 : i32
    %306 = vector.broadcast %c0_i32_82 : i32 to vector<4x32xi32>
    %307 = arith.cmpi sge, %305, %306 : vector<4x32xi32>
    %c2147483647_i32_83 = arith.constant 2147483647 : i32
    %308 = vector.broadcast %c2147483647_i32_83 : i32 to vector<4x32xi32>
    %309 = arith.xori %305, %308 : vector<4x32xi32>
    %310 = arith.select %307, %305, %309 : vector<4x32xi1>, vector<4x32xi32>
    %c-32_i32_84 = arith.constant -32 : i32
    %311 = vector.broadcast %c-32_i32_84 : i32 to vector<4x32xi32>
    %312 = arith.andi %310, %311 : vector<4x32xi32>
    %c31_i32_85 = arith.constant 31 : i32
    %313 = vector.broadcast %c31_i32_85 : i32 to vector<4x32xi32>
    %314 = arith.subi %313, %11 : vector<4x32xi32>
    %315 = arith.ori %312, %314 : vector<4x32xi32>
    %cst_86 = arith.constant dense<-2147483648> : vector<4xi32>
    %316 = vector.multi_reduction <maxsi>, %315, %cst_86 [1] : vector<4x32xi32> to vector<4xi32>
    %317 = vector.shape_cast %316 : vector<4xi32> to vector<4x1xi32>
    %c31_i32_87 = arith.constant 31 : i32
    %318 = vector.broadcast %c31_i32_87 : i32 to vector<4x1xi32>
    %319 = arith.andi %317, %318 : vector<4x1xi32>
    %c31_i32_88 = arith.constant 31 : i32
    %320 = vector.broadcast %c31_i32_88 : i32 to vector<4x1xi32>
    %321 = arith.subi %320, %319 : vector<4x1xi32>
    %322 = vector.broadcast %321 : vector<4x1xi32> to vector<4x32xi32>
    %323 = arith.cmpi eq, %11, %322 : vector<4x32xi32>
    %324 = arith.extui %323 : vector<4x32xi1> to vector<4x32xi32>
    %325 = arith.sitofp %324 : vector<4x32xi32> to vector<4x32xf32>
    %326 = arith.truncf %325 : vector<4x32xf32> to vector<4x32xbf16>
    %cst_89 = arith.constant dense<0.000000e+00> : vector<4x128xf32>
    %327 = tpu.matmul %326, %6, %cst_89 {dimension_numbers = #tpu.dot_dimension_numbers<[1], [0], [0], [1], [0, 0, 1, 1], [], []>} : vector<4x32xbf16>, vector<32x128xbf16>, vector<4x128xf32> -> vector<4x128xf32>
    %328 = arith.truncf %300 : vector<4x32xf32> to vector<4x32xbf16>
    %cst_90 = arith.constant dense<0.000000e+00> : vector<4x128xf32>
    %329 = tpu.matmul %328, %4, %cst_90 {dimension_numbers = #tpu.dot_dimension_numbers<[1], [0], [0], [1], [0, 0, 1, 1], [], []>} : vector<4x32xbf16>, vector<32x128xbf16>, vector<4x128xf32> -> vector<4x128xf32>
    %330 = tpu.concatenate %300, %300 in 1 : vector<4x32xf32>, vector<4x32xf32> -> vector<4x64xf32>
    %331 = tpu.concatenate %330, %330 in 1 : vector<4x64xf32>, vector<4x64xf32> -> vector<4x128xf32>
    %332 = tpu.concatenate %331, %331 in 1 : vector<4x128xf32>, vector<4x128xf32> -> vector<4x256xf32>
    %333 = arith.mulf %2, %332 : vector<4x256xf32>
    %334 = arith.truncf %333 : vector<4x256xf32> to vector<4x256xbf16>
    %cst_91 = arith.constant dense<0.000000e+00> : vector<4x8xf32>
    %335 = tpu.matmul %334, %9, %cst_91 {dimension_numbers = #tpu.dot_dimension_numbers<[1], [0], [0], [1], [0, 0, 1, 1], [], []>} : vector<4x256xbf16>, vector<256x8xbf16>, vector<4x8xf32> -> vector<4x8xf32>
    %cst_92 = arith.constant dense<0xFF800000> : vector<4xf32>
    %336 = vector.multi_reduction <maximumf>, %335, %cst_92 [1] : vector<4x8xf32> to vector<4xf32>
    %337 = vector.shape_cast %336 : vector<4xf32> to vector<4x1xf32>
    %338 = vector.broadcast %337 : vector<4x1xf32> to vector<4x8xf32>
    %339 = arith.subf %335, %338 : vector<4x8xf32>
    %340 = math.exp %339 : vector<4x8xf32>
    %cst_93 = arith.constant dense<0.000000e+00> : vector<4xf32>
    %341 = vector.multi_reduction <add>, %340, %cst_93 [1] : vector<4x8xf32> to vector<4xf32>
    %342 = vector.shape_cast %341 : vector<4xf32> to vector<4x1xf32>
    %343 = tpu.reciprocal %342 {approx = true} : vector<4x1xf32> -> vector<4x1xf32>
    %344 = vector.broadcast %343 : vector<4x1xf32> to vector<4x8xf32>
    %345 = arith.mulf %340, %344 : vector<4x8xf32>
    %346 = tpu.concatenate %345, %345 in 1 : vector<4x8xf32>, vector<4x8xf32> -> vector<4x16xf32>
    %347 = tpu.concatenate %346, %346 in 1 : vector<4x16xf32>, vector<4x16xf32> -> vector<4x32xf32>
    %348 = tpu.concatenate %347, %347 in 1 : vector<4x32xf32>, vector<4x32xf32> -> vector<4x64xf32>
    %349 = tpu.concatenate %348, %348 in 1 : vector<4x64xf32>, vector<4x64xf32> -> vector<4x128xf32>
    %350 = tpu.concatenate %349, %349 in 1 : vector<4x128xf32>, vector<4x128xf32> -> vector<4x256xf32>
    %351 = arith.mulf %3, %350 : vector<4x256xf32>
    %352 = arith.truncf %351 : vector<4x256xf32> to vector<4x256xbf16>
    %cst_94 = arith.constant dense<0.000000e+00> : vector<4x32xf32>
    %353 = tpu.matmul %352, %10, %cst_94 {dimension_numbers = #tpu.dot_dimension_numbers<[1], [0], [0], [1], [0, 0, 1, 1], [], []>} : vector<4x256xbf16>, vector<256x32xbf16>, vector<4x32xf32> -> vector<4x32xf32>
    %354 = arith.truncf %353 : vector<4x32xf32> to vector<4x32xbf16>
    %cst_95 = arith.constant dense<0.000000e+00> : vector<4x128xf32>
    %355 = tpu.matmul %354, %5, %cst_95 {dimension_numbers = #tpu.dot_dimension_numbers<[1], [0], [0], [1], [0, 0, 1, 1], [], []>} : vector<4x32xbf16>, vector<32x128xbf16>, vector<4x128xf32> -> vector<4x128xf32>
    %c4 = arith.constant 4 : index
    %c0_96 = arith.constant 0 : index
    %c0_97 = arith.constant 0 : index
    %356 = vector.load %arg4[%c4, %c0_96, %c0_97] : memref<8x4x128xf32, #tpu.memory_space<vmem>>, vector<1x4x128xf32>
    %357 = vector.shape_cast %356 : vector<1x4x128xf32> to vector<4x128xf32>
    %358 = arith.addf %357, %329 : vector<4x128xf32>
    %359 = arith.addf %358, %355 : vector<4x128xf32>
    %360 = arith.addf %359, %327 : vector<4x128xf32>
    %361 = math.tanh %360 : vector<4x128xf32>
    %362 = arith.negf %360 : vector<4x128xf32>
    %363 = math.exp %362 : vector<4x128xf32>
    %cst_98 = arith.constant 1.000000e+00 : f32
    %364 = vector.broadcast %cst_98 : f32 to vector<4x128xf32>
    %365 = arith.addf %364, %363 : vector<4x128xf32>
    %366 = arith.divf %364, %365 : vector<4x128xf32>
    %367 = arith.select %17, %361, %366 : vector<4x128xi1>, vector<4x128xf32>
    %368 = vector.extract_strided_slice %367 {offsets = [0, 0], sizes = [4, 32], strides = [1, 1]} : vector<4x128xf32> to vector<4x32xf32>
    %369 = vector.extract_strided_slice %367 {offsets = [0, 32], sizes = [4, 32], strides = [1, 1]} : vector<4x128xf32> to vector<4x32xf32>
    %370 = vector.extract_strided_slice %367 {offsets = [0, 64], sizes = [4, 32], strides = [1, 1]} : vector<4x128xf32> to vector<4x32xf32>
    %371 = vector.extract_strided_slice %367 {offsets = [0, 96], sizes = [4, 32], strides = [1, 1]} : vector<4x128xf32> to vector<4x32xf32>
    %372 = arith.mulf %369, %298 : vector<4x32xf32>
    %373 = arith.mulf %368, %370 : vector<4x32xf32>
    %374 = arith.addf %372, %373 : vector<4x32xf32>
    %375 = math.tanh %374 : vector<4x32xf32>
    %376 = arith.mulf %371, %375 : vector<4x32xf32>
    %377 = arith.truncf %376 : vector<4x32xf32> to vector<4x32xbf16>
    %cst_99 = arith.constant dense<0.000000e+00> : vector<4x32xf32>
    %378 = tpu.matmul %377, %7, %cst_99 {dimension_numbers = #tpu.dot_dimension_numbers<[1], [0], [0], [1], [0, 0, 1, 1], [], []>} : vector<4x32xbf16>, vector<32x32xbf16>, vector<4x32xf32> -> vector<4x32xf32>
    %379 = vector.broadcast %8 : vector<1x32xf32> to vector<4x32xf32>
    %380 = arith.addf %378, %379 : vector<4x32xf32>
    %381 = tpu.bitcast %380 : vector<4x32xf32> -> vector<4x32xi32>
    %c0_i32_100 = arith.constant 0 : i32
    %382 = vector.broadcast %c0_i32_100 : i32 to vector<4x32xi32>
    %383 = arith.cmpi sge, %381, %382 : vector<4x32xi32>
    %c2147483647_i32_101 = arith.constant 2147483647 : i32
    %384 = vector.broadcast %c2147483647_i32_101 : i32 to vector<4x32xi32>
    %385 = arith.xori %381, %384 : vector<4x32xi32>
    %386 = arith.select %383, %381, %385 : vector<4x32xi1>, vector<4x32xi32>
    %c-32_i32_102 = arith.constant -32 : i32
    %387 = vector.broadcast %c-32_i32_102 : i32 to vector<4x32xi32>
    %388 = arith.andi %386, %387 : vector<4x32xi32>
    %c31_i32_103 = arith.constant 31 : i32
    %389 = vector.broadcast %c31_i32_103 : i32 to vector<4x32xi32>
    %390 = arith.subi %389, %11 : vector<4x32xi32>
    %391 = arith.ori %388, %390 : vector<4x32xi32>
    %cst_104 = arith.constant dense<-2147483648> : vector<4xi32>
    %392 = vector.multi_reduction <maxsi>, %391, %cst_104 [1] : vector<4x32xi32> to vector<4xi32>
    %393 = vector.shape_cast %392 : vector<4xi32> to vector<4x1xi32>
    %c31_i32_105 = arith.constant 31 : i32
    %394 = vector.broadcast %c31_i32_105 : i32 to vector<4x1xi32>
    %395 = arith.andi %393, %394 : vector<4x1xi32>
    %c31_i32_106 = arith.constant 31 : i32
    %396 = vector.broadcast %c31_i32_106 : i32 to vector<4x1xi32>
    %397 = arith.subi %396, %395 : vector<4x1xi32>
    %398 = vector.broadcast %397 : vector<4x1xi32> to vector<4x32xi32>
    %399 = arith.cmpi eq, %11, %398 : vector<4x32xi32>
    %400 = arith.extui %399 : vector<4x32xi1> to vector<4x32xi32>
    %401 = arith.sitofp %400 : vector<4x32xi32> to vector<4x32xf32>
    %402 = arith.truncf %401 : vector<4x32xf32> to vector<4x32xbf16>
    %cst_107 = arith.constant dense<0.000000e+00> : vector<4x128xf32>
    %403 = tpu.matmul %402, %6, %cst_107 {dimension_numbers = #tpu.dot_dimension_numbers<[1], [0], [0], [1], [0, 0, 1, 1], [], []>} : vector<4x32xbf16>, vector<32x128xbf16>, vector<4x128xf32> -> vector<4x128xf32>
    %404 = arith.truncf %376 : vector<4x32xf32> to vector<4x32xbf16>
    %cst_108 = arith.constant dense<0.000000e+00> : vector<4x128xf32>
    %405 = tpu.matmul %404, %4, %cst_108 {dimension_numbers = #tpu.dot_dimension_numbers<[1], [0], [0], [1], [0, 0, 1, 1], [], []>} : vector<4x32xbf16>, vector<32x128xbf16>, vector<4x128xf32> -> vector<4x128xf32>
    %406 = tpu.concatenate %376, %376 in 1 : vector<4x32xf32>, vector<4x32xf32> -> vector<4x64xf32>
    %407 = tpu.concatenate %406, %406 in 1 : vector<4x64xf32>, vector<4x64xf32> -> vector<4x128xf32>
    %408 = tpu.concatenate %407, %407 in 1 : vector<4x128xf32>, vector<4x128xf32> -> vector<4x256xf32>
    %409 = arith.mulf %2, %408 : vector<4x256xf32>
    %410 = arith.truncf %409 : vector<4x256xf32> to vector<4x256xbf16>
    %cst_109 = arith.constant dense<0.000000e+00> : vector<4x8xf32>
    %411 = tpu.matmul %410, %9, %cst_109 {dimension_numbers = #tpu.dot_dimension_numbers<[1], [0], [0], [1], [0, 0, 1, 1], [], []>} : vector<4x256xbf16>, vector<256x8xbf16>, vector<4x8xf32> -> vector<4x8xf32>
    %cst_110 = arith.constant dense<0xFF800000> : vector<4xf32>
    %412 = vector.multi_reduction <maximumf>, %411, %cst_110 [1] : vector<4x8xf32> to vector<4xf32>
    %413 = vector.shape_cast %412 : vector<4xf32> to vector<4x1xf32>
    %414 = vector.broadcast %413 : vector<4x1xf32> to vector<4x8xf32>
    %415 = arith.subf %411, %414 : vector<4x8xf32>
    %416 = math.exp %415 : vector<4x8xf32>
    %cst_111 = arith.constant dense<0.000000e+00> : vector<4xf32>
    %417 = vector.multi_reduction <add>, %416, %cst_111 [1] : vector<4x8xf32> to vector<4xf32>
    %418 = vector.shape_cast %417 : vector<4xf32> to vector<4x1xf32>
    %419 = tpu.reciprocal %418 {approx = true} : vector<4x1xf32> -> vector<4x1xf32>
    %420 = vector.broadcast %419 : vector<4x1xf32> to vector<4x8xf32>
    %421 = arith.mulf %416, %420 : vector<4x8xf32>
    %422 = tpu.concatenate %421, %421 in 1 : vector<4x8xf32>, vector<4x8xf32> -> vector<4x16xf32>
    %423 = tpu.concatenate %422, %422 in 1 : vector<4x16xf32>, vector<4x16xf32> -> vector<4x32xf32>
    %424 = tpu.concatenate %423, %423 in 1 : vector<4x32xf32>, vector<4x32xf32> -> vector<4x64xf32>
    %425 = tpu.concatenate %424, %424 in 1 : vector<4x64xf32>, vector<4x64xf32> -> vector<4x128xf32>
    %426 = tpu.concatenate %425, %425 in 1 : vector<4x128xf32>, vector<4x128xf32> -> vector<4x256xf32>
    %427 = arith.mulf %3, %426 : vector<4x256xf32>
    %428 = arith.truncf %427 : vector<4x256xf32> to vector<4x256xbf16>
    %cst_112 = arith.constant dense<0.000000e+00> : vector<4x32xf32>
    %429 = tpu.matmul %428, %10, %cst_112 {dimension_numbers = #tpu.dot_dimension_numbers<[1], [0], [0], [1], [0, 0, 1, 1], [], []>} : vector<4x256xbf16>, vector<256x32xbf16>, vector<4x32xf32> -> vector<4x32xf32>
    %430 = arith.truncf %429 : vector<4x32xf32> to vector<4x32xbf16>
    %cst_113 = arith.constant dense<0.000000e+00> : vector<4x128xf32>
    %431 = tpu.matmul %430, %5, %cst_113 {dimension_numbers = #tpu.dot_dimension_numbers<[1], [0], [0], [1], [0, 0, 1, 1], [], []>} : vector<4x32xbf16>, vector<32x128xbf16>, vector<4x128xf32> -> vector<4x128xf32>
    %c5 = arith.constant 5 : index
    %c0_114 = arith.constant 0 : index
    %c0_115 = arith.constant 0 : index
    %432 = vector.load %arg4[%c5, %c0_114, %c0_115] : memref<8x4x128xf32, #tpu.memory_space<vmem>>, vector<1x4x128xf32>
    %433 = vector.shape_cast %432 : vector<1x4x128xf32> to vector<4x128xf32>
    %434 = arith.addf %433, %405 : vector<4x128xf32>
    %435 = arith.addf %434, %431 : vector<4x128xf32>
    %436 = arith.addf %435, %403 : vector<4x128xf32>
    %437 = math.tanh %436 : vector<4x128xf32>
    %438 = arith.negf %436 : vector<4x128xf32>
    %439 = math.exp %438 : vector<4x128xf32>
    %cst_116 = arith.constant 1.000000e+00 : f32
    %440 = vector.broadcast %cst_116 : f32 to vector<4x128xf32>
    %441 = arith.addf %440, %439 : vector<4x128xf32>
    %442 = arith.divf %440, %441 : vector<4x128xf32>
    %443 = arith.select %17, %437, %442 : vector<4x128xi1>, vector<4x128xf32>
    %444 = vector.extract_strided_slice %443 {offsets = [0, 0], sizes = [4, 32], strides = [1, 1]} : vector<4x128xf32> to vector<4x32xf32>
    %445 = vector.extract_strided_slice %443 {offsets = [0, 32], sizes = [4, 32], strides = [1, 1]} : vector<4x128xf32> to vector<4x32xf32>
    %446 = vector.extract_strided_slice %443 {offsets = [0, 64], sizes = [4, 32], strides = [1, 1]} : vector<4x128xf32> to vector<4x32xf32>
    %447 = vector.extract_strided_slice %443 {offsets = [0, 96], sizes = [4, 32], strides = [1, 1]} : vector<4x128xf32> to vector<4x32xf32>
    %448 = arith.mulf %445, %374 : vector<4x32xf32>
    %449 = arith.mulf %444, %446 : vector<4x32xf32>
    %450 = arith.addf %448, %449 : vector<4x32xf32>
    %451 = math.tanh %450 : vector<4x32xf32>
    %452 = arith.mulf %447, %451 : vector<4x32xf32>
    %453 = arith.truncf %452 : vector<4x32xf32> to vector<4x32xbf16>
    %cst_117 = arith.constant dense<0.000000e+00> : vector<4x32xf32>
    %454 = tpu.matmul %453, %7, %cst_117 {dimension_numbers = #tpu.dot_dimension_numbers<[1], [0], [0], [1], [0, 0, 1, 1], [], []>} : vector<4x32xbf16>, vector<32x32xbf16>, vector<4x32xf32> -> vector<4x32xf32>
    %455 = vector.broadcast %8 : vector<1x32xf32> to vector<4x32xf32>
    %456 = arith.addf %454, %455 : vector<4x32xf32>
    %457 = tpu.bitcast %456 : vector<4x32xf32> -> vector<4x32xi32>
    %c0_i32_118 = arith.constant 0 : i32
    %458 = vector.broadcast %c0_i32_118 : i32 to vector<4x32xi32>
    %459 = arith.cmpi sge, %457, %458 : vector<4x32xi32>
    %c2147483647_i32_119 = arith.constant 2147483647 : i32
    %460 = vector.broadcast %c2147483647_i32_119 : i32 to vector<4x32xi32>
    %461 = arith.xori %457, %460 : vector<4x32xi32>
    %462 = arith.select %459, %457, %461 : vector<4x32xi1>, vector<4x32xi32>
    %c-32_i32_120 = arith.constant -32 : i32
    %463 = vector.broadcast %c-32_i32_120 : i32 to vector<4x32xi32>
    %464 = arith.andi %462, %463 : vector<4x32xi32>
    %c31_i32_121 = arith.constant 31 : i32
    %465 = vector.broadcast %c31_i32_121 : i32 to vector<4x32xi32>
    %466 = arith.subi %465, %11 : vector<4x32xi32>
    %467 = arith.ori %464, %466 : vector<4x32xi32>
    %cst_122 = arith.constant dense<-2147483648> : vector<4xi32>
    %468 = vector.multi_reduction <maxsi>, %467, %cst_122 [1] : vector<4x32xi32> to vector<4xi32>
    %469 = vector.shape_cast %468 : vector<4xi32> to vector<4x1xi32>
    %c31_i32_123 = arith.constant 31 : i32
    %470 = vector.broadcast %c31_i32_123 : i32 to vector<4x1xi32>
    %471 = arith.andi %469, %470 : vector<4x1xi32>
    %c31_i32_124 = arith.constant 31 : i32
    %472 = vector.broadcast %c31_i32_124 : i32 to vector<4x1xi32>
    %473 = arith.subi %472, %471 : vector<4x1xi32>
    %474 = vector.broadcast %473 : vector<4x1xi32> to vector<4x32xi32>
    %475 = arith.cmpi eq, %11, %474 : vector<4x32xi32>
    %476 = arith.extui %475 : vector<4x32xi1> to vector<4x32xi32>
    %477 = arith.sitofp %476 : vector<4x32xi32> to vector<4x32xf32>
    %478 = arith.truncf %477 : vector<4x32xf32> to vector<4x32xbf16>
    %cst_125 = arith.constant dense<0.000000e+00> : vector<4x128xf32>
    %479 = tpu.matmul %478, %6, %cst_125 {dimension_numbers = #tpu.dot_dimension_numbers<[1], [0], [0], [1], [0, 0, 1, 1], [], []>} : vector<4x32xbf16>, vector<32x128xbf16>, vector<4x128xf32> -> vector<4x128xf32>
    %480 = arith.truncf %452 : vector<4x32xf32> to vector<4x32xbf16>
    %cst_126 = arith.constant dense<0.000000e+00> : vector<4x128xf32>
    %481 = tpu.matmul %480, %4, %cst_126 {dimension_numbers = #tpu.dot_dimension_numbers<[1], [0], [0], [1], [0, 0, 1, 1], [], []>} : vector<4x32xbf16>, vector<32x128xbf16>, vector<4x128xf32> -> vector<4x128xf32>
    %482 = tpu.concatenate %452, %452 in 1 : vector<4x32xf32>, vector<4x32xf32> -> vector<4x64xf32>
    %483 = tpu.concatenate %482, %482 in 1 : vector<4x64xf32>, vector<4x64xf32> -> vector<4x128xf32>
    %484 = tpu.concatenate %483, %483 in 1 : vector<4x128xf32>, vector<4x128xf32> -> vector<4x256xf32>
    %485 = arith.mulf %2, %484 : vector<4x256xf32>
    %486 = arith.truncf %485 : vector<4x256xf32> to vector<4x256xbf16>
    %cst_127 = arith.constant dense<0.000000e+00> : vector<4x8xf32>
    %487 = tpu.matmul %486, %9, %cst_127 {dimension_numbers = #tpu.dot_dimension_numbers<[1], [0], [0], [1], [0, 0, 1, 1], [], []>} : vector<4x256xbf16>, vector<256x8xbf16>, vector<4x8xf32> -> vector<4x8xf32>
    %cst_128 = arith.constant dense<0xFF800000> : vector<4xf32>
    %488 = vector.multi_reduction <maximumf>, %487, %cst_128 [1] : vector<4x8xf32> to vector<4xf32>
    %489 = vector.shape_cast %488 : vector<4xf32> to vector<4x1xf32>
    %490 = vector.broadcast %489 : vector<4x1xf32> to vector<4x8xf32>
    %491 = arith.subf %487, %490 : vector<4x8xf32>
    %492 = math.exp %491 : vector<4x8xf32>
    %cst_129 = arith.constant dense<0.000000e+00> : vector<4xf32>
    %493 = vector.multi_reduction <add>, %492, %cst_129 [1] : vector<4x8xf32> to vector<4xf32>
    %494 = vector.shape_cast %493 : vector<4xf32> to vector<4x1xf32>
    %495 = tpu.reciprocal %494 {approx = true} : vector<4x1xf32> -> vector<4x1xf32>
    %496 = vector.broadcast %495 : vector<4x1xf32> to vector<4x8xf32>
    %497 = arith.mulf %492, %496 : vector<4x8xf32>
    %498 = tpu.concatenate %497, %497 in 1 : vector<4x8xf32>, vector<4x8xf32> -> vector<4x16xf32>
    %499 = tpu.concatenate %498, %498 in 1 : vector<4x16xf32>, vector<4x16xf32> -> vector<4x32xf32>
    %500 = tpu.concatenate %499, %499 in 1 : vector<4x32xf32>, vector<4x32xf32> -> vector<4x64xf32>
    %501 = tpu.concatenate %500, %500 in 1 : vector<4x64xf32>, vector<4x64xf32> -> vector<4x128xf32>
    %502 = tpu.concatenate %501, %501 in 1 : vector<4x128xf32>, vector<4x128xf32> -> vector<4x256xf32>
    %503 = arith.mulf %3, %502 : vector<4x256xf32>
    %504 = arith.truncf %503 : vector<4x256xf32> to vector<4x256xbf16>
    %cst_130 = arith.constant dense<0.000000e+00> : vector<4x32xf32>
    %505 = tpu.matmul %504, %10, %cst_130 {dimension_numbers = #tpu.dot_dimension_numbers<[1], [0], [0], [1], [0, 0, 1, 1], [], []>} : vector<4x256xbf16>, vector<256x32xbf16>, vector<4x32xf32> -> vector<4x32xf32>
    %506 = arith.truncf %505 : vector<4x32xf32> to vector<4x32xbf16>
    %cst_131 = arith.constant dense<0.000000e+00> : vector<4x128xf32>
    %507 = tpu.matmul %506, %5, %cst_131 {dimension_numbers = #tpu.dot_dimension_numbers<[1], [0], [0], [1], [0, 0, 1, 1], [], []>} : vector<4x32xbf16>, vector<32x128xbf16>, vector<4x128xf32> -> vector<4x128xf32>
    %c6 = arith.constant 6 : index
    %c0_132 = arith.constant 0 : index
    %c0_133 = arith.constant 0 : index
    %508 = vector.load %arg4[%c6, %c0_132, %c0_133] : memref<8x4x128xf32, #tpu.memory_space<vmem>>, vector<1x4x128xf32>
    %509 = vector.shape_cast %508 : vector<1x4x128xf32> to vector<4x128xf32>
    %510 = arith.addf %509, %481 : vector<4x128xf32>
    %511 = arith.addf %510, %507 : vector<4x128xf32>
    %512 = arith.addf %511, %479 : vector<4x128xf32>
    %513 = math.tanh %512 : vector<4x128xf32>
    %514 = arith.negf %512 : vector<4x128xf32>
    %515 = math.exp %514 : vector<4x128xf32>
    %cst_134 = arith.constant 1.000000e+00 : f32
    %516 = vector.broadcast %cst_134 : f32 to vector<4x128xf32>
    %517 = arith.addf %516, %515 : vector<4x128xf32>
    %518 = arith.divf %516, %517 : vector<4x128xf32>
    %519 = arith.select %17, %513, %518 : vector<4x128xi1>, vector<4x128xf32>
    %520 = vector.extract_strided_slice %519 {offsets = [0, 0], sizes = [4, 32], strides = [1, 1]} : vector<4x128xf32> to vector<4x32xf32>
    %521 = vector.extract_strided_slice %519 {offsets = [0, 32], sizes = [4, 32], strides = [1, 1]} : vector<4x128xf32> to vector<4x32xf32>
    %522 = vector.extract_strided_slice %519 {offsets = [0, 64], sizes = [4, 32], strides = [1, 1]} : vector<4x128xf32> to vector<4x32xf32>
    %523 = vector.extract_strided_slice %519 {offsets = [0, 96], sizes = [4, 32], strides = [1, 1]} : vector<4x128xf32> to vector<4x32xf32>
    %524 = arith.mulf %521, %450 : vector<4x32xf32>
    %525 = arith.mulf %520, %522 : vector<4x32xf32>
    %526 = arith.addf %524, %525 : vector<4x32xf32>
    %527 = math.tanh %526 : vector<4x32xf32>
    %528 = arith.mulf %523, %527 : vector<4x32xf32>
    %529 = arith.truncf %528 : vector<4x32xf32> to vector<4x32xbf16>
    %cst_135 = arith.constant dense<0.000000e+00> : vector<4x32xf32>
    %530 = tpu.matmul %529, %7, %cst_135 {dimension_numbers = #tpu.dot_dimension_numbers<[1], [0], [0], [1], [0, 0, 1, 1], [], []>} : vector<4x32xbf16>, vector<32x32xbf16>, vector<4x32xf32> -> vector<4x32xf32>
    %531 = vector.broadcast %8 : vector<1x32xf32> to vector<4x32xf32>
    %532 = arith.addf %530, %531 : vector<4x32xf32>
    %533 = tpu.bitcast %532 : vector<4x32xf32> -> vector<4x32xi32>
    %c0_i32_136 = arith.constant 0 : i32
    %534 = vector.broadcast %c0_i32_136 : i32 to vector<4x32xi32>
    %535 = arith.cmpi sge, %533, %534 : vector<4x32xi32>
    %c2147483647_i32_137 = arith.constant 2147483647 : i32
    %536 = vector.broadcast %c2147483647_i32_137 : i32 to vector<4x32xi32>
    %537 = arith.xori %533, %536 : vector<4x32xi32>
    %538 = arith.select %535, %533, %537 : vector<4x32xi1>, vector<4x32xi32>
    %c-32_i32_138 = arith.constant -32 : i32
    %539 = vector.broadcast %c-32_i32_138 : i32 to vector<4x32xi32>
    %540 = arith.andi %538, %539 : vector<4x32xi32>
    %c31_i32_139 = arith.constant 31 : i32
    %541 = vector.broadcast %c31_i32_139 : i32 to vector<4x32xi32>
    %542 = arith.subi %541, %11 : vector<4x32xi32>
    %543 = arith.ori %540, %542 : vector<4x32xi32>
    %cst_140 = arith.constant dense<-2147483648> : vector<4xi32>
    %544 = vector.multi_reduction <maxsi>, %543, %cst_140 [1] : vector<4x32xi32> to vector<4xi32>
    %545 = vector.shape_cast %544 : vector<4xi32> to vector<4x1xi32>
    %c31_i32_141 = arith.constant 31 : i32
    %546 = vector.broadcast %c31_i32_141 : i32 to vector<4x1xi32>
    %547 = arith.andi %545, %546 : vector<4x1xi32>
    %c31_i32_142 = arith.constant 31 : i32
    %548 = vector.broadcast %c31_i32_142 : i32 to vector<4x1xi32>
    %549 = arith.subi %548, %547 : vector<4x1xi32>
    %550 = vector.broadcast %549 : vector<4x1xi32> to vector<4x32xi32>
    %551 = arith.cmpi eq, %11, %550 : vector<4x32xi32>
    %552 = arith.extui %551 : vector<4x32xi1> to vector<4x32xi32>
    %553 = arith.sitofp %552 : vector<4x32xi32> to vector<4x32xf32>
    %554 = arith.truncf %553 : vector<4x32xf32> to vector<4x32xbf16>
    %cst_143 = arith.constant dense<0.000000e+00> : vector<4x128xf32>
    %555 = tpu.matmul %554, %6, %cst_143 {dimension_numbers = #tpu.dot_dimension_numbers<[1], [0], [0], [1], [0, 0, 1, 1], [], []>} : vector<4x32xbf16>, vector<32x128xbf16>, vector<4x128xf32> -> vector<4x128xf32>
    %556 = arith.truncf %528 : vector<4x32xf32> to vector<4x32xbf16>
    %cst_144 = arith.constant dense<0.000000e+00> : vector<4x128xf32>
    %557 = tpu.matmul %556, %4, %cst_144 {dimension_numbers = #tpu.dot_dimension_numbers<[1], [0], [0], [1], [0, 0, 1, 1], [], []>} : vector<4x32xbf16>, vector<32x128xbf16>, vector<4x128xf32> -> vector<4x128xf32>
    %558 = tpu.concatenate %528, %528 in 1 : vector<4x32xf32>, vector<4x32xf32> -> vector<4x64xf32>
    %559 = tpu.concatenate %558, %558 in 1 : vector<4x64xf32>, vector<4x64xf32> -> vector<4x128xf32>
    %560 = tpu.concatenate %559, %559 in 1 : vector<4x128xf32>, vector<4x128xf32> -> vector<4x256xf32>
    %561 = arith.mulf %2, %560 : vector<4x256xf32>
    %562 = arith.truncf %561 : vector<4x256xf32> to vector<4x256xbf16>
    %cst_145 = arith.constant dense<0.000000e+00> : vector<4x8xf32>
    %563 = tpu.matmul %562, %9, %cst_145 {dimension_numbers = #tpu.dot_dimension_numbers<[1], [0], [0], [1], [0, 0, 1, 1], [], []>} : vector<4x256xbf16>, vector<256x8xbf16>, vector<4x8xf32> -> vector<4x8xf32>
    %cst_146 = arith.constant dense<0xFF800000> : vector<4xf32>
    %564 = vector.multi_reduction <maximumf>, %563, %cst_146 [1] : vector<4x8xf32> to vector<4xf32>
    %565 = vector.shape_cast %564 : vector<4xf32> to vector<4x1xf32>
    %566 = vector.broadcast %565 : vector<4x1xf32> to vector<4x8xf32>
    %567 = arith.subf %563, %566 : vector<4x8xf32>
    %568 = math.exp %567 : vector<4x8xf32>
    %cst_147 = arith.constant dense<0.000000e+00> : vector<4xf32>
    %569 = vector.multi_reduction <add>, %568, %cst_147 [1] : vector<4x8xf32> to vector<4xf32>
    %570 = vector.shape_cast %569 : vector<4xf32> to vector<4x1xf32>
    %571 = tpu.reciprocal %570 {approx = true} : vector<4x1xf32> -> vector<4x1xf32>
    %572 = vector.broadcast %571 : vector<4x1xf32> to vector<4x8xf32>
    %573 = arith.mulf %568, %572 : vector<4x8xf32>
    %574 = tpu.concatenate %573, %573 in 1 : vector<4x8xf32>, vector<4x8xf32> -> vector<4x16xf32>
    %575 = tpu.concatenate %574, %574 in 1 : vector<4x16xf32>, vector<4x16xf32> -> vector<4x32xf32>
    %576 = tpu.concatenate %575, %575 in 1 : vector<4x32xf32>, vector<4x32xf32> -> vector<4x64xf32>
    %577 = tpu.concatenate %576, %576 in 1 : vector<4x64xf32>, vector<4x64xf32> -> vector<4x128xf32>
    %578 = tpu.concatenate %577, %577 in 1 : vector<4x128xf32>, vector<4x128xf32> -> vector<4x256xf32>
    %579 = arith.mulf %3, %578 : vector<4x256xf32>
    %580 = arith.truncf %579 : vector<4x256xf32> to vector<4x256xbf16>
    %cst_148 = arith.constant dense<0.000000e+00> : vector<4x32xf32>
    %581 = tpu.matmul %580, %10, %cst_148 {dimension_numbers = #tpu.dot_dimension_numbers<[1], [0], [0], [1], [0, 0, 1, 1], [], []>} : vector<4x256xbf16>, vector<256x32xbf16>, vector<4x32xf32> -> vector<4x32xf32>
    %582 = arith.truncf %581 : vector<4x32xf32> to vector<4x32xbf16>
    %cst_149 = arith.constant dense<0.000000e+00> : vector<4x128xf32>
    %583 = tpu.matmul %582, %5, %cst_149 {dimension_numbers = #tpu.dot_dimension_numbers<[1], [0], [0], [1], [0, 0, 1, 1], [], []>} : vector<4x32xbf16>, vector<32x128xbf16>, vector<4x128xf32> -> vector<4x128xf32>
    %c7 = arith.constant 7 : index
    %c0_150 = arith.constant 0 : index
    %c0_151 = arith.constant 0 : index
    %584 = vector.load %arg4[%c7, %c0_150, %c0_151] : memref<8x4x128xf32, #tpu.memory_space<vmem>>, vector<1x4x128xf32>
    %585 = vector.shape_cast %584 : vector<1x4x128xf32> to vector<4x128xf32>
    %586 = arith.addf %585, %557 : vector<4x128xf32>
    %587 = arith.addf %586, %583 : vector<4x128xf32>
    %588 = arith.addf %587, %555 : vector<4x128xf32>
    %589 = math.tanh %588 : vector<4x128xf32>
    %590 = arith.negf %588 : vector<4x128xf32>
    %591 = math.exp %590 : vector<4x128xf32>
    %cst_152 = arith.constant 1.000000e+00 : f32
    %592 = vector.broadcast %cst_152 : f32 to vector<4x128xf32>
    %593 = arith.addf %592, %591 : vector<4x128xf32>
    %594 = arith.divf %592, %593 : vector<4x128xf32>
    %595 = arith.select %17, %589, %594 : vector<4x128xi1>, vector<4x128xf32>
    %596 = vector.extract_strided_slice %595 {offsets = [0, 0], sizes = [4, 32], strides = [1, 1]} : vector<4x128xf32> to vector<4x32xf32>
    %597 = vector.extract_strided_slice %595 {offsets = [0, 32], sizes = [4, 32], strides = [1, 1]} : vector<4x128xf32> to vector<4x32xf32>
    %598 = vector.extract_strided_slice %595 {offsets = [0, 64], sizes = [4, 32], strides = [1, 1]} : vector<4x128xf32> to vector<4x32xf32>
    %599 = vector.extract_strided_slice %595 {offsets = [0, 96], sizes = [4, 32], strides = [1, 1]} : vector<4x128xf32> to vector<4x32xf32>
    %600 = arith.mulf %597, %526 : vector<4x32xf32>
    %601 = arith.mulf %596, %598 : vector<4x32xf32>
    %602 = arith.addf %600, %601 : vector<4x32xf32>
    %603 = math.tanh %602 : vector<4x32xf32>
    %604 = arith.mulf %599, %603 : vector<4x32xf32>
    %605 = arith.truncf %604 : vector<4x32xf32> to vector<4x32xbf16>
    %cst_153 = arith.constant dense<0.000000e+00> : vector<4x32xf32>
    %606 = tpu.matmul %605, %7, %cst_153 {dimension_numbers = #tpu.dot_dimension_numbers<[1], [0], [0], [1], [0, 0, 1, 1], [], []>} : vector<4x32xbf16>, vector<32x32xbf16>, vector<4x32xf32> -> vector<4x32xf32>
    %607 = vector.broadcast %8 : vector<1x32xf32> to vector<4x32xf32>
    %608 = arith.addf %606, %607 : vector<4x32xf32>
    %609 = tpu.bitcast %608 : vector<4x32xf32> -> vector<4x32xi32>
    %c0_i32_154 = arith.constant 0 : i32
    %610 = vector.broadcast %c0_i32_154 : i32 to vector<4x32xi32>
    %611 = arith.cmpi sge, %609, %610 : vector<4x32xi32>
    %c2147483647_i32_155 = arith.constant 2147483647 : i32
    %612 = vector.broadcast %c2147483647_i32_155 : i32 to vector<4x32xi32>
    %613 = arith.xori %609, %612 : vector<4x32xi32>
    %614 = arith.select %611, %609, %613 : vector<4x32xi1>, vector<4x32xi32>
    %c-32_i32_156 = arith.constant -32 : i32
    %615 = vector.broadcast %c-32_i32_156 : i32 to vector<4x32xi32>
    %616 = arith.andi %614, %615 : vector<4x32xi32>
    %c31_i32_157 = arith.constant 31 : i32
    %617 = vector.broadcast %c31_i32_157 : i32 to vector<4x32xi32>
    %618 = arith.subi %617, %11 : vector<4x32xi32>
    %619 = arith.ori %616, %618 : vector<4x32xi32>
    %cst_158 = arith.constant dense<-2147483648> : vector<4xi32>
    %620 = vector.multi_reduction <maxsi>, %619, %cst_158 [1] : vector<4x32xi32> to vector<4xi32>
    %621 = vector.shape_cast %620 : vector<4xi32> to vector<4x1xi32>
    %c31_i32_159 = arith.constant 31 : i32
    %622 = vector.broadcast %c31_i32_159 : i32 to vector<4x1xi32>
    %623 = arith.andi %621, %622 : vector<4x1xi32>
    %c31_i32_160 = arith.constant 31 : i32
    %624 = vector.broadcast %c31_i32_160 : i32 to vector<4x1xi32>
    %625 = arith.subi %624, %623 : vector<4x1xi32>
    %626 = tpu.concatenate %93, %169, %245, %321, %397, %473, %549, %625 in 1 : vector<4x1xi32>, vector<4x1xi32>, vector<4x1xi32>, vector<4x1xi32>, vector<4x1xi32>, vector<4x1xi32>, vector<4x1xi32>, vector<4x1xi32> -> vector<4x8xi32>
    %c0_161 = arith.constant 0 : index
    %c0_162 = arith.constant 0 : index
    %627 = vector.load %arg12[%c0_161, %c0_162] : memref<4x8xi32, #tpu.memory_space<vmem>>, vector<4x8xi32>
    tpu.vector_store %arg12[%c0_161, %c0_162], %626 {strides = array<i32>} : memref<4x8xi32, #tpu.memory_space<vmem>>, vector<4x8xi32>,
    return
  }
}

</mosaic_0001>

<bundles_post_ra>
// kernel: decoder_greedy_with_src_infer.1
= control target key start
LH: loop header
LB: loop body
LE: loop exit
PB: predicated region body
PF: predicated region fallthrough
CT: control target
= control target key end

     0   :  { %v128_v1 = vlaneseq  ;;  %s4454_s23 = smov 32   ;;  %v5978_v2 = vmov 0.0   ;;  %vm4456_vm0 = vmmov 0   ;;  %vm149_vm2 = vcmask 261120   ;;  %s5965_s0 = inlined_call_operand.vmem [shape: f32[4,32], index: 0, kind: input, shape index: {}]   ;;  %s5966_s1 = inlined_call_operand.vmem [shape: f32[4,32], index: 1, kind: input, shape index: {}]   ;;  %s5967_s2 = inlined_call_operand.vmem [shape: f32[4,256], index: 2, kind: input, shape index: {}]   ;;  %s5968_s3 = inlined_call_operand.vmem [shape: f32[4,256], index: 3, kind: input, shape index: {}]   ;;  %s5969_s4 = inlined_call_operand.vmem [shape: f32[8,4,128], index: 4, kind: input, shape index: {}]   ;;  %s5970_s5 = inlined_call_operand.vmem [shape: bf16[32,128], index: 5, kind: input, shape index: {}]   ;;  %s5971_s6 = inlined_call_operand.vmem [shape: bf16[32,128], index: 6, kind: input, shape index: {}]   ;;  %s5972_s7 = inlined_call_operand.vmem [shape: bf16[32,128], index: 7, kind: input, shape index: {}]   ;;  %s5973_s8 = inlined_call_operand.vmem [shape: bf16[32,32], index: 8, kind: input, shape index: {}]   ;;  %s5974_s9 = inlined_call_operand.vmem [shape: f32[1,32], index: 9, kind: input, shape index: {}]   ;;  %s5975_s10 = inlined_call_operand.vmem [shape: bf16[256,8], index: 10, kind: input, shape index: {}]   ;;  %s5976_s11 = inlined_call_operand.vmem [shape: bf16[256,32], index: 11, kind: input, shape index: {}]   ;;  %s5977_s12 = inlined_call_operand.hbm [shape: s32[4,8], index: 12, kind: output, shape index: {}]  }
   0x1   :  { %v4529_v0 = vld [vmem:[%s5965_s0] sm:$0xf]  ;;  %3947 = vmatprep.subr.bf16.mxu0 %v5978_v2  ;;  %v4537_v3 = vld [vmem:[%s5972_s7 + $0x8] sm:$0xff]   ;;  %3951 = vmatprep.mubr.msk.bf16.mxu0 %vm4456_vm0, %v5978_v2  ;;  %v4557_v6 = vld [vmem:[%s5975_s10 + $0x78] sm:$0xff]  }
   0x2   :  { %250 = vrot.lane.b32.xlu0 %v4529_v0, %s4454_s23  ;;  %v4541_v4 = vand.u32 127, %v128_v1  ;;  %3955 = vmatprep.subr.bf16.mxu1 %v5978_v2  ;;  %v4548_v5 = vld [vmem:[%s5972_s7] sm:$0xff]   ;;  %v4564_v9 = vld [vmem:[%s5975_s10 + $0x38] sm:$0xff]   ;;  %v4570_v10 = vld [vmem:[%s5975_s10 + $0x70] sm:$0xff]  }
   0x3   :  { %3948 = vmatpush3.bf16.msra.mxu0 %v4537_v3  ;;  %3959 = vmatprep.mubr.msk.bf16.mxu1 %vm4456_vm0, %v5978_v2  ;;  %v4577_v11 = vld [vmem:[%s5975_s10 + $0x30] sm:$0xff]   ;;  %v4583_v12 = vld [vmem:[%s5975_s10 + $0x68] sm:$0xff]   ;;  %v4594_v14 = vld [vmem:[%s5975_s10 + $0x60] sm:$0xff]  }
   0x4   :  { %3949 = vmatprep.subr.bf16.mxu0 %v5978_v2  ;;  %vm133_vm1 = vcmp.eq.s32.totalorder %v4541_v4, 1  ;;  %v4588_v13 = vld [vmem:[%s5975_s10 + $0x28] sm:$0xff]   ;;  %v4600_v15 = vld [vmem:[%s5975_s10 + $0x20] sm:$0xff]   ;;  %v4605_v16 = vld [vmem:[%s5975_s10 + $0x58] sm:$0xff]  }
   0x5   :  { %v3403_v7 = vsel %vm133_vm1, 1.0, %v5978_v2  ;;  %v4612_v17 = vld [vmem:[%s5975_s10 + $0x18] sm:$0xff]   ;;  %v4617_v18 = vld [vmem:[%s5975_s10 + $0x50] sm:$0xff]  }
   0x6   :  { %v136_v8 = vpack.c.bf16 %v3403_v7, %v3403_v7  ;;  %v4624_v19 = vld [vmem:[%s5975_s10 + $0x10] sm:$0xff]  }
   0x7   :  { %3950 = vmatpush3.bf16.msra.mxu0 %v4548_v5 }
   0x8   :  { %3505 = vmatprep.subr.bf16.mxu0 %v4557_v6 }
   0xa   :  { %3952 = vmatmul.mubr.msk.bf16.vlgmr.msra.gmra.mxu0 %vm149_vm2, %v136_v8 }
   0xb   :  { %3506 = vmatpush3.bf16.msra.mxu0 %v4564_v9 }
   0xc   :  { %3507 = vmatprep.subr.bf16.mxu0 %v4570_v10 }
   0xf   :  { %3508 = vmatpush3.bf16.msra.mxu0 %v4577_v11 }
  0x10   :  { %3509 = vmatprep.subr.bf16.mxu0 %v4583_v12 }
  0x13   :  { %3510 = vmatpush3.bf16.msra.mxu0 %v4588_v13 }
  0x14   :  { %3511 = vmatprep.subr.bf16.mxu0 %v4594_v14 }
  0x17   :  { %3512 = vmatpush3.bf16.msra.mxu0 %v4600_v15 }
  0x18   :  { %3513 = vmatprep.subr.bf16.mxu0 %v4605_v16 }
  0x1b   :  { %3514 = vmatpush3.bf16.msra.mxu0 %v4612_v17 }
  0x1c   :  { %3515 = vmatprep.subr.bf16.mxu0 %v4617_v18 }
  0x1f   :  { %3516 = vmatpush3.bf16.msra.mxu0 %v4624_v19 }
  0x20   :  { %17 = vsyncpa [#allocation3], 0  ;;  %v4632_v20 = vld [vmem:[%s5975_s10 + $0x48] sm:$0xff]   ;;  %v4644_v22 = vld [vmem:[%s5975_s10 + $0x40] sm:$0xff]   ;;  %s4457_s24 = smov 64   ;;  %vm258_vm3 = vcmask 523264   ;;  %v193_v57 = vpack.c.bf16 %v4529_v0, %v4529_v0 }
  0x21   :  { %v4637_v21 = vld [vmem:[%s5975_s10 + $0x8] sm:$0xff]   ;;  %3517 = vmatprep.subr.bf16.mxu0 %v4632_v20  ;;  %v4649_v23 = vld [vmem:[%s5975_s10] sm:$0xff]   ;;  %vm405_vm4 = vcmask 60416   ;;  %s4458_s26 = smov 8   ;;  %vm421_vm5 = vcmask 64512   ;;  %s4459_s27 = smov 16  }
  0x22   :  { %v4662_v31 = vld [vmem:[%s5967_s2] sm:$0xff]  ;;  %v4676_v54 = vld [vmem:[%s5970_s5 + $0x8] sm:$0xff]   ;;  %v4688_v56 = vld [vmem:[%s5976_s11 + $0x78] sm:$0xff]   ;;  %vm427_vm6 = vcmask 130048   ;;  %vm130_vm7 = vcmp.ge.s32.totalorder %v4541_v4, 64  ;;  %vm131_vm8 = vcmp.lt.s32.totalorder %v4541_v4, 96 }
  0x23   :  { %3518 = vmatpush3.bf16.msra.mxu0 %v4637_v21  ;;  %3956 = vmatpush3.bf16.msra.mxu1 %v4676_v54  ;;  %v4682_v55 = vld [vmem:[%s5970_s5] sm:$0xff]   ;;  %v4696_v58 = vld [vmem:[%s5976_s11 + $0x38] sm:$0xff]   ;;  %v4702_v59 = vld [vmem:[%s5976_s11 + $0x70] sm:$0xff]   ;;  %vm745_vm11 = vcmask 257024  }
  0x24   :  { %3519 = vmatprep.subr.bf16.mxu0 %v4644_v22  ;;  %3957 = vmatprep.subr.bf16.mxu1 %v5978_v2  ;;  %v4709_v61 = vld [vmem:[%s5976_s11 + $0x30] sm:$0xff]   ;;  %v4716_v63 = vld [vmem:[%s5976_s11 + $0x68] sm:$0xff]   ;;  %v4729_v1 = vld [vmem:[%s5976_s11 + $0x60] sm:$0xff]  }
  0x25   :  { %v4735_v7 = vld [vmem:[%s5976_s11 + $0x20] sm:$0xff]   ;;  %v4741_v8 = vld [vmem:[%s5976_s11 + $0x58] sm:$0xff]   ;;  %vm4826_vm9 = vmand %vm130_vm7, %vm131_vm8 }
  0x27   :  { %3520 = vmatpush3.bf16.msra.mxu0 %v4649_v23  ;;  %3958 = vmatpush3.bf16.msra.mxu1 %v4682_v55 }
  0x28   :  { %3963 = vmatprep.subr.bf16.mxu0 %v5978_v2  ;;  %3527 = vmatprep.subr.bf16.mxu1 %v4688_v56 }
  0x2a   :  { %3960 = vmatmul.mubr.msk.bf16.vlgmr.msra.gmra.mxu1 %vm149_vm2, %v193_v57 }
  0x2b   :  { %3528 = vmatpush3.bf16.msra.mxu1 %v4696_v58 }
  0x2c   :  { %3529 = vmatprep.subr.bf16.mxu1 %v4702_v59 }
  0x2f   :  { %3530 = vmatpush3.bf16.msra.mxu1 %v4709_v61 }
  0x30   :  { %3531 = vmatprep.subr.bf16.mxu1 %v4716_v63 }
  0x74   :  { %v251_v24 = vpop.permute.xlu0 %250 }
  0x75   :  { %v253_v25 = vsel %vm149_vm2, %v4529_v0, %v251_v24  ;;  %v4723_v0 = vld [vmem:[%s5976_s11 + $0x28] sm:$0xff]   ;;  %v4747_v24 = vld [vmem:[%s5976_s11 + $0x18] sm:$0xff]  }
  0x76   :  { %255 = vrot.lane.b32.xlu0 %v253_v25, %s4457_s24  ;;  %3532 = vmatpush3.bf16.msra.mxu1 %v4723_v0 }
  0x77   :  { %3533 = vmatprep.subr.bf16.mxu1 %v4729_v1 }
  0x7a   :  { %3534 = vmatpush3.bf16.msra.mxu1 %v4735_v7 }
  0x7b   :  { %3535 = vmatprep.subr.bf16.mxu1 %v4741_v8 }
  0x7e   :  { %3536 = vmatpush3.bf16.msra.mxu1 %v4747_v24 }
  0xca   :  { %v4657_v26 = vpop.f32.mrf.mxu0 }
  0xcc   :  { %v3953_v27 = vpop.f32.mrf.mxu0 }
  0xcd   :  { %v4760_v27 = vld [vmem:[%s5976_s11 + $0x10] sm:$0xff]  }
  0xce   :  { %v190_v28 = vpop.f32.mrf.mxu0 }
  0xcf   :  { %v4766_v28 = vld [vmem:[%s5976_s11 + $0x48] sm:$0xff]  }
  0xd0   :  { %v3954_v29 = vpop.f32.mrf.mxu0 }
  0xd1   :  { %v4771_v29 = vld [vmem:[%s5976_s11 + $0x8] sm:$0xff]  }
  0xe8   :  { %v256_v30 = vpop.permute.xlu0 %255 }
  0xe9   :  { %v259_v32 = vsel %vm258_vm3, %v253_v25, %v256_v30  ;;  %v4753_v25 = vld [vmem:[%s5976_s11 + $0x50] sm:$0xff]   ;;  %v4778_v30 = vld [vmem:[%s5976_s11 + $0x40] sm:$0xff]  }
  0xea   :  { %v261_v33 = vcombine.low %v259_v32, %v259_v32  ;;  %3537 = vmatprep.subr.bf16.mxu1 %v4753_v25  ;;  %v4783_v32 = vld [vmem:[%s5976_s11] sm:$0xff]  }
  0xeb   :  { %3538 = vmatpush3.bf16.msra.mxu1 %v4760_v27 }
  0xec   :  { %v263_v34 = vmul.f32 %v261_v33, %v4662_v31  ;;  %3539 = vmatprep.subr.bf16.mxu1 %v4766_v28  ;;  %v4791_v33 = vld [vmem:[%s5971_s6 + $0x8] sm:$0xff]  }
  0xee   :  { %v265_v35 = vcombine.high %v263_v34, %v263_v34  ;;  %v267_v37 = vpack.c.bf16 %v263_v34, %v263_v34 }
  0xef   :  { %3540 = vmatpush3.bf16.msra.mxu1 %v4771_v29 }
  0xf0   :  { %v268_v36 = vpack.c.bf16 %v265_v35, %v265_v35  ;;  %3541 = vmatprep.subr.bf16.mxu1 %v4778_v30 }
  0xf2   :  { %397 = vmatprep.mubr.bf16.mxu0 %v268_v36  ;;  %v243_v36 = vpop.f32.mrf.mxu1 }
  0xf3   :  { %398 = vmatmul.mubr.bf16.vlgmr.msra.gmra.mxu0 %v267_v37  ;;  %3542 = vmatpush3.bf16.msra.mxu1 %v4783_v32 }
  0xf4   :  { %3967 = vmatprep.mubr.msk.bf16.mxu0 %vm4456_vm0, %v5978_v2  ;;  %3971 = vmatprep.subr.bf16.mxu1 %v5978_v2  ;;  %v3961_v37 = vpop.f32.mrf.mxu1 }
  0xf5   :  { %3964 = vmatpush3.bf16.msra.mxu0 %v4791_v33 }
  0xf6   :  { %3965 = vmatprep.subr.bf16.mxu0 %v5978_v2 }
 0x1b3   :  { %v3521_v38 = vpop.f32.mrf.mxu0 }
 0x1b5   :  { %v3522_v39 = vpop.f32.mrf.mxu0 }
 0x1b6   :  { %v3523_v40 = vadd.f32 %v3522_v39, %v3521_v38  ;;  %v246_v38 = vpop.f32.mrf.mxu1 }
 0x1b7   :  { %v3524_v41 = vpop.f32.mrf.mxu0 }
 0x1b8   :  { %v406_v42 = vsel %vm405_vm4, %v3523_v40, -inf  ;;  %v3962_v39 = vpop.f32.mrf.mxu1  ;;  %v4800_v41 = vld [vmem:[%s5968_s3] sm:$0xff] }
 0x1b9   :  { %v3525_v43 = vpop.f32.mrf.mxu0  ;;  %407 = vmax.xlane.f32.xlu1 %v406_v42 }
 0x242   :  { %v408_v44 = vpop.xlane.xlu1 %407 }
 0x243   :  { %v409_v45 = vsub.f32 %v3523_v40, %v408_v44 }
 0x245   :  { %v410_v46 = vmul.f32 1.442695, %v409_v45 }
 0x247   :  { %4250 = vpow2.f32 %v410_v46 }
 0x254   :  { %v4251_v47 = vpop.eup %4250 }
 0x255   :  { %v412_v48 = vsel %vm405_vm4, %v4251_v47, 0.0 }
 0x256   :  { %413 = vadd.xlane.f32.xlu1 %v412_v48  ;;  %v4809_v48 = vld [vmem:[%s5971_s6] sm:$0xff]  }
 0x257   :  { %3966 = vmatpush3.bf16.msra.mxu0 %v4809_v48 }
 0x258   :  { %3979 = vmatprep.subr.bf16.mxu0 %v5978_v2 }
 0x2df   :  { %v414_v49 = vpop.xlane.xlu1 %413 }
 0x2e0   :  { %4252 = vrcp.f32 %v414_v49 }
 0x2ed   :  { %v4253_v50 = vpop.eup %4252 }
 0x2ee   :  { %v416_v51 = vmul.f32 %v4253_v50, %v4251_v47 }
 0x2f0   :  { %418 = vrot.lane.b32.xlu0 %v416_v51, %s4458_s26 }
 0x362   :  { %v419_v52 = vpop.permute.xlu0 %418 }
 0x363   :  { %v422_v53 = vsel %vm421_vm5, %v416_v51, %v419_v52 }
 0x364   :  { %424 = vrot.lane.b32.xlu1 %v422_v53, %s4459_s27 }
 0x3d6   :  { %v425_v60 = vpop.permute.xlu1 %424 }
 0x3d7   :  { %v428_v62 = vsel %vm427_vm6, %v422_v53, %v425_v60  ;;  %v640_v60 = vld [vmem:[%s5969_s4] sm:$0xf] }
 0x3d8   :  { %430 = vrot.lane.b32.xlu0 %v428_v62, %s4454_s23 }
 0x44a   :  { %v431_v34 = vpop.permute.xlu0 %430 }
 0x44b   :  { %v433_v35 = vsel %vm149_vm2, %v428_v62, %v431_v34  ;;  %v641_v62 = vadd.f32 %v640_v60, %v243_v36 }
 0x44c   :  { %435 = vrot.lane.b32.xlu0 %v433_v35, %s4457_s24 }
 0x4be   :  { %v436_v40 = vpop.permute.xlu0 %435 }
 0x4bf   :  { %v438_v42 = vsel %vm258_vm3, %v433_v35, %v436_v40 }
 0x4c0   :  { %v440_v43 = vcombine.low %v438_v42, %v438_v42 }
 0x4c2   :  { %v442_v44 = vmul.f32 %v440_v43, %v4800_v41 }
 0x4c4   :  { %v444_v45 = vcombine.high %v442_v44, %v442_v44  ;;  %v446_v47 = vpack.c.bf16 %v442_v44, %v442_v44 }
 0x4c6   :  { %v447_v46 = vpack.c.bf16 %v444_v45, %v444_v45 }
 0x4c8   :  { %576 = vmatprep.mubr.bf16.mxu1 %v447_v46 }
 0x4c9   :  { %577 = vmatmul.mubr.bf16.vlgmr.msra.gmra.mxu1 %v446_v47  ;;  %v44_v47 = vld [vmem:[%s5966_s1] sm:$0xf] }
 0x4ca   :  { %3975 = vmatprep.mubr.msk.bf16.mxu1 %vm4456_vm0, %v5978_v2 }
 0x589   :  { %v3543_v49 = vpop.f32.mrf.mxu1 }
 0x58b   :  { %v3544_v50 = vpop.f32.mrf.mxu1 }
 0x58c   :  { %v3545_v51 = vadd.f32 %v3544_v50, %v3543_v49 }
 0x58d   :  { %v3546_v52 = vpop.f32.mrf.mxu1 }
 0x58e   :  { %v584_v53 = vpack.c.bf16 %v3545_v51, %v3545_v51 }
 0x58f   :  { %v3547_v57 = vpop.f32.mrf.mxu1 }
 0x590   :  { %3968 = vmatmul.mubr.msk.bf16.vlgmr.msra.gmra.mxu0 %vm149_vm2, %v584_v53 }
 0x591   :  { %3980 = vmatpush3.bf16.msra.mxu0 %v4537_v3  ;;  %3983 = vmatprep.mubr.msk.bf16.mxu0 %vm4456_vm0, %v5978_v2 }
 0x592   :  { %3981 = vmatprep.subr.bf16.mxu0 %v5978_v2 }
 0x595   :  { %3982 = vmatpush3.bf16.msra.mxu0 %v4548_v5 }
 0x596   :  { %3561 = vmatprep.subr.bf16.mxu0 %v4557_v6 }
 0x650   :  { %v634_v34 = vpop.f32.mrf.mxu0 }
 0x651   :  { %v642_v35 = vadd.f32 %v641_v62, %v634_v34  ;;  %v4844_v62 = vld [vmem:[%s5973_s8 + $0x8] sm:$0xff]   ;;  %v4851_v34 = vld [vmem:[%s5973_s8] sm:$0xff]  }
 0x652   :  { %v3969_v37 = vpop.f32.mrf.mxu0  ;;  %3972 = vmatpush3.bf16.msra.mxu1 %v4844_v62 }
 0x653   :  { %v643_v38 = vadd.f32 %v642_v35, %v4657_v26  ;;  %3973 = vmatprep.subr.bf16.mxu1 %v5978_v2 }
 0x654   :  { %v637_v39 = vpop.f32.mrf.mxu0 }
 0x655   :  { %v3445_v40 = vmul.f32 -1.442695, %v643_v38 }
 0x656   :  { %v3970_v42 = vpop.f32.mrf.mxu0  ;;  %3974 = vmatpush3.bf16.msra.mxu1 %v4851_v34 }
 0x657   :  { %4254 = vpow2.f32 %v3445_v40  ;;  %3987 = vmatprep.subr.bf16.mxu1 %v5978_v2  ;;  %v4886_v40 = vld [vmem:[%s5974_s9] ss:$0 sm:$0xff] }
 0x658   :  { %4256 = vtanh.f32 %v643_v38  ;;  %5993 = vst [vmem:[#allocation5_spill] sm:$0xff] %v4886_v40 }
 0x664   :  { %v4255_v43 = vpop.eup %4254 }
 0x665   :  { %v648_v44 = vadd.f32 1.0, %v4255_v43  ;;  %v4257_v36 = vpop.eup %4256 }
 0x667   :  { %4258 = vrcp.f32 %v648_v44 }
 0x674   :  { %v4259_v46 = vpop.eup %4258 }
 0x675   :  { %v651_v26 = vsel %vm4826_vm9, %v4257_v36, %v4259_v46 }
 0x676   :  { %658 = vrot.lane.b32.xlu0 %v651_v26, %s4457_s24 }
 0x67a   :  { %653 = vrot.lane.b32.xlu0 %v44_v47, %s4454_s23 }
 0x6e8   :  { %v659_v49 = vpop.permute.xlu0 %658 }
 0x6e9   :  { %v661_v50 = vmul.f32 %v659_v49, %v651_v26 }
 0x6eb   :  { %663 = vrot.lane.b32.xlu1 %v661_v50, %s4454_s23 }
 0x6ec   :  { %v654_v51 = vpop.permute.xlu0 %653 }
 0x6ed   :  { %v656_v52 = vmul.f32 %v654_v51, %v651_v26 }
 0x75d   :  { %v664_v53 = vpop.permute.xlu1 %663 }
 0x75e   :  { %v4838_v57 = vadd.f32 %v664_v53, %v656_v52 }
 0x760   :  { %4260 = vtanh.f32 %v4838_v57 }
 0x76d   :  { %v4261_v60 = vpop.eup %4260 }
 0x76e   :  { %669 = vrot.lane.b32.xlu0 %v4261_v60, %s4457_s24 }
 0x7e0   :  { %v670_v35 = vpop.permute.xlu0 %669 }
 0x7e1   :  { %v672_v37 = vmul.f32 %v670_v35, %v651_v26  ;;  %v4890_v26 = vsub.s32 31, %v4541_v4 }
 0x7e3   :  { %v673_v38 = vpack.c.bf16 %v672_v37, %v672_v37  ;;  %5994 = vst [vmem:[#allocation6_spill] sm:$0xff] %v4890_v26 }
 0x7e5   :  { %681 = vrot.lane.b32.xlu1 %v673_v38, %s4454_s23 }
 0x7e9   :  { %851 = vrot.lane.b32.xlu1 %v672_v37, %s4454_s23 }
 0x7ed   :  { %854 = vrot.lane.b32.xlu1 %v672_v37, %s4457_s24 }
 0x857   :  { %v682_v39 = vpop.permute.xlu1 %681 }
 0x858   :  { %3976 = vmatmul.mubr.msk.bf16.vlgmr.msra.gmra.mxu1 %vm149_vm2, %v682_v39 }
 0x859   :  { %3988 = vmatpush3.bf16.msra.mxu1 %v4676_v54  ;;  %3991 = vmatprep.mubr.msk.bf16.mxu1 %vm4456_vm0, %v5978_v2 }
 0x85a   :  { %3989 = vmatprep.subr.bf16.mxu1 %v5978_v2 }
 0x85d   :  { %3990 = vmatpush3.bf16.msra.mxu1 %v4682_v55 }
 0x85e   :  { %3583 = vmatprep.subr.bf16.mxu1 %v4688_v56 }
 0x860   :  { %3992 = vmatmul.mubr.msk.bf16.vlgmr.msra.gmra.mxu1 %vm149_vm2, %v682_v39 }
 0x861   :  { %3584 = vmatpush3.bf16.msra.mxu1 %v4696_v58 }
 0x862   :  { %3585 = vmatprep.subr.bf16.mxu1 %v4702_v59 }
 0x865   :  { %3586 = vmatpush3.bf16.msra.mxu1 %v4709_v61 }
 0x866   :  { %3587 = vmatprep.subr.bf16.mxu1 %v4716_v63 }
 0x869   :  { %3588 = vmatpush3.bf16.msra.mxu1 %v4723_v0 }
 0x86a   :  { %3589 = vmatprep.subr.bf16.mxu1 %v4729_v1 }
 0x86d   :  { %3590 = vmatpush3.bf16.msra.mxu1 %v4735_v7 }
 0x86e   :  { %3591 = vmatprep.subr.bf16.mxu1 %v4741_v8 }
 0x871   :  { %3592 = vmatpush3.bf16.msra.mxu1 %v4747_v24 }
 0x872   :  { %3593 = vmatprep.subr.bf16.mxu1 %v4753_v25 }
 0x875   :  { %3594 = vmatpush3.bf16.msra.mxu1 %v4760_v27 }
 0x876   :  { %3595 = vmatprep.subr.bf16.mxu1 %v4766_v28 }
 0x879   :  { %3596 = vmatpush3.bf16.msra.mxu1 %v4771_v29 }
 0x87a   :  { %3597 = vmatprep.subr.bf16.mxu1 %v4778_v30 }
 0x87d   :  { %3598 = vmatpush3.bf16.msra.mxu1 %v4783_v32 }
 0x87e   :  { %4003 = vmatprep.subr.bf16.mxu1 %v5978_v2 }
 0x918   :  { %v732_v42 = vpop.f32.mrf.mxu1 }
 0x919   :  { %v733_v43 = vadd.f32 %v4886_v40, %v732_v42  ;;  %v852_v42 = vpop.permute.xlu1 %851 }
 0x91a   :  { %v3977_v44 = vpop.f32.mrf.mxu1 }
 0x91b   :  { %vm739_vm10 = vcmp.ge.s32.totalorder %v733_v43, 0  ;;  %v740_v36 = vxor.u32 2147483647, %v733_v43 }
 0x91c   :  { %v735_v46 = vpop.f32.mrf.mxu1 }
 0x91d   :  { %v741_v47 = vsel %vm739_vm10, %v733_v43, %v740_v36  ;;  %v855_v44 = vpop.permute.xlu1 %854  ;;  %vm3374_vm10 = vcmask 7168  }
 0x91e   :  { %v742_v49 = vand.u32 4294967264, %v741_v47  ;;  %v3978_v50 = vpop.f32.mrf.mxu1  ;;  %v857_v46 = vsel %vm149_vm2, %v852_v42, %v855_v44 }
 0x920   :  { %v4892_v51 = vpop.f32.mrf.mxu1  ;;  %v744_v52 = vor.u32 %v4890_v26, %v742_v49 }
 0x922   :  { %v3993_v53 = vpop.f32.mrf.mxu1  ;;  %v746_v60 = vsel %vm745_vm11, %v744_v52, 2147483648 }
 0x923   :  { %v748_v35 = vshra.s32 %v746_v60, 16  ;;  %v747_v43 = vand.u32 65535, %v746_v60 }
 0x924   :  { %v847_v37 = vpop.f32.mrf.mxu1 }
 0x925   :  { %v750_v38 = vcvt.s32.f32 %v748_v35  ;;  %v749_v47 = vcvt.s32.f32 %v747_v43 }
 0x926   :  { %v3994_v39 = vpop.f32.mrf.mxu1 }
 0x927   :  { %751 = vmax.xlane.f32.xlu0 %v750_v38 }
 0x93d   :  { %859 = vrot.lane.b32.xlu0 %v857_v46, %s4457_s24 }
 0x9b0   :  { %v752_v36 = vpop.xlane.xlu0 %751 }
 0x9b1   :  { %vm753_vm12 = vcmp.eq.f32.partialorder %v750_v38, %v752_v36  ;;  %v758_v53 = vcvt.f32.s32 %v752_v36  ;;  %v5995_v38 = vmov 0.0  }
 0x9b2   :  { %v754_v50 = vsel %vm753_vm12, %v749_v47, -inf  ;;  %vm3376_vm12 = vcmask 15360  }
 0x9b3   :  { %755 = vmax.xlane.f32.xlu1 %v754_v50  ;;  %v759_v39 = vshll.u32 %v758_v53, 16 }
 0x9b4   :  { %v860_v49 = vpop.permute.xlu0 %859 }
 0x9b5   :  { %v862_v52 = vsel %vm258_vm3, %v857_v46, %v860_v49 }
 0x9b6   :  { %v864_v37 = vcombine.low %v862_v52, %v862_v52 }
 0x9b8   :  { %v866_v40 = vmul.f32 %v864_v37, %v4662_v31 }
 0x9ba   :  { %v868_v60 = vcombine.high %v866_v40, %v866_v40 }
 0x9bc   :  { %v871_v36 = vpack.c.bf16 %v868_v60, %v868_v60 }
 0xa3c   :  { %v756_v35 = vpop.xlane.xlu1 %755 }
 0xa3d   :  { %v757_v2 = vcvt.f32.s32 %v756_v35 }
 0xa3f   :  { %v760_v26 = vadd.s32 %v759_v39, %v757_v2  ;;  %v870_v2 = vpack.c.bf16 %v866_v40, %v866_v40 }
 0xa41   :  { %v761_v42 = vand.u32 31, %v760_v26 }
 0xa43   :  { %v4900_v44 = vsub.s32 31, %v761_v42 }
 0xa45   :  { %vm763_vm13 = vcmp.eq.s32.totalorder %v4541_v4, %v4900_v44 }
 0xa46   :  { %v3450_v43 = vsel %vm763_vm13, 1.0, %v5995_v38 }
 0xa47   :  { %v766_v47 = vpack.c.bf16 %v3450_v43, %v3450_v43 }
 0xa49   :  { %3984 = vmatmul.mubr.msk.bf16.vlgmr.msra.gmra.mxu0 %vm149_vm2, %v766_v47 }
 0xa4a   :  { %3562 = vmatpush3.bf16.msra.mxu0 %v4564_v9  ;;  %904 = vmatprep.mubr.bf16.mxu0 %v871_v36 }
 0xa4b   :  { %3563 = vmatprep.subr.bf16.mxu0 %v4570_v10 }
 0xa4e   :  { %3564 = vmatpush3.bf16.msra.mxu0 %v4577_v11 }
 0xa4f   :  { %3565 = vmatprep.subr.bf16.mxu0 %v4583_v12 }
 0xa52   :  { %3566 = vmatpush3.bf16.msra.mxu0 %v4588_v13 }
 0xa53   :  { %3567 = vmatprep.subr.bf16.mxu0 %v4594_v14 }
 0xa56   :  { %3568 = vmatpush3.bf16.msra.mxu0 %v4600_v15 }
 0xa57   :  { %3569 = vmatprep.subr.bf16.mxu0 %v4605_v16 }
 0xa5a   :  { %3570 = vmatpush3.bf16.msra.mxu0 %v4612_v17 }
 0xa5b   :  { %3571 = vmatprep.subr.bf16.mxu0 %v4617_v18 }
 0xa5e   :  { %3572 = vmatpush3.bf16.msra.mxu0 %v4624_v19 }
 0xa5f   :  { %3573 = vmatprep.subr.bf16.mxu0 %v4632_v20 }
 0xa62   :  { %3574 = vmatpush3.bf16.msra.mxu0 %v4637_v21 }
 0xa63   :  { %3575 = vmatprep.subr.bf16.mxu0 %v4644_v22 }
 0xa66   :  { %3576 = vmatpush3.bf16.msra.mxu0 %v4649_v23 }
 0xa67   :  { %3995 = vmatprep.subr.bf16.mxu0 %v5995_v38 }
 0xa69   :  { %905 = vmatmul.mubr.bf16.vlgmr.msra.gmra.mxu0 %v870_v2 }
 0xa6a   :  { %3996 = vmatpush3.bf16.msra.mxu0 %v4791_v33  ;;  %3999 = vmatprep.mubr.msk.bf16.mxu0 %vm4456_vm0, %v5995_v38 }
 0xa6b   :  { %3997 = vmatprep.subr.bf16.mxu0 %v5995_v38 }
 0xa6e   :  { %3998 = vmatpush3.bf16.msra.mxu0 %v4809_v48 }
 0xa6f   :  { %4011 = vmatprep.subr.bf16.mxu0 %v5995_v38 }
 0xb09   :  { %v4928_v9 = vpop.f32.mrf.mxu0 }
 0xb0b   :  { %v3985_v10 = vpop.f32.mrf.mxu0 }
 0xb0d   :  { %v807_v11 = vpop.f32.mrf.mxu0 }
 0xb0f   :  { %v3986_v12 = vpop.f32.mrf.mxu0 }
 0xb29   :  { %v3577_v13 = vpop.f32.mrf.mxu0 }
 0xb2b   :  { %v3578_v40 = vpop.f32.mrf.mxu0 }
 0xb2c   :  { %v3579_v26 = vadd.f32 %v3578_v40, %v3577_v13 }
 0xb2d   :  { %v3580_v46 = vpop.f32.mrf.mxu0 }
 0xb2e   :  { %v912_v50 = vsel %vm405_vm4, %v3579_v26, -inf }
 0xb2f   :  { %v3581_v49 = vpop.f32.mrf.mxu0  ;;  %913 = vmax.xlane.f32.xlu1 %v912_v50 }
 0xbb8   :  { %v914_v53 = vpop.xlane.xlu1 %913 }
 0xbb9   :  { %v915_v52 = vsub.f32 %v3579_v26, %v914_v53 }
 0xbbb   :  { %v916_v37 = vmul.f32 1.442695, %v915_v52 }
 0xbbd   :  { %4262 = vpow2.f32 %v916_v37 }
 0xbca   :  { %v4263_v35 = vpop.eup %4262 }
 0xbcb   :  { %v918_v39 = vsel %vm405_vm4, %v4263_v35, 0.0 }
 0xbcc   :  { %919 = vadd.xlane.f32.xlu1 %v918_v39 }
 0xc55   :  { %v920_v42 = vpop.xlane.xlu1 %919 }
 0xc56   :  { %4264 = vrcp.f32 %v920_v42 }
 0xc63   :  { %v4265_v60 = vpop.eup %4264 }
 0xc64   :  { %v922_v43 = vmul.f32 %v4265_v60, %v4263_v35 }
 0xc66   :  { %924 = vrot.lane.b32.xlu0 %v922_v43, %s4458_s26 }
 0xcd8   :  { %v925_v47 = vpop.permute.xlu0 %924 }
 0xcd9   :  { %v927_v36 = vsel %vm421_vm5, %v922_v43, %v925_v47  ;;  %v3454_v43 = vld [vmem:[%s5969_s4 + $0x4] sm:$0xf] }
 0xcda   :  { %929 = vrot.lane.b32.xlu1 %v927_v36, %s4459_s27  ;;  %v1038_v47 = vadd.f32 %v3454_v43, %v4892_v51 }
 0xd4c   :  { %v930_v2 = vpop.permute.xlu1 %929 }
 0xd4d   :  { %v932_v10 = vsel %vm427_vm6, %v927_v36, %v930_v2 }
 0xd4e   :  { %934 = vrot.lane.b32.xlu0 %v932_v10, %s4454_s23 }
 0xdc0   :  { %v935_v11 = vpop.permute.xlu0 %934 }
 0xdc1   :  { %v937_v12 = vsel %vm149_vm2, %v932_v10, %v935_v11 }
 0xdc2   :  { %939 = vrot.lane.b32.xlu0 %v937_v12, %s4457_s24 }
 0xe34   :  { %v940_v13 = vpop.permute.xlu0 %939 }
 0xe35   :  { %v942_v40 = vsel %vm258_vm3, %v937_v12, %v940_v13 }
 0xe36   :  { %v944_v26 = vcombine.low %v942_v40, %v942_v40 }
 0xe38   :  { %v946_v46 = vmul.f32 %v944_v26, %v4800_v41 }
 0xe3a   :  { %v948_v50 = vcombine.high %v946_v46, %v946_v46  ;;  %v950_v53 = vpack.c.bf16 %v946_v46, %v946_v46 }
 0xe3c   :  { %v951_v49 = vpack.c.bf16 %v948_v50, %v948_v50 }
 0xe3e   :  { %984 = vmatprep.mubr.bf16.mxu1 %v951_v49 }
 0xe3f   :  { %985 = vmatmul.mubr.bf16.vlgmr.msra.gmra.mxu1 %v950_v53 }
 0xe40   :  { %4004 = vmatpush3.bf16.msra.mxu1 %v4844_v62  ;;  %4007 = vmatprep.mubr.msk.bf16.mxu1 %vm4456_vm0, %v5995_v38 }
 0xe41   :  { %4005 = vmatprep.subr.bf16.mxu1 %v5995_v38 }
 0xe44   :  { %4006 = vmatpush3.bf16.msra.mxu1 %v4851_v34 }
 0xe45   :  { %4019 = vmatprep.subr.bf16.mxu1 %v5995_v38 }
 0xeff   :  { %v3599_v52 = vpop.f32.mrf.mxu1 }
 0xf01   :  { %v3600_v37 = vpop.f32.mrf.mxu1 }
 0xf02   :  { %v3601_v35 = vadd.f32 %v3600_v37, %v3599_v52 }
 0xf03   :  { %v3602_v39 = vpop.f32.mrf.mxu1 }
 0xf04   :  { %v992_v42 = vpack.c.bf16 %v3601_v35, %v3601_v35 }
 0xf05   :  { %v3603_v60 = vpop.f32.mrf.mxu1 }
 0xf06   :  { %4000 = vmatmul.mubr.msk.bf16.vlgmr.msra.gmra.mxu0 %vm149_vm2, %v992_v42  ;;  %v5996_v60 = vld [vmem:[#allocation5_spill] sm:$0xff] }
 0xf07   :  { %4012 = vmatpush3.bf16.msra.mxu0 %v4537_v3  ;;  %4015 = vmatprep.mubr.msk.bf16.mxu0 %vm4456_vm0, %v5995_v38 }
 0xf08   :  { %4013 = vmatprep.subr.bf16.mxu0 %v5995_v38 }
 0xf0b   :  { %4014 = vmatpush3.bf16.msra.mxu0 %v4548_v5 }
 0xf0c   :  { %3617 = vmatprep.subr.bf16.mxu0 %v4557_v6 }
 0xfc6   :  { %v1030_v36 = vpop.f32.mrf.mxu0 }
 0xfc7   :  { %v1039_v2 = vadd.f32 %v1038_v47, %v1030_v36 }
 0xfc8   :  { %v4001_v10 = vpop.f32.mrf.mxu0 }
 0xfc9   :  { %v1040_v3 = vadd.f32 %v1039_v2, %v4928_v9 }
 0xfca   :  { %v1033_v11 = vpop.f32.mrf.mxu0 }
 0xfcb   :  { %v3455_v12 = vmul.f32 -1.442695, %v1040_v3 }
 0xfcc   :  { %v4002_v13 = vpop.f32.mrf.mxu0 }
 0xfcd   :  { %4266 = vpow2.f32 %v3455_v12  ;;  %v5997_v13 = vld [vmem:[#allocation6_spill] sm:$0xff] }
 0xfce   :  { %4268 = vtanh.f32 %v1040_v3 }
 0xfda   :  { %v4267_v40 = vpop.eup %4266 }
 0xfdb   :  { %v1045_v26 = vadd.f32 1.0, %v4267_v40  ;;  %v4269_v5 = vpop.eup %4268 }
 0xfdd   :  { %4270 = vrcp.f32 %v1045_v26 }
 0xfea   :  { %v4271_v6 = vpop.eup %4270 }
 0xfeb   :  { %v1048_v46 = vsel %vm4826_vm9, %v4269_v5, %v4271_v6 }
 0xfec   :  { %1051 = vrot.lane.b32.xlu0 %v1048_v46, %s4457_s24  ;;  %v1049_v9 = vmul.f32 %v1048_v46, %v4838_v57 }
0x105e   :  { %v1052_v51 = vpop.permute.xlu0 %1051 }
0x105f   :  { %v1054_v50 = vmul.f32 %v1052_v51, %v1048_v46 }
0x1061   :  { %1056 = vrot.lane.b32.xlu0 %v1054_v50, %s4454_s23 }
0x10d3   :  { %v1057_v49 = vpop.permute.xlu0 %1056 }
0x10d4   :  { %v4964_v53 = vadd.f32 %v1057_v49, %v1049_v9 }
0x10d6   :  { %4272 = vtanh.f32 %v4964_v53 }
0x10e3   :  { %v4273_v52 = vpop.eup %4272 }
0x10e4   :  { %1062 = vrot.lane.b32.xlu1 %v4273_v52, %s4457_s24 }
0x1156   :  { %v1063_v37 = vpop.permute.xlu1 %1062 }
0x1157   :  { %v1065_v35 = vmul.f32 %v1063_v37, %v1048_v46 }
0x1159   :  { %v1066_v39 = vpack.c.bf16 %v1065_v35, %v1065_v35 }
0x115b   :  { %1068 = vrot.lane.b32.xlu0 %v1066_v39, %s4454_s23 }
0x115f   :  { %1224 = vrot.lane.b32.xlu0 %v1065_v35, %s4454_s23 }
0x1163   :  { %1227 = vrot.lane.b32.xlu0 %v1065_v35, %s4457_s24 }
0x11cd   :  { %v1069_v42 = vpop.permute.xlu0 %1068 }
0x11ce   :  { %4008 = vmatmul.mubr.msk.bf16.vlgmr.msra.gmra.mxu1 %vm149_vm2, %v1069_v42 }
0x11cf   :  { %4020 = vmatpush3.bf16.msra.mxu1 %v4676_v54  ;;  %4023 = vmatprep.mubr.msk.bf16.mxu1 %vm4456_vm0, %v5995_v38 }
0x11d0   :  { %4021 = vmatprep.subr.bf16.mxu1 %v5995_v38 }
0x11d1   :  { %v1225_v9 = vpop.permute.xlu0 %1224 }
0x11d3   :  { %4022 = vmatpush3.bf16.msra.mxu1 %v4682_v55 }
0x11d4   :  { %3639 = vmatprep.subr.bf16.mxu1 %v4688_v56 }
0x11d5   :  { %v1228_v49 = vpop.permute.xlu0 %1227 }
0x11d6   :  { %4024 = vmatmul.mubr.msk.bf16.vlgmr.msra.gmra.mxu1 %vm149_vm2, %v1069_v42  ;;  %v1230_v52 = vsel %vm149_vm2, %v1225_v9, %v1228_v49  ;;  %v5013_v9 = vld [vmem:[%s5975_s10 + $0x38] sm:$0xff]   ;;  %v5025_v49 = vld [vmem:[%s5975_s10 + $0x30] sm:$0xff]  }
0x11d7   :  { %3640 = vmatpush3.bf16.msra.mxu1 %v4696_v58 }
0x11d8   :  { %3641 = vmatprep.subr.bf16.mxu1 %v4702_v59 }
0x11db   :  { %3642 = vmatpush3.bf16.msra.mxu1 %v4709_v61 }
0x11dc   :  { %3643 = vmatprep.subr.bf16.mxu1 %v4716_v63 }
0x11df   :  { %3644 = vmatpush3.bf16.msra.mxu1 %v4723_v0 }
0x11e0   :  { %3645 = vmatprep.subr.bf16.mxu1 %v4729_v1 }
0x11e3   :  { %3646 = vmatpush3.bf16.msra.mxu1 %v4735_v7 }
0x11e4   :  { %3647 = vmatprep.subr.bf16.mxu1 %v4741_v8 }
0x11e7   :  { %3648 = vmatpush3.bf16.msra.mxu1 %v4747_v24 }
0x11e8   :  { %3649 = vmatprep.subr.bf16.mxu1 %v4753_v25 }
0x11eb   :  { %3650 = vmatpush3.bf16.msra.mxu1 %v4760_v27 }
0x11ec   :  { %3651 = vmatprep.subr.bf16.mxu1 %v4766_v28 }
0x11ef   :  { %3652 = vmatpush3.bf16.msra.mxu1 %v4771_v29 }
0x11f0   :  { %3653 = vmatprep.subr.bf16.mxu1 %v4778_v30 }
0x11f3   :  { %3654 = vmatpush3.bf16.msra.mxu1 %v4783_v32 }
0x11f4   :  { %4035 = vmatprep.subr.bf16.mxu1 %v5995_v38 }
0x128e   :  { %v1107_v57 = vpop.f32.mrf.mxu1 }
0x128f   :  { %v1108_v43 = vadd.f32 %v5996_v60, %v1107_v57 }
0x1290   :  { %v4009_v47 = vpop.f32.mrf.mxu1 }
0x1291   :  { %vm1114_vm14 = vcmp.ge.s32.totalorder %v1108_v43, 0  ;;  %v1115_v36 = vxor.u32 2147483647, %v1108_v43 }
0x1292   :  { %v1110_v2 = vpop.f32.mrf.mxu1 }
0x1293   :  { %v1116_v10 = vsel %vm1114_vm14, %v1108_v43, %v1115_v36 }
0x1294   :  { %v1117_v3 = vand.u32 4294967264, %v1116_v10  ;;  %v4010_v11 = vpop.f32.mrf.mxu1 }
0x1296   :  { %v4996_v12 = vpop.f32.mrf.mxu1  ;;  %v1118_v40 = vor.u32 %v1117_v3, %v5997_v13 }
0x1298   :  { %v4025_v26 = vpop.f32.mrf.mxu1  ;;  %v1119_v5 = vsel %vm745_vm11, %v1118_v40, 2147483648 }
0x1299   :  { %v1121_v6 = vshra.s32 %v1119_v5, 16  ;;  %v1120_v37 = vand.u32 65535, %v1119_v5 }
0x129a   :  { %v1220_v46 = vpop.f32.mrf.mxu1 }
0x129b   :  { %v1123_v51 = vcvt.s32.f32 %v1121_v6  ;;  %v1122_v39 = vcvt.s32.f32 %v1120_v37  ;;  %v5037_v37 = vld [vmem:[%s5975_s10 + $0x28] sm:$0xff]  }
0x129c   :  { %v4026_v50 = vpop.f32.mrf.mxu1 }
0x129d   :  { %1124 = vmax.xlane.f32.xlu1 %v1123_v51 }
0x12ae   :  { %1232 = vrot.lane.b32.xlu1 %v1230_v52, %s4457_s24 }
0x1326   :  { %v1125_v35 = vpop.xlane.xlu1 %1124 }
0x1327   :  { %vm1126_vm15 = vcmp.eq.f32.partialorder %v1123_v51, %v1125_v35  ;;  %v1131_v43 = vcvt.f32.s32 %v1125_v35 }
0x1328   :  { %v1127_v42 = vsel %vm1126_vm15, %v1122_v39, -inf }
0x1329   :  { %1128 = vmax.xlane.f32.xlu0 %v1127_v42  ;;  %v1132_v10 = vshll.u32 %v1131_v43, 16 }
0x132a   :  { %v1233_v57 = vpop.permute.xlu1 %1232 }
0x132b   :  { %v1235_v47 = vsel %vm258_vm3, %v1230_v52, %v1233_v57  ;;  %v5031_v52 = vld [vmem:[%s5975_s10 + $0x68] sm:$0xff]  }
0x132c   :  { %v1237_v36 = vcombine.low %v1235_v47, %v1235_v47 }
0x132e   :  { %v1239_v40 = vmul.f32 %v1237_v36, %v4662_v31  ;;  %v5019_v31 = vld [vmem:[%s5975_s10 + $0x70] sm:$0xff]  }
0x1330   :  { %v1241_v5 = vcombine.high %v1239_v40, %v1239_v40  ;;  %v1243_v35 = vpack.c.bf16 %v1239_v40, %v1239_v40 }
0x1332   :  { %v1244_v50 = vpack.c.bf16 %v1241_v5, %v1241_v5 }
0x13b2   :  { %v1129_v2 = vpop.xlane.xlu0 %1128 }
0x13b3   :  { %v1130_v3 = vcvt.f32.s32 %v1129_v2 }
0x13b5   :  { %v1133_v11 = vadd.s32 %v1132_v10, %v1130_v3 }
0x13b7   :  { %v1134_v26 = vand.u32 31, %v1133_v11 }
0x13b9   :  { %v5004_v6 = vsub.s32 31, %v1134_v26 }
0x13bb   :  { %vm1136_vm1 = vcmp.eq.s32.totalorder %v4541_v4, %v5004_v6 }
0x13bc   :  { %v3457_v46 = vsel %vm1136_vm1, 1.0, %v5995_v38  ;;  %vm3378_vm1 = vcmask 23552  }
0x13bd   :  { %v1139_v51 = vpack.c.bf16 %v3457_v46, %v3457_v46 }
0x13bf   :  { %4016 = vmatmul.mubr.msk.bf16.vlgmr.msra.gmra.mxu0 %vm149_vm2, %v1139_v51 }
0x13c0   :  { %3618 = vmatpush3.bf16.msra.mxu0 %v5013_v9  ;;  %1277 = vmatprep.mubr.bf16.mxu0 %v1244_v50 }
0x13c1   :  { %3619 = vmatprep.subr.bf16.mxu0 %v5019_v31 }
0x13c4   :  { %3620 = vmatpush3.bf16.msra.mxu0 %v5025_v49 }
0x13c5   :  { %3621 = vmatprep.subr.bf16.mxu0 %v5031_v52 }
0x13c8   :  { %3622 = vmatpush3.bf16.msra.mxu0 %v5037_v37 }
0x13c9   :  { %3623 = vmatprep.subr.bf16.mxu0 %v4594_v14 }
0x13cc   :  { %3624 = vmatpush3.bf16.msra.mxu0 %v4600_v15 }
0x13cd   :  { %3625 = vmatprep.subr.bf16.mxu0 %v4605_v16 }
0x13d0   :  { %3626 = vmatpush3.bf16.msra.mxu0 %v4612_v17 }
0x13d1   :  { %3627 = vmatprep.subr.bf16.mxu0 %v4617_v18 }
0x13d4   :  { %3628 = vmatpush3.bf16.msra.mxu0 %v4624_v19 }
0x13d5   :  { %3629 = vmatprep.subr.bf16.mxu0 %v4632_v20 }
0x13d8   :  { %3630 = vmatpush3.bf16.msra.mxu0 %v4637_v21 }
0x13d9   :  { %3631 = vmatprep.subr.bf16.mxu0 %v4644_v22 }
0x13dc   :  { %3632 = vmatpush3.bf16.msra.mxu0 %v4649_v23 }
0x13dd   :  { %4027 = vmatprep.subr.bf16.mxu0 %v5995_v38 }
0x13df   :  { %1278 = vmatmul.mubr.bf16.vlgmr.msra.gmra.mxu0 %v1243_v35 }
0x13e0   :  { %4028 = vmatpush3.bf16.msra.mxu0 %v4791_v33  ;;  %4031 = vmatprep.mubr.msk.bf16.mxu0 %vm4456_vm0, %v5995_v38 }
0x13e1   :  { %4029 = vmatprep.subr.bf16.mxu0 %v5995_v38 }
0x13e4   :  { %4030 = vmatpush3.bf16.msra.mxu0 %v4809_v48 }
0x13e5   :  { %4043 = vmatprep.subr.bf16.mxu0 %v5995_v38 }
0x147f   :  { %v5057_v14 = vpop.f32.mrf.mxu0 }
0x1481   :  { %v4017_v15 = vpop.f32.mrf.mxu0 }
0x1483   :  { %v1180_v16 = vpop.f32.mrf.mxu0 }
0x1485   :  { %v4018_v17 = vpop.f32.mrf.mxu0 }
0x149f   :  { %v3633_v18 = vpop.f32.mrf.mxu0 }
0x14a1   :  { %v3634_v19 = vpop.f32.mrf.mxu0 }
0x14a2   :  { %v3635_v20 = vadd.f32 %v3634_v19, %v3633_v18 }
0x14a3   :  { %v3636_v21 = vpop.f32.mrf.mxu0 }
0x14a4   :  { %v1285_v22 = vsel %vm405_vm4, %v3635_v20, -inf }
0x14a5   :  { %v3637_v23 = vpop.f32.mrf.mxu0  ;;  %1286 = vmax.xlane.f32.xlu0 %v1285_v22  ;;  %v5095_v22 = vld [vmem:[%s5975_s10 + $0x78] sm:$0xff]  }
0x14a6   :  { %v3461_v23 = vld [vmem:[%s5969_s4 + $0x8] sm:$0xf] }
0x152e   :  { %v1287_v33 = vpop.xlane.xlu0 %1286 }
0x152f   :  { %v1288_v39 = vsub.f32 %v3635_v20, %v1287_v33  ;;  %v1411_v33 = vadd.f32 %v3461_v23, %v4996_v12 }
0x1531   :  { %v1289_v42 = vmul.f32 1.442695, %v1288_v39 }
0x1533   :  { %4274 = vpow2.f32 %v1289_v42 }
0x1540   :  { %v4275_v48 = vpop.eup %4274 }
0x1541   :  { %v1291_v57 = vsel %vm405_vm4, %v4275_v48, 0.0 }
0x1542   :  { %1292 = vadd.xlane.f32.xlu0 %v1291_v57 }
0x15cb   :  { %v1293_v43 = vpop.xlane.xlu0 %1292 }
0x15cc   :  { %4276 = vrcp.f32 %v1293_v43 }
0x15d9   :  { %v4277_v47 = vpop.eup %4276 }
0x15da   :  { %v1295_v36 = vmul.f32 %v4277_v47, %v4275_v48 }
0x15dc   :  { %1297 = vrot.lane.b32.xlu0 %v1295_v36, %s4458_s26 }
0x164e   :  { %v1298_v2 = vpop.permute.xlu0 %1297 }
0x164f   :  { %v1300_v10 = vsel %vm421_vm5, %v1295_v36, %v1298_v2 }
0x1650   :  { %1302 = vrot.lane.b32.xlu1 %v1300_v10, %s4459_s27 }
0x16c2   :  { %v1303_v3 = vpop.permute.xlu1 %1302 }
0x16c3   :  { %v1305_v11 = vsel %vm427_vm6, %v1300_v10, %v1303_v3 }
0x16c4   :  { %1307 = vrot.lane.b32.xlu1 %v1305_v11, %s4454_s23 }
0x1736   :  { %v1308_v40 = vpop.permute.xlu1 %1307 }
0x1737   :  { %v1310_v26 = vsel %vm149_vm2, %v1305_v11, %v1308_v40 }
0x1738   :  { %1312 = vrot.lane.b32.xlu1 %v1310_v26, %s4457_s24 }
0x17aa   :  { %v1313_v5 = vpop.permute.xlu1 %1312 }
0x17ab   :  { %v1315_v46 = vsel %vm258_vm3, %v1310_v26, %v1313_v5 }
0x17ac   :  { %v1317_v51 = vcombine.low %v1315_v46, %v1315_v46 }
0x17ae   :  { %v1319_v50 = vmul.f32 %v1317_v51, %v4800_v41 }
0x17b0   :  { %v1321_v35 = vcombine.high %v1319_v50, %v1319_v50  ;;  %v1323_v16 = vpack.c.bf16 %v1319_v50, %v1319_v50 }
0x17b2   :  { %v1324_v15 = vpack.c.bf16 %v1321_v35, %v1321_v35 }
0x17b4   :  { %1357 = vmatprep.mubr.bf16.mxu1 %v1324_v15 }
0x17b5   :  { %1358 = vmatmul.mubr.bf16.vlgmr.msra.gmra.mxu1 %v1323_v16 }
0x17b6   :  { %4036 = vmatpush3.bf16.msra.mxu1 %v4844_v62  ;;  %4039 = vmatprep.mubr.msk.bf16.mxu1 %vm4456_vm0, %v5995_v38  ;;  %v5080_v62 = vld [vmem:[%s5972_s7 + $0x8] sm:$0xff]  }
0x17b7   :  { %4037 = vmatprep.subr.bf16.mxu1 %v5995_v38 }
0x17ba   :  { %4038 = vmatpush3.bf16.msra.mxu1 %v4851_v34  ;;  %v5089_v34 = vld [vmem:[%s5972_s7] sm:$0xff]  }
0x17bb   :  { %4051 = vmatprep.subr.bf16.mxu1 %v5995_v38 }
0x1875   :  { %v3655_v17 = vpop.f32.mrf.mxu1 }
0x1877   :  { %v3656_v18 = vpop.f32.mrf.mxu1 }
0x1878   :  { %v3657_v19 = vadd.f32 %v3656_v18, %v3655_v17 }
0x1879   :  { %v3658_v41 = vpop.f32.mrf.mxu1 }
0x187a   :  { %v1365_v20 = vpack.c.bf16 %v3657_v19, %v3657_v19 }
0x187b   :  { %v3659_v21 = vpop.f32.mrf.mxu1 }
0x187c   :  { %4032 = vmatmul.mubr.msk.bf16.vlgmr.msra.gmra.mxu0 %vm149_vm2, %v1365_v20 }
0x187d   :  { %4044 = vmatpush3.bf16.msra.mxu0 %v5080_v62  ;;  %4047 = vmatprep.mubr.msk.bf16.mxu0 %vm4456_vm0, %v5995_v38 }
0x187e   :  { %4045 = vmatprep.subr.bf16.mxu0 %v5995_v38 }
0x1881   :  { %4046 = vmatpush3.bf16.msra.mxu0 %v5089_v34 }
0x1882   :  { %3673 = vmatprep.subr.bf16.mxu0 %v5095_v22 }
0x193c   :  { %v1403_v39 = vpop.f32.mrf.mxu0 }
0x193d   :  { %v1412_v42 = vadd.f32 %v1411_v33, %v1403_v39 }
0x193e   :  { %v4033_v48 = vpop.f32.mrf.mxu0 }
0x193f   :  { %v1413_v57 = vadd.f32 %v1412_v42, %v5057_v14 }
0x1940   :  { %v1406_v43 = vpop.f32.mrf.mxu0 }
0x1941   :  { %v3462_v47 = vmul.f32 -1.442695, %v1413_v57 }
0x1942   :  { %v4034_v36 = vpop.f32.mrf.mxu0 }
0x1943   :  { %4278 = vpow2.f32 %v3462_v47 }
0x1944   :  { %4280 = vtanh.f32 %v1413_v57  ;;  %v5150_v57 = vld [vmem:[%s5967_s2] sm:$0xff] }
0x1950   :  { %v4279_v2 = vpop.eup %4278 }
0x1951   :  { %v1418_v10 = vadd.f32 1.0, %v4279_v2  ;;  %v4281_v3 = vpop.eup %4280  ;;  %v3375_v2 = vsel %vm3374_vm10, %v4900_v44, %v5004_v6  ;;  %v5168_v44 = vld [vmem:[%s5975_s10 + $0x60] sm:$0xff]  }
0x1952   :  { %v5174_v6 = vld [vmem:[%s5975_s10 + $0x20] sm:$0xff]  }
0x1953   :  { %4282 = vrcp.f32 %v1418_v10 }
0x1960   :  { %v4283_v11 = vpop.eup %4282 }
0x1961   :  { %v1421_v40 = vsel %vm4826_vm9, %v4281_v3, %v4283_v11 }
0x1962   :  { %1424 = vrot.lane.b32.xlu1 %v1421_v40, %s4457_s24  ;;  %v1422_v14 = vmul.f32 %v1421_v40, %v4964_v53 }
0x19d4   :  { %v1425_v12 = vpop.permute.xlu1 %1424 }
0x19d5   :  { %v1427_v26 = vmul.f32 %v1425_v12, %v1421_v40 }
0x19d7   :  { %1429 = vrot.lane.b32.xlu1 %v1427_v26, %s4454_s23  ;;  %v5180_v26 = vld [vmem:[%s5975_s10 + $0x58] sm:$0xff]  }
0x1a49   :  { %v1430_v5 = vpop.permute.xlu1 %1429 }
0x1a4a   :  { %v5108_v46 = vadd.f32 %v1430_v5, %v1422_v14  ;;  %v5186_v14 = vld [vmem:[%s5975_s10 + $0x18] sm:$0xff]   ;;  %v5192_v5 = vld [vmem:[%s5975_s10 + $0x50] sm:$0xff]  }
0x1a4c   :  { %4284 = vtanh.f32 %v5108_v46 }
0x1a59   :  { %v4285_v51 = vpop.eup %4284 }
0x1a5a   :  { %1435 = vrot.lane.b32.xlu0 %v4285_v51, %s4457_s24  ;;  %v5198_v51 = vld [vmem:[%s5975_s10 + $0x10] sm:$0xff]  }
0x1acc   :  { %v1436_v50 = vpop.permute.xlu0 %1435 }
0x1acd   :  { %v1438_v35 = vmul.f32 %v1436_v50, %v1421_v40  ;;  %v5204_v50 = vld [vmem:[%s5975_s10 + $0x48] sm:$0xff]  }
0x1acf   :  { %v1439_v15 = vpack.c.bf16 %v1438_v35, %v1438_v35 }
0x1ad1   :  { %1441 = vrot.lane.b32.xlu1 %v1439_v15, %s4454_s23  ;;  %v5216_v15 = vld [vmem:[%s5975_s10 + $0x40] sm:$0xff]  }
0x1ad5   :  { %1597 = vrot.lane.b32.xlu1 %v1438_v35, %s4454_s23 }
0x1ad9   :  { %1600 = vrot.lane.b32.xlu1 %v1438_v35, %s4457_s24  ;;  %v5210_v35 = vld [vmem:[%s5975_s10 + $0x8] sm:$0xff]  }
0x1b43   :  { %v1442_v16 = vpop.permute.xlu1 %1441 }
0x1b44   :  { %4040 = vmatmul.mubr.msk.bf16.vlgmr.msra.gmra.mxu1 %vm149_vm2, %v1442_v16 }
0x1b45   :  { %4052 = vmatpush3.bf16.msra.mxu1 %v4676_v54  ;;  %4055 = vmatprep.mubr.msk.bf16.mxu1 %vm4456_vm0, %v5995_v38 }
0x1b46   :  { %4053 = vmatprep.subr.bf16.mxu1 %v5995_v38 }
0x1b49   :  { %4054 = vmatpush3.bf16.msra.mxu1 %v4682_v55 }
0x1b4a   :  { %3695 = vmatprep.subr.bf16.mxu1 %v4688_v56 }
0x1b4c   :  { %4056 = vmatmul.mubr.msk.bf16.vlgmr.msra.gmra.mxu1 %vm149_vm2, %v1442_v16  ;;  %v5222_v16 = vld [vmem:[%s5975_s10] sm:$0xff]  }
0x1b4d   :  { %3696 = vmatpush3.bf16.msra.mxu1 %v4696_v58 }
0x1b4e   :  { %3697 = vmatprep.subr.bf16.mxu1 %v4702_v59 }
0x1b51   :  { %3698 = vmatpush3.bf16.msra.mxu1 %v4709_v61 }
0x1b52   :  { %3699 = vmatprep.subr.bf16.mxu1 %v4716_v63 }
0x1b55   :  { %3700 = vmatpush3.bf16.msra.mxu1 %v4723_v0 }
0x1b56   :  { %3701 = vmatprep.subr.bf16.mxu1 %v4729_v1 }
0x1b59   :  { %3702 = vmatpush3.bf16.msra.mxu1 %v4735_v7 }
0x1b5a   :  { %3703 = vmatprep.subr.bf16.mxu1 %v4741_v8 }
0x1b5d   :  { %3704 = vmatpush3.bf16.msra.mxu1 %v4747_v24 }
0x1b5e   :  { %3705 = vmatprep.subr.bf16.mxu1 %v4753_v25 }
0x1b61   :  { %3706 = vmatpush3.bf16.msra.mxu1 %v4760_v27 }
0x1b62   :  { %3707 = vmatprep.subr.bf16.mxu1 %v4766_v28 }
0x1b65   :  { %3708 = vmatpush3.bf16.msra.mxu1 %v4771_v29 }
0x1b66   :  { %3709 = vmatprep.subr.bf16.mxu1 %v4778_v30  ;;  %v1598_v30 = vpop.permute.xlu1 %1597 }
0x1b69   :  { %3710 = vmatpush3.bf16.msra.mxu1 %v4783_v32 }
0x1b6a   :  { %4067 = vmatprep.subr.bf16.mxu1 %v5995_v38  ;;  %v1601_v32 = vpop.permute.xlu1 %1600 }
0x1b6b   :  { %v1603_v53 = vsel %vm149_vm2, %v1598_v30, %v1601_v32 }
0x1c04   :  { %v1480_v54 = vpop.f32.mrf.mxu1 }
0x1c05   :  { %v1481_v55 = vadd.f32 %v5996_v60, %v1480_v54 }
0x1c06   :  { %v4041_v56 = vpop.f32.mrf.mxu1 }
0x1c07   :  { %vm1487_vm7 = vcmp.ge.s32.totalorder %v1481_v55, 0  ;;  %v1488_v58 = vxor.u32 2147483647, %v1481_v55  ;;  %v5238_v56 = vld [vmem:[%s5971_s6] sm:$0xff]  }
0x1c08   :  { %v1483_v59 = vpop.f32.mrf.mxu1 }
0x1c09   :  { %v1489_v61 = vsel %vm1487_vm7, %v1481_v55, %v1488_v58  ;;  %v5229_v55 = vld [vmem:[%s5971_s6 + $0x8] sm:$0xff]  }
0x1c0a   :  { %v1490_v63 = vand.u32 4294967264, %v1489_v61  ;;  %v4042_v0 = vpop.f32.mrf.mxu1 }
0x1c0c   :  { %v5140_v1 = vpop.f32.mrf.mxu1  ;;  %v1491_v7 = vor.u32 %v1490_v63, %v5997_v13 }
0x1c0e   :  { %v4057_v8 = vpop.f32.mrf.mxu1  ;;  %v1492_v24 = vsel %vm745_vm11, %v1491_v7, 2147483648 }
0x1c0f   :  { %v1494_v25 = vshra.s32 %v1492_v24, 16  ;;  %v1493_v60 = vand.u32 65535, %v1492_v24 }
0x1c10   :  { %v1593_v27 = vpop.f32.mrf.mxu1 }
0x1c11   :  { %v1496_v28 = vcvt.s32.f32 %v1494_v25  ;;  %v1495_v18 = vcvt.s32.f32 %v1493_v60 }
0x1c12   :  { %v4058_v29 = vpop.f32.mrf.mxu1 }
0x1c13   :  { %1497 = vmax.xlane.f32.xlu0 %v1496_v28 }
0x1c29   :  { %1605 = vrot.lane.b32.xlu0 %v1603_v53, %s4457_s24 }
0x1c9c   :  { %v1498_v17 = vpop.xlane.xlu0 %1497 }
0x1c9d   :  { %vm1499_vm8 = vcmp.eq.f32.partialorder %v1496_v28, %v1498_v17  ;;  %v1504_v20 = vcvt.f32.s32 %v1498_v17 }
0x1c9e   :  { %v1500_v19 = vsel %vm1499_vm8, %v1495_v18, -inf }
0x1c9f   :  { %1501 = vmax.xlane.f32.xlu1 %v1500_v19  ;;  %v1505_v39 = vshll.u32 %v1504_v20, 16 }
0x1ca0   :  { %v1606_v41 = vpop.permute.xlu0 %1605 }
0x1ca1   :  { %v1608_v21 = vsel %vm258_vm3, %v1603_v53, %v1606_v41 }
0x1ca2   :  { %v1610_v23 = vcombine.low %v1608_v21, %v1608_v21 }
0x1ca4   :  { %v1612_v43 = vmul.f32 %v5150_v57, %v1610_v23 }
0x1ca6   :  { %v1614_v10 = vcombine.high %v1612_v43, %v1612_v43  ;;  %v1616_v54 = vpack.c.bf16 %v1612_v43, %v1612_v43  ;;  %v5257_v43 = vld [vmem:[%s5968_s3] sm:$0xff] }
0x1ca8   :  { %v1617_v12 = vpack.c.bf16 %v1614_v10, %v1614_v10 }
0x1d28   :  { %v1502_v33 = vpop.xlane.xlu1 %1501 }
0x1d29   :  { %v1503_v42 = vcvt.f32.s32 %v1502_v33 }
0x1d2b   :  { %v1506_v48 = vadd.s32 %v1505_v39, %v1503_v42 }
0x1d2d   :  { %v1507_v47 = vand.u32 31, %v1506_v48 }
0x1d2f   :  { %v1508_v36 = vsub.s32 31, %v1507_v47 }
0x1d31   :  { %vm1509_vm13 = vcmp.eq.s32.totalorder %v4541_v4, %v1508_v36  ;;  %v5156_v3 = vsel %vm3376_vm12, %v3375_v2, %v1508_v36  ;;  %vm3380_vm12 = vcmask 31744  }
0x1d32   :  { %v3464_v11 = vsel %vm1509_vm13, 1.0, %v5995_v38 }
0x1d33   :  { %v1512_v40 = vpack.c.bf16 %v3464_v11, %v3464_v11  ;;  %v5263_v11 = vld [vmem:[%s5973_s8 + $0x8] sm:$0xff]  }
0x1d35   :  { %4048 = vmatmul.mubr.msk.bf16.vlgmr.msra.gmra.mxu0 %vm149_vm2, %v1512_v40  ;;  %v5272_v40 = vld [vmem:[%s5973_s8] sm:$0xff]  }
0x1d36   :  { %3674 = vmatpush3.bf16.msra.mxu0 %v5013_v9  ;;  %1650 = vmatprep.mubr.bf16.mxu0 %v1617_v12 }
0x1d37   :  { %3675 = vmatprep.subr.bf16.mxu0 %v5019_v31 }
0x1d3a   :  { %3676 = vmatpush3.bf16.msra.mxu0 %v5025_v49 }
0x1d3b   :  { %3677 = vmatprep.subr.bf16.mxu0 %v5031_v52 }
0x1d3e   :  { %3678 = vmatpush3.bf16.msra.mxu0 %v5037_v37 }
0x1d3f   :  { %3679 = vmatprep.subr.bf16.mxu0 %v5168_v44 }
0x1d42   :  { %3680 = vmatpush3.bf16.msra.mxu0 %v5174_v6 }
0x1d43   :  { %3681 = vmatprep.subr.bf16.mxu0 %v5180_v26 }
0x1d46   :  { %3682 = vmatpush3.bf16.msra.mxu0 %v5186_v14 }
0x1d47   :  { %3683 = vmatprep.subr.bf16.mxu0 %v5192_v5 }
0x1d4a   :  { %3684 = vmatpush3.bf16.msra.mxu0 %v5198_v51 }
0x1d4b   :  { %3685 = vmatprep.subr.bf16.mxu0 %v5204_v50 }
0x1d4e   :  { %3686 = vmatpush3.bf16.msra.mxu0 %v5210_v35 }
0x1d4f   :  { %3687 = vmatprep.subr.bf16.mxu0 %v5216_v15 }
0x1d52   :  { %3688 = vmatpush3.bf16.msra.mxu0 %v5222_v16 }
0x1d53   :  { %4059 = vmatprep.subr.bf16.mxu0 %v5995_v38 }
0x1d55   :  { %1651 = vmatmul.mubr.bf16.vlgmr.msra.gmra.mxu0 %v1616_v54 }
0x1d56   :  { %4060 = vmatpush3.bf16.msra.mxu0 %v5229_v55  ;;  %4063 = vmatprep.mubr.msk.bf16.mxu0 %vm4456_vm0, %v5995_v38 }
0x1d57   :  { %4061 = vmatprep.subr.bf16.mxu0 %v5995_v38 }
0x1d5a   :  { %4062 = vmatpush3.bf16.msra.mxu0 %v5238_v56 }
0x1d5b   :  { %4075 = vmatprep.subr.bf16.mxu0 %v5995_v38 }
0x1df5   :  { %v5242_v58 = vpop.f32.mrf.mxu0 }
0x1df7   :  { %v4049_v59 = vpop.f32.mrf.mxu0 }
0x1df9   :  { %v1553_v61 = vpop.f32.mrf.mxu0 }
0x1dfb   :  { %v4050_v63 = vpop.f32.mrf.mxu0 }
0x1e15   :  { %v3689_v0 = vpop.f32.mrf.mxu0 }
0x1e17   :  { %v3690_v7 = vpop.f32.mrf.mxu0 }
0x1e18   :  { %v3691_v8 = vadd.f32 %v3690_v7, %v3689_v0  ;;  %v3468_v7 = vld [vmem:[%s5969_s4 + $0xc] sm:$0xf] }
0x1e19   :  { %v3692_v24 = vpop.f32.mrf.mxu0 }
0x1e1a   :  { %v1658_v25 = vsel %vm405_vm4, %v3691_v8, -inf }
0x1e1b   :  { %v3693_v27 = vpop.f32.mrf.mxu0  ;;  %1659 = vmax.xlane.f32.xlu1 %v1658_v25 }
0x1ea4   :  { %v1660_v28 = vpop.xlane.xlu1 %1659 }
0x1ea5   :  { %v1661_v29 = vsub.f32 %v3691_v8, %v1660_v28  ;;  %v1784_v8 = vadd.f32 %v3468_v7, %v5140_v1  ;;  %v5374_v7 = vld [vmem:[%s5976_s11 + $0x18] sm:$0xff]  }
0x1ea7   :  { %v1662_v30 = vmul.f32 1.442695, %v1661_v29 }
0x1ea9   :  { %4286 = vpow2.f32 %v1662_v30 }
0x1eb6   :  { %v4287_v32 = vpop.eup %4286 }
0x1eb7   :  { %v1664_v53 = vsel %vm405_vm4, %v4287_v32, 0.0 }
0x1eb8   :  { %1665 = vadd.xlane.f32.xlu1 %v1664_v53 }
0x1f41   :  { %v1666_v60 = vpop.xlane.xlu1 %1665 }
0x1f42   :  { %4288 = vrcp.f32 %v1666_v60 }
0x1f4f   :  { %v4289_v17 = vpop.eup %4288 }
0x1f50   :  { %v1668_v18 = vmul.f32 %v4289_v17, %v4287_v32 }
0x1f52   :  { %1670 = vrot.lane.b32.xlu0 %v1668_v18, %s4458_s26 }
0x1fc4   :  { %v1671_v19 = vpop.permute.xlu0 %1670 }
0x1fc5   :  { %v1673_v41 = vsel %vm421_vm5, %v1668_v18, %v1671_v19 }
0x1fc6   :  { %1675 = vrot.lane.b32.xlu1 %v1673_v41, %s4459_s27 }
0x2038   :  { %v1676_v20 = vpop.permute.xlu1 %1675 }
0x2039   :  { %v1678_v21 = vsel %vm427_vm6, %v1673_v41, %v1676_v20 }
0x203a   :  { %1680 = vrot.lane.b32.xlu0 %v1678_v21, %s4454_s23 }
0x20ac   :  { %v1681_v23 = vpop.permute.xlu0 %1680 }
0x20ad   :  { %v1683_v33 = vsel %vm149_vm2, %v1678_v21, %v1681_v23 }
0x20ae   :  { %1685 = vrot.lane.b32.xlu0 %v1683_v33, %s4457_s24 }
0x2120   :  { %v1686_v39 = vpop.permute.xlu0 %1685 }
0x2121   :  { %v1688_v42 = vsel %vm258_vm3, %v1683_v33, %v1686_v39 }
0x2122   :  { %v1690_v48 = vcombine.low %v1688_v42, %v1688_v42 }
0x2124   :  { %v1692_v47 = vmul.f32 %v5257_v43, %v1690_v48 }
0x2126   :  { %v1694_v36 = vcombine.high %v1692_v47, %v1692_v47  ;;  %v1696_v10 = vpack.c.bf16 %v1692_v47, %v1692_v47  ;;  %v5313_v47 = vld [vmem:[%s5970_s5] sm:$0xff]  }
0x2128   :  { %v1697_v2 = vpack.c.bf16 %v1694_v36, %v1694_v36  ;;  %v5319_v36 = vld [vmem:[%s5976_s11 + $0x78] sm:$0xff]  }
0x212a   :  { %1730 = vmatprep.mubr.bf16.mxu1 %v1697_v2  ;;  %v5326_v2 = vld [vmem:[%s5976_s11 + $0x38] sm:$0xff]  }
0x212b   :  { %1731 = vmatmul.mubr.bf16.vlgmr.msra.gmra.mxu1 %v1696_v10  ;;  %v5332_v10 = vld [vmem:[%s5976_s11 + $0x70] sm:$0xff]  }
0x212c   :  { %4068 = vmatpush3.bf16.msra.mxu1 %v5263_v11  ;;  %4071 = vmatprep.mubr.msk.bf16.mxu1 %vm4456_vm0, %v5995_v38 }
0x212d   :  { %4069 = vmatprep.subr.bf16.mxu1 %v5995_v38 }
0x2130   :  { %4070 = vmatpush3.bf16.msra.mxu1 %v5272_v40 }
0x2131   :  { %4083 = vmatprep.subr.bf16.mxu1 %v5995_v38 }
0x21eb   :  { %v3711_v12 = vpop.f32.mrf.mxu1 }
0x21ed   :  { %v3712_v54 = vpop.f32.mrf.mxu1 }
0x21ee   :  { %v3713_v59 = vadd.f32 %v3712_v54, %v3711_v12  ;;  %v5338_v12 = vld [vmem:[%s5976_s11 + $0x30] sm:$0xff]   ;;  %v5344_v54 = vld [vmem:[%s5976_s11 + $0x68] sm:$0xff]  }
0x21ef   :  { %v3714_v61 = vpop.f32.mrf.mxu1 }
0x21f0   :  { %v1738_v63 = vpack.c.bf16 %v3713_v59, %v3713_v59  ;;  %v5350_v59 = vld [vmem:[%s5976_s11 + $0x28] sm:$0xff]   ;;  %v5356_v61 = vld [vmem:[%s5976_s11 + $0x60] sm:$0xff]  }
0x21f1   :  { %v3715_v0 = vpop.f32.mrf.mxu1 }
0x21f2   :  { %4064 = vmatmul.mubr.msk.bf16.vlgmr.msra.gmra.mxu0 %vm149_vm2, %v1738_v63  ;;  %v5362_v63 = vld [vmem:[%s5976_s11 + $0x20] sm:$0xff]   ;;  %v5368_v0 = vld [vmem:[%s5976_s11 + $0x58] sm:$0xff]  }
0x21f3   :  { %4076 = vmatpush3.bf16.msra.mxu0 %v5080_v62  ;;  %4079 = vmatprep.mubr.msk.bf16.mxu0 %vm4456_vm0, %v5995_v38 }
0x21f4   :  { %4077 = vmatprep.subr.bf16.mxu0 %v5995_v38 }
0x21f7   :  { %4078 = vmatpush3.bf16.msra.mxu0 %v5089_v34 }
0x21f8   :  { %3729 = vmatprep.subr.bf16.mxu0 %v5095_v22 }
0x22b2   :  { %v1776_v24 = vpop.f32.mrf.mxu0 }
0x22b3   :  { %v1785_v25 = vadd.f32 %v1784_v8, %v1776_v24  ;;  %v5380_v8 = vld [vmem:[%s5976_s11 + $0x50] sm:$0xff]  }
0x22b4   :  { %v4065_v27 = vpop.f32.mrf.mxu0  ;;  %v5386_v24 = vld [vmem:[%s5976_s11 + $0x10] sm:$0xff]  }
0x22b5   :  { %v1786_v28 = vadd.f32 %v1785_v25, %v5242_v58  ;;  %v5392_v25 = vld [vmem:[%s5976_s11 + $0x48] sm:$0xff]  }
0x22b6   :  { %v1779_v29 = vpop.f32.mrf.mxu0  ;;  %v5398_v27 = vld [vmem:[%s5976_s11 + $0x8] sm:$0xff]  }
0x22b7   :  { %v3469_v30 = vmul.f32 -1.442695, %v1786_v28  ;;  %v5410_v29 = vld [vmem:[%s5976_s11] sm:$0xff]  }
0x22b8   :  { %v4066_v32 = vpop.f32.mrf.mxu0  ;;  %5999 = vst [vmem:[#allocation7_spill] sm:$0xff] %v5410_v29 }
0x22b9   :  { %4290 = vpow2.f32 %v3469_v30  ;;  %v5417_v32 = vld [vmem:[%s5974_s9] ss:$0 sm:$0xff] }
0x22ba   :  { %4292 = vtanh.f32 %v1786_v28  ;;  %v5404_v28 = vld [vmem:[%s5976_s11 + $0x40] sm:$0xff]   ;;  %6000 = vst [vmem:[#allocation8_spill] sm:$0xff] %v5417_v32 }
0x22bb   :  { %5998 = vst [vmem:[#allocation5_spill] sm:$0xff] %v5404_v28 }
0x22c6   :  { %v4291_v53 = vpop.eup %4290 }
0x22c7   :  { %v1791_v60 = vadd.f32 1.0, %v4291_v53  ;;  %v4293_v17 = vpop.eup %4292 }
0x22c9   :  { %4294 = vrcp.f32 %v1791_v60 }
0x22d6   :  { %v4295_v18 = vpop.eup %4294 }
0x22d7   :  { %v1794_v19 = vsel %vm4826_vm9, %v4293_v17, %v4295_v18 }
0x22d8   :  { %1797 = vrot.lane.b32.xlu0 %v1794_v19, %s4457_s24  ;;  %v1795_v58 = vmul.f32 %v1794_v19, %v5108_v46  ;;  %v5304_v46 = vld [vmem:[%s5970_s5 + $0x8] sm:$0xff]  }
0x234a   :  { %v1798_v1 = vpop.permute.xlu0 %1797 }
0x234b   :  { %v1800_v41 = vmul.f32 %v1798_v1, %v1794_v19 }
0x234d   :  { %1802 = vrot.lane.b32.xlu0 %v1800_v41, %s4454_s23 }
0x23bf   :  { %v1803_v20 = vpop.permute.xlu0 %1802 }
0x23c0   :  { %v5293_v21 = vadd.f32 %v1803_v20, %v1795_v58 }
0x23c2   :  { %4296 = vtanh.f32 %v5293_v21 }
0x23cf   :  { %v4297_v23 = vpop.eup %4296 }
0x23d0   :  { %1808 = vrot.lane.b32.xlu1 %v4297_v23, %s4457_s24 }
0x2442   :  { %v1809_v33 = vpop.permute.xlu1 %1808 }
0x2443   :  { %v1811_v39 = vmul.f32 %v1809_v33, %v1794_v19 }
0x2445   :  { %v1812_v42 = vpack.c.bf16 %v1811_v39, %v1811_v39 }
0x2447   :  { %1814 = vrot.lane.b32.xlu0 %v1812_v42, %s4454_s23 }
0x244b   :  { %1970 = vrot.lane.b32.xlu0 %v1811_v39, %s4454_s23 }
0x244f   :  { %1973 = vrot.lane.b32.xlu0 %v1811_v39, %s4457_s24 }
0x24b9   :  { %v1815_v48 = vpop.permute.xlu0 %1814 }
0x24ba   :  { %4072 = vmatmul.mubr.msk.bf16.vlgmr.msra.gmra.mxu1 %vm149_vm2, %v1815_v48 }
0x24bb   :  { %4084 = vmatpush3.bf16.msra.mxu1 %v5304_v46  ;;  %4087 = vmatprep.mubr.msk.bf16.mxu1 %vm4456_vm0, %v5995_v38 }
0x24bc   :  { %4085 = vmatprep.subr.bf16.mxu1 %v5995_v38 }
0x24bf   :  { %4086 = vmatpush3.bf16.msra.mxu1 %v5313_v47 }
0x24c0   :  { %3751 = vmatprep.subr.bf16.mxu1 %v5319_v36 }
0x24c2   :  { %4088 = vmatmul.mubr.msk.bf16.vlgmr.msra.gmra.mxu1 %vm149_vm2, %v1815_v48 }
0x24c3   :  { %3752 = vmatpush3.bf16.msra.mxu1 %v5326_v2 }
0x24c4   :  { %3753 = vmatprep.subr.bf16.mxu1 %v5332_v10 }
0x24c7   :  { %3754 = vmatpush3.bf16.msra.mxu1 %v5338_v12 }
0x24c8   :  { %3755 = vmatprep.subr.bf16.mxu1 %v5344_v54 }
0x24cb   :  { %3756 = vmatpush3.bf16.msra.mxu1 %v5350_v59 }
0x24cc   :  { %3757 = vmatprep.subr.bf16.mxu1 %v5356_v61 }
0x24cf   :  { %3758 = vmatpush3.bf16.msra.mxu1 %v5362_v63 }
0x24d0   :  { %3759 = vmatprep.subr.bf16.mxu1 %v5368_v0 }
0x24d3   :  { %3760 = vmatpush3.bf16.msra.mxu1 %v5374_v7 }
0x24d4   :  { %3761 = vmatprep.subr.bf16.mxu1 %v5380_v8 }
0x24d7   :  { %3762 = vmatpush3.bf16.msra.mxu1 %v5386_v24 }
0x24d8   :  { %3763 = vmatprep.subr.bf16.mxu1 %v5392_v25 }
0x24db   :  { %3764 = vmatpush3.bf16.msra.mxu1 %v5398_v27 }
0x24dc   :  { %3765 = vmatprep.subr.bf16.mxu1 %v5404_v28 }
0x24df   :  { %3766 = vmatpush3.bf16.msra.mxu1 %v5410_v29 }
0x24e0   :  { %4099 = vmatprep.subr.bf16.mxu1 %v5995_v38 }
0x257a   :  { %v1853_v30 = vpop.f32.mrf.mxu1 }
0x257b   :  { %v1854_v53 = vadd.f32 %v5417_v32, %v1853_v30  ;;  %v1971_v30 = vpop.permute.xlu0 %1970 }
0x257c   :  { %v4073_v60 = vpop.f32.mrf.mxu1 }
0x257d   :  { %vm1860_vm14 = vcmp.ge.s32.totalorder %v1854_v53, 0  ;;  %v1861_v17 = vxor.u32 2147483647, %v1854_v53 }
0x257e   :  { %v1856_v18 = vpop.f32.mrf.mxu1 }
0x257f   :  { %v1862_v19 = vsel %vm1860_vm14, %v1854_v53, %v1861_v17  ;;  %v1974_v60 = vpop.permute.xlu0 %1973 }
0x2580   :  { %v1863_v1 = vand.u32 4294967264, %v1862_v19  ;;  %v4074_v41 = vpop.f32.mrf.mxu1  ;;  %v1976_v32 = vsel %vm149_vm2, %v1971_v30, %v1974_v60 }
0x2582   :  { %v5420_v58 = vpop.f32.mrf.mxu1  ;;  %v1864_v20 = vor.u32 %v1863_v1, %v5997_v13 }
0x2584   :  { %v4089_v23 = vpop.f32.mrf.mxu1  ;;  %v1865_v33 = vsel %vm745_vm11, %v1864_v20, 2147483648 }
0x2585   :  { %v1867_v39 = vshra.s32 %v1865_v33, 16  ;;  %v1866_v53 = vand.u32 65535, %v1865_v33 }
0x2586   :  { %v1966_v42 = vpop.f32.mrf.mxu1 }
0x2587   :  { %v1869_v48 = vcvt.s32.f32 %v1867_v39  ;;  %v1868_v18 = vcvt.s32.f32 %v1866_v53 }
0x2588   :  { %v4090_v29 = vpop.f32.mrf.mxu1 }
0x2589   :  { %1870 = vmax.xlane.f32.xlu1 %v1869_v48 }
0x259a   :  { %1978 = vrot.lane.b32.xlu1 %v1976_v32, %s4457_s24 }
0x2612   :  { %v1871_v17 = vpop.xlane.xlu1 %1870 }
0x2613   :  { %vm1872_vm15 = vcmp.eq.f32.partialorder %v1869_v48, %v1871_v17  ;;  %v1877_v41 = vcvt.f32.s32 %v1871_v17 }
0x2614   :  { %v1873_v19 = vsel %vm1872_vm15, %v1868_v18, -inf }
0x2615   :  { %1874 = vmax.xlane.f32.xlu0 %v1873_v19  ;;  %v1878_v29 = vshll.u32 %v1877_v41, 16 }
0x2616   :  { %v1979_v1 = vpop.permute.xlu1 %1978 }
0x2617   :  { %v1981_v20 = vsel %vm258_vm3, %v1976_v32, %v1979_v1 }
0x2618   :  { %v1983_v23 = vcombine.low %v1981_v20, %v1981_v20 }
0x261a   :  { %v1985_v28 = vmul.f32 %v5150_v57, %v1983_v23 }
0x261c   :  { %v1987_v33 = vcombine.high %v1985_v28, %v1985_v28 }
0x261e   :  { %v1990_v32 = vpack.c.bf16 %v1987_v33, %v1987_v33 }
0x269e   :  { %v1875_v39 = vpop.xlane.xlu0 %1874 }
0x269f   :  { %v1876_v42 = vcvt.f32.s32 %v1875_v39 }
0x26a1   :  { %v1879_v13 = vadd.s32 %v1878_v29, %v1876_v42 }
0x26a3   :  { %v1880_v30 = vand.u32 31, %v1879_v13  ;;  %v1989_v13 = vpack.c.bf16 %v1985_v28, %v1985_v28 }
0x26a5   :  { %v1881_v60 = vsub.s32 31, %v1880_v30 }
0x26a7   :  { %vm1882_vm7 = vcmp.eq.s32.totalorder %v4541_v4, %v1881_v60  ;;  %v5430_v48 = vsel %vm3378_vm1, %v5156_v3, %v1881_v60  ;;  %vm3382_vm1 = vcmask 39936  }
0x26a8   :  { %v3471_v53 = vsel %vm1882_vm7, 1.0, %v5995_v38 }
0x26a9   :  { %v1885_v17 = vpack.c.bf16 %v3471_v53, %v3471_v53 }
0x26ab   :  { %4080 = vmatmul.mubr.msk.bf16.vlgmr.msra.gmra.mxu0 %vm149_vm2, %v1885_v17 }
0x26ac   :  { %3730 = vmatpush3.bf16.msra.mxu0 %v5013_v9  ;;  %2023 = vmatprep.mubr.bf16.mxu0 %v1990_v32 }
0x26ad   :  { %3731 = vmatprep.subr.bf16.mxu0 %v5019_v31 }
0x26b0   :  { %3732 = vmatpush3.bf16.msra.mxu0 %v5025_v49 }
0x26b1   :  { %3733 = vmatprep.subr.bf16.mxu0 %v5031_v52 }
0x26b4   :  { %3734 = vmatpush3.bf16.msra.mxu0 %v5037_v37 }
0x26b5   :  { %3735 = vmatprep.subr.bf16.mxu0 %v5168_v44 }
0x26b8   :  { %3736 = vmatpush3.bf16.msra.mxu0 %v5174_v6 }
0x26b9   :  { %3737 = vmatprep.subr.bf16.mxu0 %v5180_v26 }
0x26bc   :  { %3738 = vmatpush3.bf16.msra.mxu0 %v5186_v14 }
0x26bd   :  { %3739 = vmatprep.subr.bf16.mxu0 %v5192_v5 }
0x26c0   :  { %3740 = vmatpush3.bf16.msra.mxu0 %v5198_v51 }
0x26c1   :  { %3741 = vmatprep.subr.bf16.mxu0 %v5204_v50 }
0x26c4   :  { %3742 = vmatpush3.bf16.msra.mxu0 %v5210_v35 }
0x26c5   :  { %3743 = vmatprep.subr.bf16.mxu0 %v5216_v15 }
0x26c8   :  { %3744 = vmatpush3.bf16.msra.mxu0 %v5222_v16 }
0x26c9   :  { %4091 = vmatprep.subr.bf16.mxu0 %v5995_v38 }
0x26cb   :  { %2024 = vmatmul.mubr.bf16.vlgmr.msra.gmra.mxu0 %v1989_v13 }
0x26cc   :  { %4092 = vmatpush3.bf16.msra.mxu0 %v5229_v55  ;;  %4095 = vmatprep.mubr.msk.bf16.mxu0 %vm4456_vm0, %v5995_v38 }
0x26cd   :  { %4093 = vmatprep.subr.bf16.mxu0 %v5995_v38 }
0x26d0   :  { %4094 = vmatpush3.bf16.msra.mxu0 %v5238_v56 }
0x26d1   :  { %4107 = vmatprep.subr.bf16.mxu0 %v5995_v38 }
0x276b   :  { %v5456_v9 = vpop.f32.mrf.mxu0 }
0x276d   :  { %v4081_v31 = vpop.f32.mrf.mxu0 }
0x276f   :  { %v1926_v49 = vpop.f32.mrf.mxu0 }
0x2771   :  { %v4082_v52 = vpop.f32.mrf.mxu0 }
0x278b   :  { %v3745_v37 = vpop.f32.mrf.mxu0 }
0x278d   :  { %v3746_v3 = vpop.f32.mrf.mxu0 }
0x278e   :  { %v3747_v28 = vadd.f32 %v3746_v3, %v3745_v37 }
0x278f   :  { %v3748_v18 = vpop.f32.mrf.mxu0 }
0x2790   :  { %v2031_v19 = vsel %vm405_vm4, %v3747_v28, -inf }
0x2791   :  { %v3749_v1 = vpop.f32.mrf.mxu0  ;;  %2032 = vmax.xlane.f32.xlu0 %v2031_v19 }
0x281a   :  { %v2033_v41 = vpop.xlane.xlu0 %2032 }
0x281b   :  { %v2034_v20 = vsub.f32 %v3747_v28, %v2033_v41 }
0x281d   :  { %v2035_v23 = vmul.f32 1.442695, %v2034_v20 }
0x281f   :  { %4298 = vpow2.f32 %v2035_v23 }
0x282c   :  { %v4299_v39 = vpop.eup %4298 }
0x282d   :  { %v2037_v29 = vsel %vm405_vm4, %v4299_v39, 0.0 }
0x282e   :  { %2038 = vadd.xlane.f32.xlu0 %v2037_v29 }
0x28b7   :  { %v2039_v42 = vpop.xlane.xlu0 %2038 }
0x28b8   :  { %4300 = vrcp.f32 %v2039_v42  ;;  %v3475_v42 = vld [vmem:[%s5969_s4 + $0x10] sm:$0xf] }
0x28c5   :  { %v4301_v30 = vpop.eup %4300 }
0x28c6   :  { %v2041_v60 = vmul.f32 %v4301_v30, %v4299_v39  ;;  %v2157_v30 = vadd.f32 %v3475_v42, %v5420_v58 }
0x28c8   :  { %2043 = vrot.lane.b32.xlu0 %v2041_v60, %s4458_s26 }
0x293a   :  { %v2044_v33 = vpop.permute.xlu0 %2043 }
0x293b   :  { %v2046_v53 = vsel %vm421_vm5, %v2041_v60, %v2044_v33 }
0x293c   :  { %2048 = vrot.lane.b32.xlu1 %v2046_v53, %s4459_s27 }
0x29ae   :  { %v2049_v17 = vpop.permute.xlu1 %2048 }
0x29af   :  { %v2051_v32 = vsel %vm427_vm6, %v2046_v53, %v2049_v17 }
0x29b0   :  { %2053 = vrot.lane.b32.xlu1 %v2051_v32, %s4454_s23 }
0x2a22   :  { %v2054_v13 = vpop.permute.xlu1 %2053 }
0x2a23   :  { %v2056_v31 = vsel %vm149_vm2, %v2051_v32, %v2054_v13 }
0x2a24   :  { %2058 = vrot.lane.b32.xlu1 %v2056_v31, %s4457_s24 }
0x2a96   :  { %v2059_v49 = vpop.permute.xlu1 %2058 }
0x2a97   :  { %v2061_v52 = vsel %vm258_vm3, %v2056_v31, %v2059_v49 }
0x2a98   :  { %v2063_v37 = vcombine.low %v2061_v52, %v2061_v52 }
0x2a9a   :  { %v2065_v3 = vmul.f32 %v5257_v43, %v2063_v37 }
0x2a9c   :  { %v2067_v28 = vcombine.high %v2065_v3, %v2065_v3  ;;  %v2069_v19 = vpack.c.bf16 %v2065_v3, %v2065_v3 }
0x2a9e   :  { %v2070_v18 = vpack.c.bf16 %v2067_v28, %v2067_v28 }
0x2aa0   :  { %2103 = vmatprep.mubr.bf16.mxu1 %v2070_v18 }
0x2aa1   :  { %2104 = vmatmul.mubr.bf16.vlgmr.msra.gmra.mxu1 %v2069_v19 }
0x2aa2   :  { %4100 = vmatpush3.bf16.msra.mxu1 %v5263_v11  ;;  %4103 = vmatprep.mubr.msk.bf16.mxu1 %vm4456_vm0, %v5995_v38 }
0x2aa3   :  { %4101 = vmatprep.subr.bf16.mxu1 %v5995_v38 }
0x2aa6   :  { %4102 = vmatpush3.bf16.msra.mxu1 %v5272_v40 }
0x2aa7   :  { %4115 = vmatprep.subr.bf16.mxu1 %v5995_v38 }
0x2b61   :  { %v3767_v1 = vpop.f32.mrf.mxu1 }
0x2b63   :  { %v3768_v41 = vpop.f32.mrf.mxu1 }
0x2b64   :  { %v3769_v20 = vadd.f32 %v3768_v41, %v3767_v1 }
0x2b65   :  { %v3770_v23 = vpop.f32.mrf.mxu1 }
0x2b66   :  { %v2111_v39 = vpack.c.bf16 %v3769_v20, %v3769_v20  ;;  %v6002_v23 = vld [vmem:[#allocation7_spill] sm:$0xff] }
0x2b67   :  { %v3771_v29 = vpop.f32.mrf.mxu1 }
0x2b68   :  { %4096 = vmatmul.mubr.msk.bf16.vlgmr.msra.gmra.mxu0 %vm149_vm2, %v2111_v39  ;;  %v6003_v29 = vld [vmem:[#allocation8_spill] sm:$0xff] }
0x2b69   :  { %4108 = vmatpush3.bf16.msra.mxu0 %v5080_v62  ;;  %4111 = vmatprep.mubr.msk.bf16.mxu0 %vm4456_vm0, %v5995_v38 }
0x2b6a   :  { %4109 = vmatprep.subr.bf16.mxu0 %v5995_v38 }
0x2b6d   :  { %4110 = vmatpush3.bf16.msra.mxu0 %v5089_v34 }
0x2b6e   :  { %3785 = vmatprep.subr.bf16.mxu0 %v5095_v22 }
0x2c28   :  { %v2149_v60 = vpop.f32.mrf.mxu0 }
0x2c29   :  { %v2158_v33 = vadd.f32 %v2157_v30, %v2149_v60 }
0x2c2a   :  { %v4097_v53 = vpop.f32.mrf.mxu0 }
0x2c2b   :  { %v2159_v62 = vadd.f32 %v2158_v33, %v5456_v9 }
0x2c2c   :  { %v2152_v17 = vpop.f32.mrf.mxu0 }
0x2c2d   :  { %v3476_v32 = vmul.f32 -1.442695, %v2159_v62 }
0x2c2e   :  { %v4098_v13 = vpop.f32.mrf.mxu0 }
0x2c2f   :  { %4302 = vpow2.f32 %v3476_v32  ;;  %v6004_v13 = vld [vmem:[#allocation6_spill] sm:$0xff] }
0x2c30   :  { %4304 = vtanh.f32 %v2159_v62 }
0x2c3c   :  { %v4303_v31 = vpop.eup %4302 }
0x2c3d   :  { %v2164_v49 = vadd.f32 1.0, %v4303_v31  ;;  %v4305_v34 = vpop.eup %4304 }
0x2c3f   :  { %4306 = vrcp.f32 %v2164_v49 }
0x2c4c   :  { %v4307_v22 = vpop.eup %4306 }
0x2c4d   :  { %v2167_v52 = vsel %vm4826_vm9, %v4305_v34, %v4307_v22 }
0x2c4e   :  { %2170 = vrot.lane.b32.xlu1 %v2167_v52, %s4457_s24  ;;  %v2168_v9 = vmul.f32 %v2167_v52, %v5293_v21  ;;  %v6001_v21 = vld [vmem:[#allocation5_spill] sm:$0xff] }
0x2cc0   :  { %v2171_v58 = vpop.permute.xlu1 %2170 }
0x2cc1   :  { %v2173_v37 = vmul.f32 %v2171_v58, %v2167_v52 }
0x2cc3   :  { %2175 = vrot.lane.b32.xlu1 %v2173_v37, %s4454_s23 }
0x2d35   :  { %v2176_v3 = vpop.permute.xlu1 %2175 }
0x2d36   :  { %v5492_v28 = vadd.f32 %v2176_v3, %v2168_v9 }
0x2d38   :  { %4308 = vtanh.f32 %v5492_v28 }
0x2d45   :  { %v4309_v18 = vpop.eup %4308 }
0x2d46   :  { %2181 = vrot.lane.b32.xlu0 %v4309_v18, %s4457_s24 }
0x2db8   :  { %v2182_v19 = vpop.permute.xlu0 %2181 }
0x2db9   :  { %v2184_v1 = vmul.f32 %v2182_v19, %v2167_v52 }
0x2dbb   :  { %v2185_v41 = vpack.c.bf16 %v2184_v1, %v2184_v1 }
0x2dbd   :  { %2187 = vrot.lane.b32.xlu1 %v2185_v41, %s4454_s23 }
0x2dc1   :  { %2343 = vrot.lane.b32.xlu1 %v2184_v1, %s4454_s23 }
0x2dc5   :  { %2346 = vrot.lane.b32.xlu1 %v2184_v1, %s4457_s24 }
0x2e2f   :  { %v2188_v20 = vpop.permute.xlu1 %2187 }
0x2e30   :  { %4104 = vmatmul.mubr.msk.bf16.vlgmr.msra.gmra.mxu1 %vm149_vm2, %v2188_v20 }
0x2e31   :  { %4116 = vmatpush3.bf16.msra.mxu1 %v5304_v46  ;;  %4119 = vmatprep.mubr.msk.bf16.mxu1 %vm4456_vm0, %v5995_v38 }
0x2e32   :  { %4117 = vmatprep.subr.bf16.mxu1 %v5995_v38 }
0x2e33   :  { %v2344_v9 = vpop.permute.xlu1 %2343 }
0x2e35   :  { %4118 = vmatpush3.bf16.msra.mxu1 %v5313_v47 }
0x2e36   :  { %3807 = vmatprep.subr.bf16.mxu1 %v5319_v36 }
0x2e37   :  { %v2347_v3 = vpop.permute.xlu1 %2346 }
0x2e38   :  { %4120 = vmatmul.mubr.msk.bf16.vlgmr.msra.gmra.mxu1 %vm149_vm2, %v2188_v20  ;;  %v2349_v18 = vsel %vm149_vm2, %v2344_v9, %v2347_v3  ;;  %v5541_v3 = vld [vmem:[%s5975_s10 + $0x38] sm:$0xff]  }
0x2e39   :  { %3808 = vmatpush3.bf16.msra.mxu1 %v5326_v2 }
0x2e3a   :  { %3809 = vmatprep.subr.bf16.mxu1 %v5332_v10 }
0x2e3d   :  { %3810 = vmatpush3.bf16.msra.mxu1 %v5338_v12 }
0x2e3e   :  { %3811 = vmatprep.subr.bf16.mxu1 %v5344_v54 }
0x2e41   :  { %3812 = vmatpush3.bf16.msra.mxu1 %v5350_v59 }
0x2e42   :  { %3813 = vmatprep.subr.bf16.mxu1 %v5356_v61 }
0x2e45   :  { %3814 = vmatpush3.bf16.msra.mxu1 %v5362_v63 }
0x2e46   :  { %3815 = vmatprep.subr.bf16.mxu1 %v5368_v0 }
0x2e49   :  { %3816 = vmatpush3.bf16.msra.mxu1 %v5374_v7 }
0x2e4a   :  { %3817 = vmatprep.subr.bf16.mxu1 %v5380_v8 }
0x2e4d   :  { %3818 = vmatpush3.bf16.msra.mxu1 %v5386_v24 }
0x2e4e   :  { %3819 = vmatprep.subr.bf16.mxu1 %v5392_v25 }
0x2e51   :  { %3820 = vmatpush3.bf16.msra.mxu1 %v5398_v27 }
0x2e52   :  { %3821 = vmatprep.subr.bf16.mxu1 %v6001_v21 }
0x2e55   :  { %3822 = vmatpush3.bf16.msra.mxu1 %v6002_v23 }
0x2e56   :  { %4131 = vmatprep.subr.bf16.mxu1 %v5995_v38 }
0x2ef0   :  { %v2226_v39 = vpop.f32.mrf.mxu1 }
0x2ef1   :  { %v2227_v42 = vadd.f32 %v6003_v29, %v2226_v39 }
0x2ef2   :  { %v4105_v30 = vpop.f32.mrf.mxu1 }
0x2ef3   :  { %vm2233_vm8 = vcmp.ge.s32.totalorder %v2227_v42, 0  ;;  %v2234_v60 = vxor.u32 2147483647, %v2227_v42 }
0x2ef4   :  { %v2229_v33 = vpop.f32.mrf.mxu1 }
0x2ef5   :  { %v2235_v53 = vsel %vm2233_vm8, %v2227_v42, %v2234_v60 }
0x2ef6   :  { %v2236_v62 = vand.u32 4294967264, %v2235_v53  ;;  %v4106_v17 = vpop.f32.mrf.mxu1 }
0x2ef8   :  { %v5524_v32 = vpop.f32.mrf.mxu1  ;;  %v2237_v31 = vor.u32 %v2236_v62, %v6004_v13 }
0x2efa   :  { %v4121_v49 = vpop.f32.mrf.mxu1  ;;  %v2238_v34 = vsel %vm745_vm11, %v2237_v31, 2147483648 }
0x2efb   :  { %v2240_v22 = vshra.s32 %v2238_v34, 16  ;;  %v2239_v19 = vand.u32 65535, %v2238_v34 }
0x2efc   :  { %v2339_v52 = vpop.f32.mrf.mxu1 }
0x2efd   :  { %v2242_v58 = vcvt.s32.f32 %v2240_v22  ;;  %v2241_v41 = vcvt.s32.f32 %v2239_v19  ;;  %v5565_v19 = vld [vmem:[%s5975_s10 + $0x28] sm:$0xff]  }
0x2efe   :  { %v4122_v37 = vpop.f32.mrf.mxu1 }
0x2eff   :  { %2243 = vmax.xlane.f32.xlu0 %v2242_v58 }
0x2f15   :  { %2351 = vrot.lane.b32.xlu0 %v2349_v18, %s4457_s24 }
0x2f88   :  { %v2244_v1 = vpop.xlane.xlu0 %2243 }
0x2f89   :  { %vm2245_vm10 = vcmp.eq.f32.partialorder %v2242_v58, %v2244_v1  ;;  %v2250_v42 = vcvt.f32.s32 %v2244_v1 }
0x2f8a   :  { %v2246_v20 = vsel %vm2245_vm10, %v2241_v41, -inf }
0x2f8b   :  { %2247 = vmax.xlane.f32.xlu1 %v2246_v20  ;;  %v2251_v53 = vshll.u32 %v2250_v42, 16 }
0x2f8c   :  { %v2352_v39 = vpop.permute.xlu0 %2351 }
0x2f8d   :  { %v2354_v30 = vsel %vm258_vm3, %v2349_v18, %v2352_v39  ;;  %v5559_v18 = vld [vmem:[%s5975_s10 + $0x68] sm:$0xff]  }
0x2f8e   :  { %v2356_v60 = vcombine.low %v2354_v30, %v2354_v30 }
0x2f90   :  { %v2358_v31 = vmul.f32 %v5150_v57, %v2356_v60  ;;  %v5547_v57 = vld [vmem:[%s5975_s10 + $0x70] sm:$0xff]  }
0x2f92   :  { %v2360_v34 = vcombine.high %v2358_v31, %v2358_v31  ;;  %v2362_v1 = vpack.c.bf16 %v2358_v31, %v2358_v31 }
0x2f94   :  { %v2363_v9 = vpack.c.bf16 %v2360_v34, %v2360_v34 }
0x3014   :  { %v2248_v33 = vpop.xlane.xlu1 %2247 }
0x3015   :  { %v2249_v62 = vcvt.f32.s32 %v2248_v33 }
0x3017   :  { %v2252_v17 = vadd.s32 %v2251_v53, %v2249_v62 }
0x3019   :  { %v2253_v49 = vand.u32 31, %v2252_v17 }
0x301b   :  { %v2254_v22 = vsub.s32 31, %v2253_v49 }
0x301d   :  { %vm2255_vm13 = vcmp.eq.s32.totalorder %v4541_v4, %v2254_v22  ;;  %v5534_v52 = vsel %vm3380_vm12, %v5430_v48, %v2254_v22  ;;  %v5553_v48 = vld [vmem:[%s5975_s10 + $0x30] sm:$0xff]   ;;  %vm3384_vm12 = vcmask 48128  }
0x301e   :  { %v3478_v58 = vsel %vm2255_vm13, 1.0, %v5995_v38 }
0x301f   :  { %v2258_v37 = vpack.c.bf16 %v3478_v58, %v3478_v58 }
0x3021   :  { %4112 = vmatmul.mubr.msk.bf16.vlgmr.msra.gmra.mxu0 %vm149_vm2, %v2258_v37 }
0x3022   :  { %3786 = vmatpush3.bf16.msra.mxu0 %v5541_v3  ;;  %2396 = vmatprep.mubr.bf16.mxu0 %v2363_v9 }
0x3023   :  { %3787 = vmatprep.subr.bf16.mxu0 %v5547_v57 }
0x3026   :  { %3788 = vmatpush3.bf16.msra.mxu0 %v5553_v48 }
0x3027   :  { %3789 = vmatprep.subr.bf16.mxu0 %v5559_v18 }
0x302a   :  { %3790 = vmatpush3.bf16.msra.mxu0 %v5565_v19 }
0x302b   :  { %3791 = vmatprep.subr.bf16.mxu0 %v5168_v44 }
0x302e   :  { %3792 = vmatpush3.bf16.msra.mxu0 %v5174_v6 }
0x302f   :  { %3793 = vmatprep.subr.bf16.mxu0 %v5180_v26 }
0x3032   :  { %3794 = vmatpush3.bf16.msra.mxu0 %v5186_v14 }
0x3033   :  { %3795 = vmatprep.subr.bf16.mxu0 %v5192_v5 }
0x3036   :  { %3796 = vmatpush3.bf16.msra.mxu0 %v5198_v51 }
0x3037   :  { %3797 = vmatprep.subr.bf16.mxu0 %v5204_v50 }
0x303a   :  { %3798 = vmatpush3.bf16.msra.mxu0 %v5210_v35 }
0x303b   :  { %3799 = vmatprep.subr.bf16.mxu0 %v5216_v15 }
0x303e   :  { %3800 = vmatpush3.bf16.msra.mxu0 %v5222_v16 }
0x303f   :  { %4123 = vmatprep.subr.bf16.mxu0 %v5995_v38 }
0x3041   :  { %2397 = vmatmul.mubr.bf16.vlgmr.msra.gmra.mxu0 %v2362_v1 }
0x3042   :  { %4124 = vmatpush3.bf16.msra.mxu0 %v5229_v55  ;;  %4127 = vmatprep.mubr.msk.bf16.mxu0 %vm4456_vm0, %v5995_v38 }
0x3043   :  { %4125 = vmatprep.subr.bf16.mxu0 %v5995_v38 }
0x3046   :  { %4126 = vmatpush3.bf16.msra.mxu0 %v5238_v56 }
0x3047   :  { %4139 = vmatprep.subr.bf16.mxu0 %v5995_v38 }
0x30e1   :  { %v5585_v44 = vpop.f32.mrf.mxu0 }
0x30e3   :  { %v4113_v6 = vpop.f32.mrf.mxu0 }
0x30e5   :  { %v2299_v26 = vpop.f32.mrf.mxu0 }
0x30e7   :  { %v4114_v14 = vpop.f32.mrf.mxu0 }
0x3101   :  { %v3801_v5 = vpop.f32.mrf.mxu0 }
0x3103   :  { %v3802_v51 = vpop.f32.mrf.mxu0 }
0x3104   :  { %v3803_v50 = vadd.f32 %v3802_v51, %v3801_v5 }
0x3105   :  { %v3804_v35 = vpop.f32.mrf.mxu0 }
0x3106   :  { %v2404_v15 = vsel %vm405_vm4, %v3803_v50, -inf  ;;  %v5623_v35 = vld [vmem:[%s5975_s10 + $0x78] sm:$0xff]  }
0x3107   :  { %v3805_v16 = vpop.f32.mrf.mxu0  ;;  %2405 = vmax.xlane.f32.xlu1 %v2404_v15  ;;  %v3482_v15 = vld [vmem:[%s5969_s4 + $0x14] sm:$0xf] }
0x3108   :  { %v2530_v16 = vadd.f32 %v3482_v15, %v5524_v32 }
0x3190   :  { %v2406_v55 = vpop.xlane.xlu1 %2405 }
0x3191   :  { %v2407_v41 = vsub.f32 %v3803_v50, %v2406_v55 }
0x3193   :  { %v2408_v20 = vmul.f32 1.442695, %v2407_v41 }
0x3195   :  { %4310 = vpow2.f32 %v2408_v20 }
0x31a2   :  { %v4311_v56 = vpop.eup %4310 }
0x31a3   :  { %v2410_v39 = vsel %vm405_vm4, %v4311_v56, 0.0 }
0x31a4   :  { %2411 = vadd.xlane.f32.xlu1 %v2410_v39 }
0x322d   :  { %v2412_v42 = vpop.xlane.xlu1 %2411 }
0x322e   :  { %4312 = vrcp.f32 %v2412_v42 }
0x323b   :  { %v4313_v30 = vpop.eup %4312 }
0x323c   :  { %v2414_v60 = vmul.f32 %v4313_v30, %v4311_v56 }
0x323e   :  { %2416 = vrot.lane.b32.xlu0 %v2414_v60, %s4458_s26 }
0x32b0   :  { %v2417_v33 = vpop.permute.xlu0 %2416 }
0x32b1   :  { %v2419_v53 = vsel %vm421_vm5, %v2414_v60, %v2417_v33 }
0x32b2   :  { %2421 = vrot.lane.b32.xlu1 %v2419_v53, %s4459_s27 }
0x3324   :  { %v2422_v62 = vpop.permute.xlu1 %2421 }
0x3325   :  { %v2424_v17 = vsel %vm427_vm6, %v2419_v53, %v2422_v62 }
0x3326   :  { %2426 = vrot.lane.b32.xlu0 %v2424_v17, %s4454_s23 }
0x3398   :  { %v2427_v31 = vpop.permute.xlu0 %2426 }
0x3399   :  { %v2429_v49 = vsel %vm149_vm2, %v2424_v17, %v2427_v31 }
0x339a   :  { %2431 = vrot.lane.b32.xlu0 %v2429_v49, %s4457_s24 }
0x340c   :  { %v2432_v22 = vpop.permute.xlu0 %2431 }
0x340d   :  { %v2434_v34 = vsel %vm258_vm3, %v2429_v49, %v2432_v22 }
0x340e   :  { %v2436_v58 = vcombine.low %v2434_v34, %v2434_v34 }
0x3410   :  { %v2438_v37 = vmul.f32 %v5257_v43, %v2436_v58 }
0x3412   :  { %v2440_v9 = vcombine.high %v2438_v37, %v2438_v37  ;;  %v2442_v6 = vpack.c.bf16 %v2438_v37, %v2438_v37 }
0x3414   :  { %v2443_v1 = vpack.c.bf16 %v2440_v9, %v2440_v9 }
0x3416   :  { %2476 = vmatprep.mubr.bf16.mxu1 %v2443_v1 }
0x3417   :  { %2477 = vmatmul.mubr.bf16.vlgmr.msra.gmra.mxu1 %v2442_v6 }
0x3418   :  { %4132 = vmatpush3.bf16.msra.mxu1 %v5263_v11  ;;  %4135 = vmatprep.mubr.msk.bf16.mxu1 %vm4456_vm0, %v5995_v38  ;;  %v5608_v11 = vld [vmem:[%s5972_s7 + $0x8] sm:$0xff]  }
0x3419   :  { %4133 = vmatprep.subr.bf16.mxu1 %v5995_v38 }
0x341c   :  { %4134 = vmatpush3.bf16.msra.mxu1 %v5272_v40  ;;  %v5617_v40 = vld [vmem:[%s5972_s7] sm:$0xff]  }
0x341d   :  { %4147 = vmatprep.subr.bf16.mxu1 %v5995_v38 }
0x34d7   :  { %v3823_v26 = vpop.f32.mrf.mxu1 }
0x34d9   :  { %v3824_v14 = vpop.f32.mrf.mxu1 }
0x34da   :  { %v3825_v5 = vadd.f32 %v3824_v14, %v3823_v26 }
0x34db   :  { %v3826_v43 = vpop.f32.mrf.mxu1 }
0x34dc   :  { %v2484_v51 = vpack.c.bf16 %v3825_v5, %v3825_v5 }
0x34dd   :  { %v3827_v50 = vpop.f32.mrf.mxu1 }
0x34de   :  { %4128 = vmatmul.mubr.msk.bf16.vlgmr.msra.gmra.mxu0 %vm149_vm2, %v2484_v51 }
0x34df   :  { %4140 = vmatpush3.bf16.msra.mxu0 %v5608_v11  ;;  %4143 = vmatprep.mubr.msk.bf16.mxu0 %vm4456_vm0, %v5995_v38 }
0x34e0   :  { %4141 = vmatprep.subr.bf16.mxu0 %v5995_v38 }
0x34e3   :  { %4142 = vmatpush3.bf16.msra.mxu0 %v5617_v40 }
0x34e4   :  { %3841 = vmatprep.subr.bf16.mxu0 %v5623_v35 }
0x359e   :  { %v2522_v55 = vpop.f32.mrf.mxu0 }
0x359f   :  { %v2531_v41 = vadd.f32 %v2530_v16, %v2522_v55 }
0x35a0   :  { %v4129_v20 = vpop.f32.mrf.mxu0 }
0x35a1   :  { %v2532_v56 = vadd.f32 %v2531_v41, %v5585_v44  ;;  %v5678_v20 = vld [vmem:[%s5967_s2] sm:$0xff] }
0x35a2   :  { %v2525_v39 = vpop.f32.mrf.mxu0 }
0x35a3   :  { %v3483_v42 = vmul.f32 -1.442695, %v2532_v56 }
0x35a4   :  { %v4130_v30 = vpop.f32.mrf.mxu0 }
0x35a5   :  { %4314 = vpow2.f32 %v3483_v42 }
0x35a6   :  { %4316 = vtanh.f32 %v2532_v56 }
0x35b2   :  { %v4315_v60 = vpop.eup %4314 }
0x35b3   :  { %v2537_v33 = vadd.f32 1.0, %v4315_v60  ;;  %v4317_v53 = vpop.eup %4316 }
0x35b5   :  { %4318 = vrcp.f32 %v2537_v33 }
0x35c2   :  { %v4319_v62 = vpop.eup %4318 }
0x35c3   :  { %v2540_v17 = vsel %vm4826_vm9, %v4317_v53, %v4319_v62 }
0x35c4   :  { %2543 = vrot.lane.b32.xlu0 %v2540_v17, %s4457_s24  ;;  %v2541_v44 = vmul.f32 %v2540_v17, %v5492_v28 }
0x3636   :  { %v2544_v32 = vpop.permute.xlu0 %2543 }
0x3637   :  { %v2546_v31 = vmul.f32 %v2544_v32, %v2540_v17  ;;  %v5707_v32 = vld [vmem:[%s5975_s10 + $0x58] sm:$0xff]  }
0x3639   :  { %2548 = vrot.lane.b32.xlu0 %v2546_v31, %s4454_s23  ;;  %v5713_v31 = vld [vmem:[%s5975_s10 + $0x18] sm:$0xff]  }
0x36ab   :  { %v2549_v49 = vpop.permute.xlu0 %2548 }
0x36ac   :  { %v5636_v22 = vadd.f32 %v2549_v49, %v2541_v44  ;;  %v5719_v44 = vld [vmem:[%s5975_s10 + $0x50] sm:$0xff]  }
0x36ad   :  { %v5725_v49 = vld [vmem:[%s5975_s10 + $0x10] sm:$0xff]  }
0x36ae   :  { %4320 = vtanh.f32 %v5636_v22 }
0x36bb   :  { %v4321_v34 = vpop.eup %4320 }
0x36bc   :  { %2554 = vrot.lane.b32.xlu1 %v4321_v34, %s4457_s24  ;;  %v5731_v34 = vld [vmem:[%s5975_s10 + $0x48] sm:$0xff]  }
0x372e   :  { %v2555_v58 = vpop.permute.xlu1 %2554 }
0x372f   :  { %v2557_v37 = vmul.f32 %v2555_v58, %v2540_v17  ;;  %v5701_v17 = vld [vmem:[%s5975_s10 + $0x20] sm:$0xff]   ;;  %v5737_v58 = vld [vmem:[%s5975_s10 + $0x8] sm:$0xff]  }
0x3731   :  { %v2558_v9 = vpack.c.bf16 %v2557_v37, %v2557_v37 }
0x3733   :  { %2560 = vrot.lane.b32.xlu0 %v2558_v9, %s4454_s23  ;;  %v5749_v9 = vld [vmem:[%s5975_s10] sm:$0xff]  }
0x3737   :  { %2716 = vrot.lane.b32.xlu0 %v2557_v37, %s4454_s23 }
0x373b   :  { %2719 = vrot.lane.b32.xlu0 %v2557_v37, %s4457_s24  ;;  %v5743_v37 = vld [vmem:[%s5975_s10 + $0x40] sm:$0xff]  }
0x37a5   :  { %v2561_v1 = vpop.permute.xlu0 %2560 }
0x37a6   :  { %4136 = vmatmul.mubr.msk.bf16.vlgmr.msra.gmra.mxu1 %vm149_vm2, %v2561_v1 }
0x37a7   :  { %4148 = vmatpush3.bf16.msra.mxu1 %v5304_v46  ;;  %4151 = vmatprep.mubr.msk.bf16.mxu1 %vm4456_vm0, %v5995_v38 }
0x37a8   :  { %4149 = vmatprep.subr.bf16.mxu1 %v5995_v38 }
0x37a9   :  { %v2717_v28 = vpop.permute.xlu0 %2716 }
0x37ab   :  { %4150 = vmatpush3.bf16.msra.mxu1 %v5313_v47 }
0x37ac   :  { %3863 = vmatprep.subr.bf16.mxu1 %v5319_v36 }
0x37ae   :  { %4152 = vmatmul.mubr.msk.bf16.vlgmr.msra.gmra.mxu1 %vm149_vm2, %v2561_v1 }
0x37af   :  { %3864 = vmatpush3.bf16.msra.mxu1 %v5326_v2 }
0x37b0   :  { %3865 = vmatprep.subr.bf16.mxu1 %v5332_v10 }
0x37b3   :  { %3866 = vmatpush3.bf16.msra.mxu1 %v5338_v12 }
0x37b4   :  { %3867 = vmatprep.subr.bf16.mxu1 %v5344_v54 }
0x37b7   :  { %3868 = vmatpush3.bf16.msra.mxu1 %v5350_v59 }
0x37b8   :  { %3869 = vmatprep.subr.bf16.mxu1 %v5356_v61 }
0x37bb   :  { %3870 = vmatpush3.bf16.msra.mxu1 %v5362_v63 }
0x37bc   :  { %3871 = vmatprep.subr.bf16.mxu1 %v5368_v0 }
0x37bf   :  { %3872 = vmatpush3.bf16.msra.mxu1 %v5374_v7 }
0x37c0   :  { %3873 = vmatprep.subr.bf16.mxu1 %v5380_v8 }
0x37c3   :  { %3874 = vmatpush3.bf16.msra.mxu1 %v5386_v24 }
0x37c4   :  { %3875 = vmatprep.subr.bf16.mxu1 %v5392_v25 }
0x37c7   :  { %3876 = vmatpush3.bf16.msra.mxu1 %v5398_v27 }
0x37c8   :  { %3877 = vmatprep.subr.bf16.mxu1 %v6001_v21  ;;  %v2720_v21 = vpop.permute.xlu0 %2719 }
0x37cb   :  { %3878 = vmatpush3.bf16.msra.mxu1 %v6002_v23  ;;  %v2722_v23 = vsel %vm149_vm2, %v2717_v28, %v2720_v21 }
0x37cc   :  { %4163 = vmatprep.subr.bf16.mxu1 %v5995_v38 }
0x3866   :  { %v2599_v46 = vpop.f32.mrf.mxu1 }
0x3867   :  { %v2600_v47 = vadd.f32 %v6003_v29, %v2599_v46  ;;  %v5756_v46 = vld [vmem:[%s5971_s6 + $0x8] sm:$0xff]  }
0x3868   :  { %v4137_v36 = vpop.f32.mrf.mxu1 }
0x3869   :  { %vm2606_vm14 = vcmp.ge.s32.totalorder %v2600_v47, 0  ;;  %v2607_v2 = vxor.u32 2147483647, %v2600_v47 }
0x386a   :  { %v2602_v10 = vpop.f32.mrf.mxu1 }
0x386b   :  { %v2608_v12 = vsel %vm2606_vm14, %v2600_v47, %v2607_v2  ;;  %v5765_v47 = vld [vmem:[%s5971_s6] sm:$0xff]  }
0x386c   :  { %v2609_v54 = vand.u32 4294967264, %v2608_v12  ;;  %v4138_v59 = vpop.f32.mrf.mxu1 }
0x386e   :  { %v5668_v61 = vpop.f32.mrf.mxu1  ;;  %v2610_v63 = vor.u32 %v2609_v54, %v6004_v13 }
0x3870   :  { %v4153_v0 = vpop.f32.mrf.mxu1  ;;  %v2611_v7 = vsel %vm745_vm11, %v2610_v63, 2147483648 }
0x3871   :  { %v2613_v8 = vshra.s32 %v2611_v7, 16  ;;  %v2612_v29 = vand.u32 65535, %v2611_v7 }
0x3872   :  { %v2712_v24 = vpop.f32.mrf.mxu1 }
0x3873   :  { %v2615_v25 = vcvt.s32.f32 %v2613_v8  ;;  %v2614_v26 = vcvt.s32.f32 %v2612_v29 }
0x3874   :  { %v4154_v27 = vpop.f32.mrf.mxu1 }
0x3875   :  { %2616 = vmax.xlane.f32.xlu1 %v2615_v25 }
0x3886   :  { %2724 = vrot.lane.b32.xlu1 %v2722_v23, %s4457_s24 }
0x38fe   :  { %v2617_v6 = vpop.xlane.xlu1 %2616 }
0x38ff   :  { %vm2618_vm15 = vcmp.eq.f32.partialorder %v2615_v25, %v2617_v6  ;;  %v2623_v43 = vcvt.f32.s32 %v2617_v6 }
0x3900   :  { %v2619_v14 = vsel %vm2618_vm15, %v2614_v26, -inf }
0x3901   :  { %2620 = vmax.xlane.f32.xlu0 %v2619_v14  ;;  %v2624_v16 = vshll.u32 %v2623_v43, 16 }
0x3902   :  { %v2725_v5 = vpop.permute.xlu1 %2724 }
0x3903   :  { %v2727_v51 = vsel %vm258_vm3, %v2722_v23, %v2725_v5 }
0x3904   :  { %v2729_v50 = vcombine.low %v2727_v51, %v2727_v51 }
0x3906   :  { %v2731_v56 = vmul.f32 %v5678_v20, %v2729_v50 }
0x3908   :  { %v2733_v30 = vcombine.high %v2731_v56, %v2731_v56  ;;  %v2735_v1 = vpack.c.bf16 %v2731_v56, %v2731_v56 }
0x390a   :  { %v2736_v62 = vpack.c.bf16 %v2733_v30, %v2733_v30 }
0x398a   :  { %v2621_v15 = vpop.xlane.xlu0 %2620 }
0x398b   :  { %v2622_v55 = vcvt.f32.s32 %v2621_v15 }
0x398d   :  { %v2625_v41 = vadd.s32 %v2624_v16, %v2622_v55 }
0x398f   :  { %v2626_v39 = vand.u32 31, %v2625_v41  ;;  %v5784_v41 = vld [vmem:[%s5968_s3] sm:$0xff] }
0x3991   :  { %v2627_v42 = vsub.s32 31, %v2626_v39 }
0x3993   :  { %vm2628_vm7 = vcmp.eq.s32.totalorder %v4541_v4, %v2627_v42  ;;  %v5683_v60 = vsel %vm3382_vm1, %v5534_v52, %v2627_v42  ;;  %v5695_v52 = vld [vmem:[%s5975_s10 + $0x60] sm:$0xff]  }
0x3994   :  { %v3485_v33 = vsel %vm2628_vm7, 1.0, %v5995_v38 }
0x3995   :  { %v2631_v53 = vpack.c.bf16 %v3485_v33, %v3485_v33  ;;  %v5790_v33 = vld [vmem:[%s5973_s8 + $0x8] sm:$0xff]  }
0x3997   :  { %4144 = vmatmul.mubr.msk.bf16.vlgmr.msra.gmra.mxu0 %vm149_vm2, %v2631_v53  ;;  %v5799_v53 = vld [vmem:[%s5973_s8] sm:$0xff]  }
0x3998   :  { %3842 = vmatpush3.bf16.msra.mxu0 %v5541_v3  ;;  %2769 = vmatprep.mubr.bf16.mxu0 %v2736_v62 }
0x3999   :  { %3843 = vmatprep.subr.bf16.mxu0 %v5547_v57 }
0x399c   :  { %3844 = vmatpush3.bf16.msra.mxu0 %v5553_v48 }
0x399d   :  { %3845 = vmatprep.subr.bf16.mxu0 %v5559_v18 }
0x39a0   :  { %3846 = vmatpush3.bf16.msra.mxu0 %v5565_v19 }
0x39a1   :  { %3847 = vmatprep.subr.bf16.mxu0 %v5695_v52 }
0x39a4   :  { %3848 = vmatpush3.bf16.msra.mxu0 %v5701_v17 }
0x39a5   :  { %3849 = vmatprep.subr.bf16.mxu0 %v5707_v32 }
0x39a8   :  { %3850 = vmatpush3.bf16.msra.mxu0 %v5713_v31 }
0x39a9   :  { %3851 = vmatprep.subr.bf16.mxu0 %v5719_v44 }
0x39ac   :  { %3852 = vmatpush3.bf16.msra.mxu0 %v5725_v49 }
0x39ad   :  { %3853 = vmatprep.subr.bf16.mxu0 %v5731_v34 }
0x39b0   :  { %3854 = vmatpush3.bf16.msra.mxu0 %v5737_v58 }
0x39b1   :  { %3855 = vmatprep.subr.bf16.mxu0 %v5743_v37 }
0x39b4   :  { %3856 = vmatpush3.bf16.msra.mxu0 %v5749_v9 }
0x39b5   :  { %4155 = vmatprep.subr.bf16.mxu0 %v5995_v38 }
0x39b7   :  { %2770 = vmatmul.mubr.bf16.vlgmr.msra.gmra.mxu0 %v2735_v1 }
0x39b8   :  { %4156 = vmatpush3.bf16.msra.mxu0 %v5756_v46  ;;  %4159 = vmatprep.mubr.msk.bf16.mxu0 %vm4456_vm0, %v5995_v38 }
0x39b9   :  { %4157 = vmatprep.subr.bf16.mxu0 %v5995_v38 }
0x39bc   :  { %4158 = vmatpush3.bf16.msra.mxu0 %v5765_v47 }
0x39bd   :  { %4171 = vmatprep.subr.bf16.mxu0 %v5995_v38 }
0x3a57   :  { %v5769_v36 = vpop.f32.mrf.mxu0 }
0x3a59   :  { %v4145_v2 = vpop.f32.mrf.mxu0 }
0x3a5b   :  { %v2672_v10 = vpop.f32.mrf.mxu0 }
0x3a5d   :  { %v4146_v12 = vpop.f32.mrf.mxu0 }
0x3a77   :  { %v3857_v54 = vpop.f32.mrf.mxu0 }
0x3a79   :  { %v3858_v59 = vpop.f32.mrf.mxu0 }
0x3a7a   :  { %v3859_v63 = vadd.f32 %v3858_v59, %v3857_v54  ;;  %v3489_v59 = vld [vmem:[%s5969_s4 + $0x18] sm:$0xf] }
0x3a7b   :  { %v3860_v0 = vpop.f32.mrf.mxu0 }
0x3a7c   :  { %v2777_v7 = vsel %vm405_vm4, %v3859_v63, -inf }
0x3a7d   :  { %v3861_v8 = vpop.f32.mrf.mxu0  ;;  %2778 = vmax.xlane.f32.xlu0 %v2777_v7 }
0x3b06   :  { %v2779_v24 = vpop.xlane.xlu0 %2778 }
0x3b07   :  { %v2780_v25 = vsub.f32 %v3859_v63, %v2779_v24  ;;  %v2903_v63 = vadd.f32 %v3489_v59, %v5668_v61  ;;  %v4427_v59 = vld [vmem:[%s5976_s11 + $0x48] sm:$0xff]  }
0x3b09   :  { %v2781_v27 = vmul.f32 1.442695, %v2780_v25 }
0x3b0b   :  { %4322 = vpow2.f32 %v2781_v27 }
0x3b18   :  { %v4323_v28 = vpop.eup %4322 }
0x3b19   :  { %v2783_v21 = vsel %vm405_vm4, %v4323_v28, 0.0 }
0x3b1a   :  { %2784 = vadd.xlane.f32.xlu0 %v2783_v21 }
0x3ba3   :  { %v2785_v23 = vpop.xlane.xlu0 %2784 }
0x3ba4   :  { %4324 = vrcp.f32 %v2785_v23 }
0x3bb1   :  { %v4325_v29 = vpop.eup %4324 }
0x3bb2   :  { %v2787_v6 = vmul.f32 %v4325_v29, %v4323_v28 }
0x3bb4   :  { %2789 = vrot.lane.b32.xlu0 %v2787_v6, %s4458_s26 }
0x3c26   :  { %v2790_v26 = vpop.permute.xlu0 %2789 }
0x3c27   :  { %v2792_v14 = vsel %vm421_vm5, %v2787_v6, %v2790_v26 }
0x3c28   :  { %2794 = vrot.lane.b32.xlu1 %v2792_v14, %s4459_s27 }
0x3c9a   :  { %v2795_v5 = vpop.permute.xlu1 %2794 }
0x3c9b   :  { %v2797_v43 = vsel %vm427_vm6, %v2792_v14, %v2795_v5 }
0x3c9c   :  { %2799 = vrot.lane.b32.xlu1 %v2797_v43, %s4454_s23 }
0x3d0e   :  { %v2800_v51 = vpop.permute.xlu1 %2799 }
0x3d0f   :  { %v2802_v50 = vsel %vm149_vm2, %v2797_v43, %v2800_v51 }
0x3d10   :  { %2804 = vrot.lane.b32.xlu1 %v2802_v50, %s4457_s24 }
0x3d82   :  { %v2805_v15 = vpop.permute.xlu1 %2804 }
0x3d83   :  { %v2807_v16 = vsel %vm258_vm3, %v2802_v50, %v2805_v15  ;;  %v4414_v15 = vld [vmem:[%s5970_s5] sm:$0xff]  }
0x3d84   :  { %v2809_v55 = vcombine.low %v2807_v16, %v2807_v16  ;;  %v4415_v16 = vld [vmem:[%s5976_s11 + $0x78] sm:$0xff]  }
0x3d86   :  { %v2811_v56 = vmul.f32 %v5784_v41, %v2809_v55  ;;  %v4416_v55 = vld [vmem:[%s5976_s11 + $0x38] sm:$0xff]  }
0x3d88   :  { %v2813_v39 = vcombine.high %v2811_v56, %v2811_v56  ;;  %v2815_v30 = vpack.c.bf16 %v2811_v56, %v2811_v56  ;;  %v4417_v56 = vld [vmem:[%s5976_s11 + $0x70] sm:$0xff]  }
0x3d8a   :  { %v2816_v42 = vpack.c.bf16 %v2813_v39, %v2813_v39  ;;  %v4418_v39 = vld [vmem:[%s5976_s11 + $0x30] sm:$0xff]  }
0x3d8c   :  { %2849 = vmatprep.mubr.bf16.mxu1 %v2816_v42  ;;  %v4419_v42 = vld [vmem:[%s5976_s11 + $0x68] sm:$0xff]  }
0x3d8d   :  { %2850 = vmatmul.mubr.bf16.vlgmr.msra.gmra.mxu1 %v2815_v30  ;;  %v4420_v30 = vld [vmem:[%s5976_s11 + $0x28] sm:$0xff]  }
0x3d8e   :  { %4164 = vmatpush3.bf16.msra.mxu1 %v5790_v33  ;;  %4167 = vmatprep.mubr.msk.bf16.mxu1 %vm4456_vm0, %v5995_v38 }
0x3d8f   :  { %4165 = vmatprep.subr.bf16.mxu1 %v5995_v38 }
0x3d92   :  { %4166 = vmatpush3.bf16.msra.mxu1 %v5799_v53 }
0x3d93   :  { %4179 = vmatprep.subr.bf16.mxu1 %v5995_v38 }
0x3e4d   :  { %v3879_v62 = vpop.f32.mrf.mxu1 }
0x3e4f   :  { %v3880_v1 = vpop.f32.mrf.mxu1 }
0x3e50   :  { %v3881_v2 = vadd.f32 %v3880_v1, %v3879_v62  ;;  %v4421_v62 = vld [vmem:[%s5976_s11 + $0x60] sm:$0xff]  }
0x3e51   :  { %v3882_v10 = vpop.f32.mrf.mxu1  ;;  %v4422_v1 = vld [vmem:[%s5976_s11 + $0x20] sm:$0xff]  }
0x3e52   :  { %v2857_v12 = vpack.c.bf16 %v3881_v2, %v3881_v2  ;;  %v4423_v2 = vld [vmem:[%s5976_s11 + $0x58] sm:$0xff]  }
0x3e53   :  { %v3883_v54 = vpop.f32.mrf.mxu1  ;;  %v4424_v10 = vld [vmem:[%s5976_s11 + $0x18] sm:$0xff]  }
0x3e54   :  { %4160 = vmatmul.mubr.msk.bf16.vlgmr.msra.gmra.mxu0 %vm149_vm2, %v2857_v12  ;;  %v4425_v12 = vld [vmem:[%s5976_s11 + $0x50] sm:$0xff]  }
0x3e55   :  { %4172 = vmatpush3.bf16.msra.mxu0 %v5608_v11  ;;  %4175 = vmatprep.mubr.msk.bf16.mxu0 %vm4456_vm0, %v5995_v38  ;;  %v4426_v54 = vld [vmem:[%s5976_s11 + $0x10] sm:$0xff]  }
0x3e56   :  { %4173 = vmatprep.subr.bf16.mxu0 %v5995_v38 }
0x3e59   :  { %4174 = vmatpush3.bf16.msra.mxu0 %v5617_v40 }
0x3e5a   :  { %3897 = vmatprep.subr.bf16.mxu0 %v5623_v35 }
0x3f14   :  { %v2895_v0 = vpop.f32.mrf.mxu0 }
0x3f15   :  { %v2904_v7 = vadd.f32 %v2903_v63, %v2895_v0  ;;  %v4428_v63 = vld [vmem:[%s5976_s11 + $0x8] sm:$0xff]   ;;  %v4429_v0 = vld [vmem:[%s5976_s11 + $0x40] sm:$0xff]  }
0x3f16   :  { %v4161_v8 = vpop.f32.mrf.mxu0 }
0x3f17   :  { %v2905_v11 = vadd.f32 %v2904_v7, %v5769_v36  ;;  %v4430_v7 = vld [vmem:[%s5976_s11] sm:$0xff]  }
0x3f18   :  { %v2898_v24 = vpop.f32.mrf.mxu0 }
0x3f19   :  { %v3490_v25 = vmul.f32 -1.442695, %v2905_v11 }
0x3f1a   :  { %v4162_v27 = vpop.f32.mrf.mxu0 }
0x3f1b   :  { %4326 = vpow2.f32 %v3490_v25 }
0x3f1c   :  { %4328 = vtanh.f32 %v2905_v11  ;;  %v5890_v11 = vld [vmem:[%s5974_s9] ss:$0 sm:$0xff] }
0x3f28   :  { %v4327_v28 = vpop.eup %4326 }
0x3f29   :  { %v2910_v21 = vadd.f32 1.0, %v4327_v28  ;;  %v4329_v40 = vpop.eup %4328 }
0x3f2b   :  { %4330 = vrcp.f32 %v2910_v21 }
0x3f38   :  { %v4331_v35 = vpop.eup %4330 }
0x3f39   :  { %v2913_v23 = vsel %vm4826_vm9, %v4329_v40, %v4331_v35 }
0x3f3a   :  { %2916 = vrot.lane.b32.xlu1 %v2913_v23, %s4457_s24  ;;  %v2914_v36 = vmul.f32 %v2913_v23, %v5636_v22  ;;  %v4413_v22 = vld [vmem:[%s5970_s5 + $0x8] sm:$0xff]  }
0x3fac   :  { %v2917_v61 = vpop.permute.xlu1 %2916 }
0x3fad   :  { %v2919_v29 = vmul.f32 %v2917_v61, %v2913_v23 }
0x3faf   :  { %2921 = vrot.lane.b32.xlu1 %v2919_v29, %s4454_s23 }
0x4021   :  { %v2922_v6 = vpop.permute.xlu1 %2921 }
0x4022   :  { %v5820_v26 = vadd.f32 %v2922_v6, %v2914_v36 }
0x4024   :  { %4332 = vtanh.f32 %v5820_v26 }
0x4031   :  { %v4333_v14 = vpop.eup %4332 }
0x4032   :  { %2927 = vrot.lane.b32.xlu0 %v4333_v14, %s4457_s24 }
0x40a4   :  { %v2928_v5 = vpop.permute.xlu0 %2927 }
0x40a5   :  { %v2930_v43 = vmul.f32 %v2928_v5, %v2913_v23 }
0x40a7   :  { %v2931_v51 = vpack.c.bf16 %v2930_v43, %v2930_v43 }
0x40a9   :  { %2933 = vrot.lane.b32.xlu1 %v2931_v51, %s4454_s23 }
0x40ad   :  { %3089 = vrot.lane.b32.xlu1 %v2930_v43, %s4454_s23 }
0x40b1   :  { %3092 = vrot.lane.b32.xlu1 %v2930_v43, %s4457_s24 }
0x411b   :  { %v2934_v50 = vpop.permute.xlu1 %2933 }
0x411c   :  { %4168 = vmatmul.mubr.msk.bf16.vlgmr.msra.gmra.mxu1 %vm149_vm2, %v2934_v50 }
0x411d   :  { %4180 = vmatpush3.bf16.msra.mxu1 %v4413_v22  ;;  %4183 = vmatprep.mubr.msk.bf16.mxu1 %vm4456_vm0, %v5995_v38 }
0x411e   :  { %4181 = vmatprep.subr.bf16.mxu1 %v5995_v38 }
0x411f   :  { %v3090_v51 = vpop.permute.xlu1 %3089 }
0x4121   :  { %4182 = vmatpush3.bf16.msra.mxu1 %v4414_v15 }
0x4122   :  { %3919 = vmatprep.subr.bf16.mxu1 %v4415_v16 }
0x4124   :  { %4184 = vmatmul.mubr.msk.bf16.vlgmr.msra.gmra.mxu1 %vm149_vm2, %v2934_v50  ;;  %v3093_v50 = vpop.permute.xlu1 %3092 }
0x4125   :  { %3920 = vmatpush3.bf16.msra.mxu1 %v4416_v55  ;;  %v3095_v22 = vsel %vm149_vm2, %v3090_v51, %v3093_v50 }
0x4126   :  { %3921 = vmatprep.subr.bf16.mxu1 %v4417_v56 }
0x4129   :  { %3922 = vmatpush3.bf16.msra.mxu1 %v4418_v39 }
0x412a   :  { %3923 = vmatprep.subr.bf16.mxu1 %v4419_v42 }
0x412d   :  { %3924 = vmatpush3.bf16.msra.mxu1 %v4420_v30 }
0x412e   :  { %3925 = vmatprep.subr.bf16.mxu1 %v4421_v62 }
0x4131   :  { %3926 = vmatpush3.bf16.msra.mxu1 %v4422_v1 }
0x4132   :  { %3927 = vmatprep.subr.bf16.mxu1 %v4423_v2 }
0x4135   :  { %3928 = vmatpush3.bf16.msra.mxu1 %v4424_v10 }
0x4136   :  { %3929 = vmatprep.subr.bf16.mxu1 %v4425_v12 }
0x4139   :  { %3930 = vmatpush3.bf16.msra.mxu1 %v4426_v54 }
0x413a   :  { %3931 = vmatprep.subr.bf16.mxu1 %v4427_v59 }
0x413d   :  { %3932 = vmatpush3.bf16.msra.mxu1 %v4428_v63 }
0x413e   :  { %3933 = vmatprep.subr.bf16.mxu1 %v4429_v0 }
0x4141   :  { %3934 = vmatpush3.bf16.msra.mxu1 %v4430_v7 }
0x4142   :  { %4195 = vmatprep.subr.bf16.mxu1 %v5995_v38 }
0x41dc   :  { %v2972_v8 = vpop.f32.mrf.mxu1 }
0x41dd   :  { %v2973_v24 = vadd.f32 %v5890_v11, %v2972_v8 }
0x41de   :  { %v4169_v25 = vpop.f32.mrf.mxu1 }
0x41df   :  { %vm2979_vm8 = vcmp.ge.s32.totalorder %v2973_v24, 0  ;;  %v2980_v27 = vxor.u32 2147483647, %v2973_v24 }
0x41e0   :  { %v2975_v28 = vpop.f32.mrf.mxu1 }
0x41e1   :  { %v2981_v21 = vsel %vm2979_vm8, %v2973_v24, %v2980_v27 }
0x41e2   :  { %v2982_v40 = vand.u32 4294967264, %v2981_v21  ;;  %v4170_v35 = vpop.f32.mrf.mxu1 }
0x41e4   :  { %v2983_v23 = vor.u32 %v2982_v40, %v6004_v13  ;;  %v5894_v61 = vpop.f32.mrf.mxu1 }
0x41e6   :  { %v4185_v29 = vpop.f32.mrf.mxu1  ;;  %v2984_v36 = vsel %vm745_vm11, %v2983_v23, 2147483648 }
0x41e7   :  { %v2986_v6 = vshra.s32 %v2984_v36, 16  ;;  %v2985_v15 = vand.u32 65535, %v2984_v36 }
0x41e8   :  { %v3085_v14 = vpop.f32.mrf.mxu1 }
0x41e9   :  { %v2988_v5 = vcvt.s32.f32 %v2986_v6  ;;  %v2987_v55 = vcvt.s32.f32 %v2985_v15 }
0x41ea   :  { %v4186_v43 = vpop.f32.mrf.mxu1 }
0x41eb   :  { %2989 = vmax.xlane.f32.xlu0 %v2988_v5 }
0x4201   :  { %3097 = vrot.lane.b32.xlu0 %v3095_v22, %s4457_s24 }
0x4274   :  { %v2990_v16 = vpop.xlane.xlu0 %2989 }
0x4275   :  { %vm2991_vm10 = vcmp.eq.f32.partialorder %v2988_v5, %v2990_v16  ;;  %v2996_v42 = vcvt.f32.s32 %v2990_v16 }
0x4276   :  { %v2992_v56 = vsel %vm2991_vm10, %v2987_v55, -inf  ;;  %v3496_v55 = vld [vmem:[%s5969_s4 + $0x1c] sm:$0xf]  ;;  %s4460_s4 = smov [#allocation2]  }
0x4277   :  { %2993 = vmax.xlane.f32.xlu1 %v2992_v56  ;;  %v2997_v2 = vshll.u32 %v2996_v42, 16 }
0x4278   :  { %v3098_v39 = vpop.permute.xlu0 %3097 }
0x4279   :  { %v3100_v30 = vsel %vm258_vm3, %v3095_v22, %v3098_v39 }
0x427a   :  { %v3102_v62 = vcombine.low %v3100_v30, %v3100_v30 }
0x427c   :  { %v3104_v54 = vmul.f32 %v5678_v20, %v3102_v62 }
0x427e   :  { %v3106_v0 = vcombine.high %v3104_v54, %v3104_v54 }
0x4280   :  { %v3109_v25 = vpack.c.bf16 %v3106_v0, %v3106_v0 }
0x4300   :  { %v2994_v1 = vpop.xlane.xlu1 %2993 }
0x4301   :  { %v2995_v10 = vcvt.f32.s32 %v2994_v1 }
0x4303   :  { %v2998_v12 = vadd.s32 %v2997_v2, %v2995_v10 }
0x4305   :  { %v2999_v59 = vand.u32 31, %v2998_v12 }
0x4307   :  { %v3000_v63 = vsub.s32 31, %v2999_v59 }
0x4309   :  { %vm3001_vm13 = vcmp.eq.s32.totalorder %v4541_v4, %v3000_v63  ;;  %v5903_v7 = vsel %vm3384_vm12, %v5683_v60, %v3000_v63  ;;  %v3108_v4 = vpack.c.bf16 %v3104_v54, %v3104_v54 }
0x430a   :  { %v3492_v8 = vsel %vm3001_vm13, 1.0, %v5995_v38 }
0x430b   :  { %v3004_v24 = vpack.c.bf16 %v3492_v8, %v3492_v8 }
0x430d   :  { %4176 = vmatmul.mubr.msk.bf16.vlgmr.msra.gmra.mxu0 %vm149_vm2, %v3004_v24 }
0x430e   :  { %3898 = vmatpush3.bf16.msra.mxu0 %v5541_v3  ;;  %3142 = vmatprep.mubr.bf16.mxu0 %v3109_v25 }
0x430f   :  { %3899 = vmatprep.subr.bf16.mxu0 %v5547_v57 }
0x4312   :  { %3900 = vmatpush3.bf16.msra.mxu0 %v5553_v48 }
0x4313   :  { %3901 = vmatprep.subr.bf16.mxu0 %v5559_v18 }
0x4316   :  { %3902 = vmatpush3.bf16.msra.mxu0 %v5565_v19 }
0x4317   :  { %3903 = vmatprep.subr.bf16.mxu0 %v5695_v52 }
0x431a   :  { %3904 = vmatpush3.bf16.msra.mxu0 %v5701_v17 }
0x431b   :  { %3905 = vmatprep.subr.bf16.mxu0 %v5707_v32 }
0x431e   :  { %3906 = vmatpush3.bf16.msra.mxu0 %v5713_v31 }
0x431f   :  { %3907 = vmatprep.subr.bf16.mxu0 %v5719_v44 }
0x4322   :  { %3908 = vmatpush3.bf16.msra.mxu0 %v5725_v49 }
0x4323   :  { %3909 = vmatprep.subr.bf16.mxu0 %v5731_v34 }
0x4326   :  { %3910 = vmatpush3.bf16.msra.mxu0 %v5737_v58 }
0x4327   :  { %3911 = vmatprep.subr.bf16.mxu0 %v5743_v37 }
0x432a   :  { %3912 = vmatpush3.bf16.msra.mxu0 %v5749_v9 }
0x432b   :  { %4187 = vmatprep.subr.bf16.mxu0 %v5995_v38 }
0x432d   :  { %3143 = vmatmul.mubr.bf16.vlgmr.msra.gmra.mxu0 %v3108_v4 }
0x432e   :  { %4188 = vmatpush3.bf16.msra.mxu0 %v5756_v46  ;;  %4191 = vmatprep.mubr.msk.bf16.mxu0 %vm4456_vm0, %v5995_v38 }
0x432f   :  { %4189 = vmatprep.subr.bf16.mxu0 %v5995_v38 }
0x4332   :  { %4190 = vmatpush3.bf16.msra.mxu0 %v5765_v47 }
0x43cd   :  { %v3042_v3 = vpop.f32.mrf.mxu0 }
0x43cf   :  { %v4177_v57 = vpop.f32.mrf.mxu0 }
0x43d1   :  { %v3045_v48 = vpop.f32.mrf.mxu0 }
0x43d3   :  { %v4178_v18 = vpop.f32.mrf.mxu0 }
0x43ed   :  { %v3913_v19 = vpop.f32.mrf.mxu0 }
0x43ef   :  { %v3914_v20 = vpop.f32.mrf.mxu0 }
0x43f0   :  { %v3915_v60 = vadd.f32 %v3914_v20, %v3913_v19 }
0x43f1   :  { %v3916_v52 = vpop.f32.mrf.mxu0 }
0x43f2   :  { %v3150_v17 = vsel %vm405_vm4, %v3915_v60, -inf }
0x43f3   :  { %v3917_v32 = vpop.f32.mrf.mxu0  ;;  %3151 = vmax.xlane.f32.xlu1 %v3150_v17 }
0x447c   :  { %v3152_v31 = vpop.xlane.xlu1 %3151 }
0x447d   :  { %v3153_v44 = vsub.f32 %v3915_v60, %v3152_v31 }
0x447f   :  { %v3154_v49 = vmul.f32 1.442695, %v3153_v44 }
0x4481   :  { %4334 = vpow2.f32 %v3154_v49 }
0x448e   :  { %v4335_v34 = vpop.eup %4334 }
0x448f   :  { %v3156_v58 = vsel %vm405_vm4, %v4335_v34, 0.0 }
0x4490   :  { %3157 = vadd.xlane.f32.xlu1 %v3156_v58 }
0x4519   :  { %v3158_v37 = vpop.xlane.xlu1 %3157 }
0x451a   :  { %4336 = vrcp.f32 %v3158_v37 }
0x4527   :  { %v4337_v9 = vpop.eup %4336 }
0x4528   :  { %v3160_v46 = vmul.f32 %v4337_v9, %v4335_v34 }
0x452a   :  { %3162 = vrot.lane.b32.xlu0 %v3160_v46, %s4458_s26 }
0x459c   :  { %v3163_v47 = vpop.permute.xlu0 %3162 }
0x459d   :  { %v3165_v27 = vsel %vm421_vm5, %v3160_v46, %v3163_v47 }
0x459e   :  { %3167 = vrot.lane.b32.xlu1 %v3165_v27, %s4459_s27 }
0x4610   :  { %v3168_v28 = vpop.permute.xlu1 %3167 }
0x4611   :  { %v3170_v21 = vsel %vm427_vm6, %v3165_v27, %v3168_v28 }
0x4612   :  { %3172 = vrot.lane.b32.xlu0 %v3170_v21, %s4454_s23 }
0x4684   :  { %v3173_v40 = vpop.permute.xlu0 %3172 }
0x4685   :  { %v3175_v35 = vsel %vm149_vm2, %v3170_v21, %v3173_v40 }
0x4686   :  { %3177 = vrot.lane.b32.xlu0 %v3175_v35, %s4457_s24 }
0x46f8   :  { %v3178_v23 = vpop.permute.xlu0 %3177 }
0x46f9   :  { %v3180_v29 = vsel %vm258_vm3, %v3175_v35, %v3178_v23  ;;  %vm3386_vm3 = vcmask 56320  }
0x46fa   :  { %v3182_v36 = vcombine.low %v3180_v29, %v3180_v29 }
0x46fc   :  { %v3184_v6 = vmul.f32 %v5784_v41, %v3182_v36 }
0x46fe   :  { %v3186_v14 = vcombine.high %v3184_v6, %v3184_v6  ;;  %v3188_v43 = vpack.c.bf16 %v3184_v6, %v3184_v6 }
0x4700   :  { %v3189_v5 = vpack.c.bf16 %v3186_v14, %v3186_v14 }
0x4702   :  { %3222 = vmatprep.mubr.bf16.mxu1 %v3189_v5 }
0x4703   :  { %3223 = vmatmul.mubr.bf16.vlgmr.msra.gmra.mxu1 %v3188_v43 }
0x4704   :  { %4196 = vmatpush3.bf16.msra.mxu1 %v5790_v33  ;;  %4199 = vmatprep.mubr.msk.bf16.mxu1 %vm4456_vm0, %v5995_v38  ;;  %v3276_v33 = vadd.f32 %v3496_v55, %v5894_v61 }
0x4705   :  { %4197 = vmatprep.subr.bf16.mxu1 %v5995_v38 }
0x4708   :  { %4198 = vmatpush3.bf16.msra.mxu1 %v5799_v53 }
0x47c3   :  { %v3935_v51 = vpop.f32.mrf.mxu1 }
0x47c5   :  { %v3936_v50 = vpop.f32.mrf.mxu1 }
0x47c6   :  { %v3937_v22 = vadd.f32 %v3936_v50, %v3935_v51 }
0x47c7   :  { %v3938_v15 = vpop.f32.mrf.mxu1 }
0x47c8   :  { %v3230_v16 = vpack.c.bf16 %v3937_v22, %v3937_v22 }
0x47c9   :  { %v3939_v41 = vpop.f32.mrf.mxu1 }
0x47ca   :  { %4192 = vmatmul.mubr.msk.bf16.vlgmr.msra.gmra.mxu0 %vm149_vm2, %v3230_v16 }
0x488a   :  { %v3268_v56 = vpop.f32.mrf.mxu0 }
0x488b   :  { %v3277_v39 = vadd.f32 %v3276_v33, %v3268_v56 }
0x488c   :  { %v4193_v42 = vpop.f32.mrf.mxu0 }
0x488d   :  { %v3278_v38 = vadd.f32 %v3277_v39, %v3042_v3 }
0x488e   :  { %v3271_v30 = vpop.f32.mrf.mxu0 }
0x488f   :  { %v3497_v53 = vmul.f32 -1.442695, %v3278_v38 }
0x4890   :  { %v4194_v62 = vpop.f32.mrf.mxu0 }
0x4891   :  { %4338 = vpow2.f32 %v3497_v53 }
0x4892   :  { %4340 = vtanh.f32 %v3278_v38 }
0x489e   :  { %v4339_v1 = vpop.eup %4338 }
0x489f   :  { %v3283_v2 = vadd.f32 1.0, %v4339_v1  ;;  %v4341_v10 = vpop.eup %4340 }
0x48a1   :  { %4342 = vrcp.f32 %v3283_v2 }
0x48ae   :  { %v4343_v12 = vpop.eup %4342 }
0x48af   :  { %v3286_v54 = vsel %vm4826_vm9, %v4341_v10, %v4343_v12 }
0x48b0   :  { %3289 = vrot.lane.b32.xlu0 %v3286_v54, %s4457_s24  ;;  %v3287_v63 = vmul.f32 %v3286_v54, %v5820_v26 }
0x4922   :  { %v3290_v61 = vpop.permute.xlu0 %3289 }
0x4923   :  { %v3292_v59 = vmul.f32 %v3290_v61, %v3286_v54 }
0x4925   :  { %3294 = vrot.lane.b32.xlu0 %v3292_v59, %s4454_s23 }
0x4997   :  { %v3295_v0 = vpop.permute.xlu0 %3294 }
0x4998   :  { %v3297_v8 = vadd.f32 %v3295_v0, %v3287_v63 }
0x499a   :  { %4344 = vtanh.f32 %v3297_v8 }
0x49a7   :  { %v4345_v24 = vpop.eup %4344 }
0x49a8   :  { %3300 = vrot.lane.b32.xlu1 %v4345_v24, %s4457_s24 }
0x4a1a   :  { %v3301_v25 = vpop.permute.xlu1 %3300 }
0x4a1b   :  { %v3303_v4 = vmul.f32 %v3301_v25, %v3286_v54 }
0x4a1d   :  { %v3304_v3 = vpack.c.bf16 %v3303_v4, %v3303_v4 }
0x4a1f   :  { %3306 = vrot.lane.b32.xlu0 %v3304_v3, %s4454_s23  ;;  %s3395_s23 = sshll.u32 %s4460_s4, 4  ;;  %s3396_s23 = int_to_ptr.vmem [resolvable:$true] %s3395_s23 }
0x4a20   :  { %s4432_s24 = scalar_lea.vmem %s3396_s23, 64  ;;  %p4437_p1 = scmp.lt.s32.totalorder %s3396_s23, %s3396_s23 }
0x4a21   :  { %p4433_p0 = scmp.ne.s32.totalorder %s3396_s23, %s4432_s24  ;;  %p4438_p2 = scmp.lt.s32.totalorder %s4432_s24, %s4432_s24 }
0x4a23   :  { %p4439_p3 = por %p4438_p2, %p4437_p1 }
0x4a25   :  { %p4440_p4 = pnand %p4439_p3, %p4433_p0 }
0x4a91   :  { %v3307_v45 = vpop.permute.xlu0 %3306 }
0x4a92   :  { %4200 = vmatmul.mubr.msk.bf16.vlgmr.msra.gmra.mxu1 %vm149_vm2, %v3307_v45 }
0x4b52   :  { %v3345_v57 = vpop.f32.mrf.mxu1 }
0x4b53   :  { %v3346_v48 = vadd.f32 %v5890_v11, %v3345_v57 }
0x4b54   :  { %v4201_v18 = vpop.f32.mrf.mxu1 }
0x4b55   :  { %vm3352_vm0 = vcmp.ge.s32.totalorder %v3346_v48, 0  ;;  %v3353_v26 = vxor.u32 2147483647, %v3346_v48 }
0x4b56   :  { %v3348_v19 = vpop.f32.mrf.mxu1 }
0x4b57   :  { %v3354_v20 = vsel %vm3352_vm0, %v3346_v48, %v3353_v26 }
0x4b58   :  { %v3355_v60 = vand.u32 4294967264, %v3354_v20  ;;  %v4202_v52 = vpop.f32.mrf.mxu1 }
0x4b5a   :  { %v3356_v17 = vor.u32 %v3355_v60, %v6004_v13 }
0x4b5c   :  { %v3357_v32 = vsel %vm745_vm11, %v3356_v17, 2147483648 }
0x4b5d   :  { %v3359_v31 = vshra.s32 %v3357_v32, 16  ;;  %v3358_v49 = vand.u32 65535, %v3357_v32 }
0x4b5f   :  { %v3361_v44 = vcvt.s32.f32 %v3359_v31  ;;  %v3360_v58 = vcvt.s32.f32 %v3358_v49 }
0x4b61   :  { %3362 = vmax.xlane.f32.xlu1 %v3361_v44 }
0x4bea   :  { %v3363_v34 = vpop.xlane.xlu1 %3362 }
0x4beb   :  { %vm3364_vm2 = vcmp.eq.f32.partialorder %v3361_v44, %v3363_v34  ;;  %v3369_v11 = vcvt.f32.s32 %v3363_v34 }
0x4bec   :  { %v3365_v37 = vsel %vm3364_vm2, %v3360_v58, -inf }
0x4bed   :  { %3366 = vmax.xlane.f32.xlu0 %v3365_v37  ;;  %v3370_v46 = vshll.u32 %v3369_v11, 16 }
0x4c76   :  { %v3367_v9 = vpop.xlane.xlu0 %3366 }
0x4c77   :  { %v3368_v47 = vcvt.f32.s32 %v3367_v9 }
0x4c79   :  { %v3371_v27 = vadd.s32 %v3370_v46, %v3368_v47 }
0x4c7b   :  { %v3372_v28 = vand.u32 31, %v3371_v27 }
0x4c7d   :  { %v3373_v13 = vsub.s32 31, %v3372_v28 }
0x4c7f   :  { %v3387_v21 = vsel %vm3386_vm3, %v5903_v7, %v3373_v13 }
0x4c80   :  { %3388 = vst.msk [vmem:[#allocation2] sm:$0xf] %vm405_vm4, %v3387_v21 }
0x4c81   :  { %4443 = shalt.err (!%p4440_p4)
}
0x4c82   :  { %3398 = dma.vmem_to_hbm [thread:$0]  %s3396_s23, 64, %s5977_s12, [#allocation3]  }
0x4c83   :  { %4452 = dma.done.wait [#allocation3], 64  }
0x4c84   :  { %4453 = vsyncadd [#allocation3], 4294967232 }
0x4c85   :  { %3402 = vsyncpa [#allocation3], 1 }

</bundles_post_ra>
